<compile_context>
chip_gen: v6e
topology: v6e:2x2x1
jax: 0.10.0
libtpu: 0.0.40
codegen_flags: <defaults>
</compile_context>

<pallas_src>
import math

import jax
import jax.numpy as jnp
from jax import lax
from jax.experimental import pallas as pl
from jax.experimental.pallas import tpu as pltpu

GN_EPS = 1e-6
NUM_GROUPS = 32
MM_DTYPE = jnp.bfloat16          # MXU operand dtype (accumulation is always f32)


# ---------------------------------------------------------------------------
# In-kernel helpers
# ---------------------------------------------------------------------------
def _silu(x):
    return x * jax.nn.sigmoid(x)


def _group_norm(xf, gamma, beta, memb):
    """GroupNorm on (HW, C) f32 values.

    memb is a (G, C) 0/1 membership matrix (memb[g, c] = 1 iff channel c is in
    group g).  Group aggregation = two tiny MXU matmuls (contracted with
    dot_general so no transpose is materialized); two-pass variance.
    """
    hw, c = xf.shape
    g = memb.shape[0]
    n = float(hw * (c // g))
    csum = jnp.sum(xf, axis=0, keepdims=True)                          # (1, C)
    gsum = lax.dot_general(csum, memb, (((1,), (1,)), ((), ())),
                           preferred_element_type=jnp.float32)          # (1, G)
    mean = jnp.dot(gsum, memb, preferred_element_type=jnp.float32) / n  # (1, C)
    d = xf - mean
    csq = jnp.sum(d * d, axis=0, keepdims=True)                         # (1, C)
    gsq = lax.dot_general(csq, memb, (((1,), (1,)), ((), ())),
                          preferred_element_type=jnp.float32)           # (1, G)
    var = jnp.dot(gsq, memb, preferred_element_type=jnp.float32) / n    # (1, C)
    return d * lax.rsqrt(var + GN_EPS) * gamma + beta


def _conv3x3(h_hwc, w_ref, bias, hpad_ref, H, W, mm_dtype):
    """3x3 SAME conv as 9 accumulated MXU matmuls.

    h_hwc: (H, W, Cin) f32 value; w_ref: (9, Cin, Cout) ref (bf16);
    bias: (1, Cout) f32; hpad_ref: (H+2, W+2, Cin) f32 VMEM scratch whose zero
    border implements the SAME padding.  Returns (H*W, Cout) f32.
    """
    cin = h_hwc.shape[-1]
    cout = w_ref.shape[-1]
    # Re-zero every grid step (megacore-safe; border stays zero, interior is
    # overwritten below).
    hpad_ref[...] = jnp.zeros_like(hpad_ref)
    hpad_ref[1:H + 1, 1:W + 1, :] = h_hwc
    hp = hpad_ref[...]
    acc = jnp.zeros((H * W, cout), jnp.float32)
    for k in range(9):                                   # static unroll: 9 MXU pushes
        dy, dx = k // 3, k % 3
        tap = hp[dy:dy + H, dx:dx + W, :].reshape(H * W, cin).astype(mm_dtype)
        acc = acc + jnp.dot(tap, w_ref[k], preferred_element_type=jnp.float32)
    return acc + bias


# ---------------------------------------------------------------------------
# Kernel factory (static config: shapes + which optional branches exist)
# ---------------------------------------------------------------------------
def make_resnet_block_kernel(H, W, cin, cout, has_temb, has_nin, mm_dtype):
    HW = H * W

    def kernel(*refs):
        it = iter(refs)
        x_ref = next(it)                              # (H, W, Cin)   f32
        memb0 = next(it)                              # (G, Cin)      f32
        gn0_g, gn0_b = next(it), next(it)             # (1, Cin)      f32
        w0, b0 = next(it), next(it)                   # (9,Cin,Cout) bf16, (1,Cout) f32
        if has_temb:
            temb = next(it)                           # (1, Td)       f32
            wd, bd = next(it), next(it)               # (Td,Cout) bf16, (1,Cout) f32
        memb1 = next(it)                              # (G, Cout)     f32
        gn1_g, gn1_b = next(it), next(it)             # (1, Cout)     f32
        w1, b1 = next(it), next(it)                   # (9,Cout,Cout) bf16, (1,Cout) f32
        if has_nin:
            wn, bn = next(it), next(it)               # (Cin,Cout) bf16, (1,Cout) f32
        out_ref = next(it)                            # (H, W, Cout)
        hpad0 = next(it)                              # (H+2, W+2, Cin)  f32 scratch
        hpad1 = next(it)                              # (H+2, W+2, Cout) f32 scratch

        x = x_ref[...].astype(jnp.float32).reshape(HW, cin)

        # --- GroupNorm_0 + SiLU ---
        h = _silu(_group_norm(x, gn0_g[...], gn0_b[...], memb0[...]))

        # --- Conv_0 : 3x3 SAME, Cin -> Cout ---
        h = _conv3x3(h.reshape(H, W, cin), w0, b0[...], hpad0, H, W, mm_dtype)

        # --- time-embedding projection: h += Dense_0(SiLU(temb)) ---
        if has_temb:
            t = _silu(temb[...].astype(jnp.float32)).astype(mm_dtype)   # (1, Td)
            h = h + (jnp.dot(t, wd[...], preferred_element_type=jnp.float32)
                     + bd[...])                                         # broadcast over HW

        # --- GroupNorm_1 + SiLU ---
        h = _silu(_group_norm(h, gn1_g[...], gn1_b[...], memb1[...]))
        # Dropout_0: identity (inference forward).
        # TODO(synk): training-mode dropout (p=0.1) via pltpu.prng_seed /
        #             pltpu.prng_random_bits if required.

        # --- Conv_1 : 3x3 SAME, Cout -> Cout ---
        h = _conv3x3(h.reshape(H, W, cout), w1, b1[...], hpad1, H, W, mm_dtype)

        # --- shortcut: NIN (1x1) when Cin != Cout, identity otherwise ---
        if has_nin:
            xs = (jnp.dot(x.astype(mm_dtype), wn[...],
                          preferred_element_type=jnp.float32) + bn[...])
        else:
            xs = x

        out_ref[...] = (xs + h).reshape(H, W, cout).astype(out_ref.dtype)

    return kernel


# ---------------------------------------------------------------------------
# Wrapper: NCHW in / NCHW out (like the PyTorch module), grid over batch.
# ---------------------------------------------------------------------------
def _group_membership(c, groups):
    gid = jnp.arange(c) // (c // groups)
    return (jnp.arange(groups)[:, None] == gid[None, :]).astype(jnp.float32)  # (G, C)


def resnet_block_ddpm(x_nchw, params, temb=None, mm_dtype=MM_DTYPE):
    B, cin, H, W = map(int, x_nchw.shape)
    cout = int(params["w_conv0"].shape[-1])
    assert cin % NUM_GROUPS == 0 and cout % NUM_GROUPS == 0, \
        "GroupNorm(32) needs channels divisible by 32"
    has_temb = temb is not None
    has_nin = cin != cout
    G = NUM_GROUPS

    # NCHW -> NHWC so channels are the lane dimension inside the kernel.
    x_nhwc = jnp.transpose(x_nchw, (0, 2, 3, 1))

    def row(v):
        return jnp.asarray(v, jnp.float32).reshape(1, -1)

    def const_spec(shape):
        return pl.BlockSpec(tuple(shape), lambda b: (0,) * len(shape))

    operands = [x_nhwc]
    in_specs = [pl.BlockSpec((None, H, W, cin), lambda b: (b, 0, 0, 0))]

    def add(arr, spec=None):
        operands.append(arr)
        in_specs.append(spec if spec is not None else const_spec(arr.shape))

    add(_group_membership(cin, G))
    add(row(params["gn0_gamma"]))
    add(row(params["gn0_beta"]))
    add(jnp.asarray(params["w_conv0"], jnp.float32)
        .reshape(9, cin, cout).astype(mm_dtype))
    add(row(params["b_conv0"]))
    if has_temb:
        td = int(temb.shape[-1])
        add(jnp.asarray(temb, jnp.float32).reshape(B, 1, td),
            pl.BlockSpec((None, 1, td), lambda b: (b, 0, 0)))
        add(jnp.asarray(params["w_dense"], jnp.float32).astype(mm_dtype))
        add(row(params["b_dense"]))
    add(_group_membership(cout, G))
    add(row(params["gn1_gamma"]))
    add(row(params["gn1_beta"]))
    add(jnp.asarray(params["w_conv1"], jnp.float32)
        .reshape(9, cout, cout).astype(mm_dtype))
    add(row(params["b_conv1"]))
    if has_nin:
        add(jnp.asarray(params["w_nin"], jnp.float32).astype(mm_dtype))
        add(row(params["b_nin"]))

    kernel = make_resnet_block_kernel(H, W, cin, cout, has_temb, has_nin, mm_dtype)

    # Advisory cost estimate so XLA can schedule neighbors around the call.
    flops = 2 * B * H * W * 9 * (cin * cout + cout * cout)
    if has_nin:
        flops += 2 * B * H * W * cin * cout
    if has_temb:
        flops += 2 * B * int(temb.shape[-1]) * cout
    bytes_accessed = int(x_nhwc.size) * 4 + B * H * W * cout * 4
    bytes_accessed += sum(int(o.size) * o.dtype.itemsize for o in operands[1:])
    cost = pl.CostEstimate(flops=int(flops),
                           transcendentals=int(B * H * W * (cin + cout)),
                           bytes_accessed=int(bytes_accessed))

    out_nhwc = pl.pallas_call(
        kernel,
        out_shape=jax.ShapeDtypeStruct((B, H, W, cout), x_nchw.dtype),
        grid=(B,),
        in_specs=in_specs,
        out_specs=pl.BlockSpec((None, H, W, cout), lambda b: (b, 0, 0, 0)),
        scratch_shapes=[pltpu.VMEM((H + 2, W + 2, cin), jnp.float32),
                        pltpu.VMEM((H + 2, W + 2, cout), jnp.float32)],
        compiler_params=pltpu.CompilerParams(
            dimension_semantics=("parallel",),
            vmem_limit_bytes=64 * 1024 * 1024),
        cost_estimate=cost,
    )(*operands)

    return jnp.transpose(out_nhwc, (0, 3, 1, 2))


# ---------------------------------------------------------------------------
# Deterministic parameter init (DDPM fan_avg-uniform for weights).
# ---------------------------------------------------------------------------
def _fan_avg_uniform(key, shape, fan_in, fan_out, scale):
    scale = 1e-10 if scale == 0 else scale
    variance = scale / ((fan_in + fan_out) / 2.0)
    bound = math.sqrt(3.0 * variance)
    return jax.random.uniform(key, shape, jnp.float32, -bound, bound)


def make_params(key, in_ch, out_ch, temb_dim):
    """JAX-layout params (conv: HWIO, dense/NIN: (in, out)).

    Weight scales follow the module's default_init; biases / GroupNorm affine
    params get small random values (the module zeroes them and uses
    init_scale=0 for Conv_1) so the numeric check exercises every term --
    forward semantics are identical for any parameter values.
    """
    ks = jax.random.split(key, 12)
    p = {
        "gn0_gamma": 1.0 + 0.1 * jax.random.normal(ks[0], (in_ch,), jnp.float32),
        "gn0_beta": 0.1 * jax.random.normal(ks[1], (in_ch,), jnp.float32),
        "w_conv0": _fan_avg_uniform(ks[2], (3, 3, in_ch, out_ch),
                                    9 * in_ch, 9 * out_ch, 1.0),
        "b_conv0": 0.1 * jax.random.normal(ks[3], (out_ch,), jnp.float32),
        "w_dense": _fan_avg_uniform(ks[4], (temb_dim, out_ch),
                                    temb_dim, out_ch, 1.0),
        "b_dense": 0.1 * jax.random.normal(ks[5], (out_ch,), jnp.float32),
        "gn1_gamma": 1.0 + 0.1 * jax.random.normal(ks[6], (out_ch,), jnp.float32),
        "gn1_beta": 0.1 * jax.random.normal(ks[7], (out_ch,), jnp.float32),
        "w_conv1": _fan_avg_uniform(ks[8], (3, 3, out_ch, out_ch),
                                    9 * out_ch, 9 * out_ch, 1.0),
        "b_conv1": 0.1 * jax.random.normal(ks[9], (out_ch,), jnp.float32),
    }
    if in_ch != out_ch:
        p["w_nin"] = _fan_avg_uniform(ks[10], (in_ch, out_ch), out_ch, in_ch, 0.1)
        p["b_nin"] = 0.1 * jax.random.normal(ks[11], (out_ch,), jnp.float32)
    return p


# ---------------------------------------------------------------------------
# Pure-JAX fp32 reference mirroring the PyTorch forward (eval mode).
# ---------------------------------------------------------------------------
def resnet_block_ref(x, params, temb=None):
    B, cin, H, W = x.shape
    cout = params["w_conv0"].shape[-1]
    act = jax.nn.silu

    def gn(t, gamma, beta):
        b, c, hh, ww = t.shape
        tg = t.reshape(b, NUM_GROUPS, c // NUM_GROUPS, hh, ww)
        mean = tg.mean(axis=(2, 3, 4), keepdims=True)
        var = tg.var(axis=(2, 3, 4), keepdims=True)
        tn = ((tg - mean) / jnp.sqrt(var + GN_EPS)).reshape(b, c, hh, ww)
        return tn * gamma[None, :, None, None] + beta[None, :, None, None]

    def conv3x3(t, w, b):
        y = lax.conv_general_dilated(t, w, (1, 1), "SAME",
                                     dimension_numbers=("NCHW", "HWIO", "NCHW"))
        return y + b[None, :, None, None]

    h = act(gn(x, params["gn0_gamma"], params["gn0_beta"]))
    h = conv3x3(h, params["w_conv0"], params["b_conv0"])
    if temb is not None:
        h = h + (act(temb) @ params["w_dense"] + params["b_dense"])[:, :, None, None]
    h = act(gn(h, params["gn1_gamma"], params["gn1_beta"]))
    h = conv3x3(h, params["w_conv1"], params["b_conv1"])     # Dropout = identity (eval)
    if cin != cout:
        x = (jnp.einsum("bchw,cd->bdhw", x, params["w_nin"])
             + params["b_nin"][None, :, None, None])
    return x + h


if __name__ == "__main__":
    # TODO(synk): conv_shortcut=True (Conv_2 3x3 shortcut) is not implemented;
    #             the default NIN / identity shortcut paths are.
    B, IN_CH, OUT_CH, H, W, TEMB = 2, 64, 128, 8, 8, 128
    key = jax.random.PRNGKey(0)
    kx, kt, kp = jax.random.split(key, 3)
    x = jax.random.normal(kx, (B, IN_CH, H, W), jnp.float32)
    temb = jax.random.normal(kt, (B, TEMB), jnp.float32)
    params = make_params(kp, IN_CH, OUT_CH, TEMB)

    out = jax.block_until_ready(resnet_block_ddpm(x, params, temb))
    ref = resnet_block_ref(x, params, temb)

    assert out.shape == (B, OUT_CH, H, W) and out.dtype == x.dtype
    # bf16 MXU operands (f32 accumulation) vs. the fp32 reference: typical
    # deviation ~1e-3, worst-case ~1e-2 at unit activation scale.
    err = float(jnp.max(jnp.abs(out - ref)))
    assert jnp.allclose(out, ref, atol=4e-2, rtol=4e-2), f"max abs err {err}"
    print("KERNEL_OK")
</pallas_src>

<mosaic_0001>
module attributes {stable_mosaic.version = 11 : i64} {
  func.func @kernel(%arg0: i32, %arg1: memref<1x8x8x64xf32, #tpu.memory_space<vmem>>, %arg2: memref<32x64xf32, #tpu.memory_space<vmem>>, %arg3: memref<1x64xf32, #tpu.memory_space<vmem>>, %arg4: memref<1x64xf32, #tpu.memory_space<vmem>>, %arg5: memref<9x64x128xbf16, #tpu.memory_space<vmem>>, %arg6: memref<1x128xf32, #tpu.memory_space<vmem>>, %arg7: memref<1x1x128xf32, #tpu.memory_space<vmem>>, %arg8: memref<128x128xbf16, #tpu.memory_space<vmem>>, %arg9: memref<1x128xf32, #tpu.memory_space<vmem>>, %arg10: memref<32x128xf32, #tpu.memory_space<vmem>>, %arg11: memref<1x128xf32, #tpu.memory_space<vmem>>, %arg12: memref<1x128xf32, #tpu.memory_space<vmem>>, %arg13: memref<9x128x128xbf16, #tpu.memory_space<vmem>>, %arg14: memref<1x128xf32, #tpu.memory_space<vmem>>, %arg15: memref<64x128xbf16, #tpu.memory_space<vmem>>, %arg16: memref<1x128xf32, #tpu.memory_space<vmem>>, %arg17: memref<1x8x8x128xf32, #tpu.memory_space<vmem>>, %arg18: memref<10x10x64xf32, #tpu.memory_space<vmem>>, %arg19: memref<10x10x128xf32, #tpu.memory_space<vmem>>) attributes {dimension_semantics = [#tpu.dimension_semantics<parallel>], iteration_bounds = array<i64: 2>, scalar_prefetch = 0 : i64, scratch_operands = 2 : i64, tpu.core_type = #tpu.core_type<tc>, window_params = [{transform_indices = @transform_0, window_bounds = array<i64: 1, 8, 8, 64>}, {pipeline_mode = #tpu.pipeline_mode<synchronous>, transform_indices = @transform_1, window_bounds = array<i64: 32, 64>}, {pipeline_mode = #tpu.pipeline_mode<synchronous>, transform_indices = @transform_2, window_bounds = array<i64: 1, 64>}, {pipeline_mode = #tpu.pipeline_mode<synchronous>, transform_indices = @transform_3, window_bounds = array<i64: 1, 64>}, {pipeline_mode = #tpu.pipeline_mode<synchronous>, transform_indices = @transform_4, window_bounds = array<i64: 9, 64, 128>}, {pipeline_mode = #tpu.pipeline_mode<synchronous>, transform_indices = @transform_5, window_bounds = array<i64: 1, 128>}, {transform_indices = @transform_6, window_bounds = array<i64: 1, 1, 128>}, {pipeline_mode = #tpu.pipeline_mode<synchronous>, transform_indices = @transform_7, window_bounds = array<i64: 128, 128>}, {pipeline_mode = #tpu.pipeline_mode<synchronous>, transform_indices = @transform_8, window_bounds = array<i64: 1, 128>}, {pipeline_mode = #tpu.pipeline_mode<synchronous>, transform_indices = @transform_9, window_bounds = array<i64: 32, 128>}, {pipeline_mode = #tpu.pipeline_mode<synchronous>, transform_indices = @transform_10, window_bounds = array<i64: 1, 128>}, {pipeline_mode = #tpu.pipeline_mode<synchronous>, transform_indices = @transform_11, window_bounds = array<i64: 1, 128>}, {pipeline_mode = #tpu.pipeline_mode<synchronous>, transform_indices = @transform_12, window_bounds = array<i64: 9, 128, 128>}, {pipeline_mode = #tpu.pipeline_mode<synchronous>, transform_indices = @transform_13, window_bounds = array<i64: 1, 128>}, {pipeline_mode = #tpu.pipeline_mode<synchronous>, transform_indices = @transform_14, window_bounds = array<i64: 64, 128>}, {pipeline_mode = #tpu.pipeline_mode<synchronous>, transform_indices = @transform_15, window_bounds = array<i64: 1, 128>}, {transform_indices = @transform_16, window_bounds = array<i64: 1, 8, 8, 128>}]} {
    %c0 = arith.constant 0 : index
    %c0_0 = arith.constant 0 : index
    %c0_1 = arith.constant 0 : index
    %c0_2 = arith.constant 0 : index
    %0 = vector.load %arg1[%c0, %c0_0, %c0_1, %c0_2] : memref<1x8x8x64xf32, #tpu.memory_space<vmem>>, vector<1x8x8x64xf32>
    %1 = vector.shape_cast %0 : vector<1x8x8x64xf32> to vector<8x8x64xf32>
    %2 = vector.shape_cast %1 : vector<8x8x64xf32> to vector<64x64xf32>
    %c0_3 = arith.constant 0 : index
    %c0_4 = arith.constant 0 : index
    %3 = vector.load %arg3[%c0_3, %c0_4] : memref<1x64xf32, #tpu.memory_space<vmem>>, vector<1x64xf32>
    %c0_5 = arith.constant 0 : index
    %c0_6 = arith.constant 0 : index
    %4 = vector.load %arg4[%c0_5, %c0_6] : memref<1x64xf32, #tpu.memory_space<vmem>>, vector<1x64xf32>
    %c0_7 = arith.constant 0 : index
    %c0_8 = arith.constant 0 : index
    %5 = vector.load %arg2[%c0_7, %c0_8] : memref<32x64xf32, #tpu.memory_space<vmem>>, vector<32x64xf32>
    %cst = arith.constant dense<0.000000e+00> : vector<64xf32>
    %6 = vector.multi_reduction <add>, %2, %cst [0] : vector<64x64xf32> to vector<64xf32>
    %7 = vector.shape_cast %6 : vector<64xf32> to vector<1x64xf32>
    %cst_9 = arith.constant dense<0.000000e+00> : vector<1x32xf32>
    %8 = tpu.matmul %7, %5, %cst_9 {dimension_numbers = #tpu.dot_dimension_numbers<[1], [1], [0], [0], [0, 0, 1, 0], [], []>} : vector<1x64xf32>, vector<32x64xf32>, vector<1x32xf32> -> vector<1x32xf32>
    %cst_10 = arith.constant dense<0.000000e+00> : vector<1x64xf32>
    %9 = tpu.matmul %8, %5, %cst_10 {dimension_numbers = #tpu.dot_dimension_numbers<[1], [0], [0], [1], [0, 0, 1, 1], [], []>} : vector<1x32xf32>, vector<32x64xf32>, vector<1x64xf32> -> vector<1x64xf32>
    %cst_11 = arith.constant 1.280000e+02 : f32
    %10 = vector.broadcast %cst_11 : f32 to vector<1x64xf32>
    %11 = arith.divf %9, %10 : vector<1x64xf32>
    %12 = vector.broadcast %11 : vector<1x64xf32> to vector<64x64xf32>
    %13 = arith.subf %2, %12 : vector<64x64xf32>
    %14 = arith.mulf %13, %13 : vector<64x64xf32>
    %cst_12 = arith.constant dense<0.000000e+00> : vector<64xf32>
    %15 = vector.multi_reduction <add>, %14, %cst_12 [0] : vector<64x64xf32> to vector<64xf32>
    %16 = vector.shape_cast %15 : vector<64xf32> to vector<1x64xf32>
    %cst_13 = arith.constant dense<0.000000e+00> : vector<1x32xf32>
    %17 = tpu.matmul %16, %5, %cst_13 {dimension_numbers = #tpu.dot_dimension_numbers<[1], [1], [0], [0], [0, 0, 1, 0], [], []>} : vector<1x64xf32>, vector<32x64xf32>, vector<1x32xf32> -> vector<1x32xf32>
    %cst_14 = arith.constant dense<0.000000e+00> : vector<1x64xf32>
    %18 = tpu.matmul %17, %5, %cst_14 {dimension_numbers = #tpu.dot_dimension_numbers<[1], [0], [0], [1], [0, 0, 1, 1], [], []>} : vector<1x32xf32>, vector<32x64xf32>, vector<1x64xf32> -> vector<1x64xf32>
    %cst_15 = arith.constant 1.280000e+02 : f32
    %19 = vector.broadcast %cst_15 : f32 to vector<1x64xf32>
    %20 = arith.divf %18, %19 : vector<1x64xf32>
    %cst_16 = arith.constant 9.99999997E-7 : f32
    %21 = vector.broadcast %cst_16 : f32 to vector<1x64xf32>
    %22 = arith.addf %20, %21 : vector<1x64xf32>
    %23 = math.rsqrt %22 : vector<1x64xf32>
    %24 = vector.broadcast %23 : vector<1x64xf32> to vector<64x64xf32>
    %25 = arith.mulf %13, %24 : vector<64x64xf32>
    %26 = vector.broadcast %3 : vector<1x64xf32> to vector<64x64xf32>
    %27 = arith.mulf %25, %26 : vector<64x64xf32>
    %28 = vector.broadcast %4 : vector<1x64xf32> to vector<64x64xf32>
    %29 = arith.addf %27, %28 : vector<64x64xf32>
    %30 = arith.negf %29 : vector<64x64xf32>
    %31 = math.exp %30 : vector<64x64xf32>
    %cst_17 = arith.constant 1.000000e+00 : f32
    %32 = vector.broadcast %cst_17 : f32 to vector<64x64xf32>
    %33 = arith.addf %32, %31 : vector<64x64xf32>
    %34 = arith.divf %32, %33 : vector<64x64xf32>
    %35 = arith.mulf %29, %34 : vector<64x64xf32>
    %36 = vector.shape_cast %35 : vector<64x64xf32> to vector<8x8x64xf32>
    %c0_18 = arith.constant 0 : index
    %c0_19 = arith.constant 0 : index
    %37 = vector.load %arg6[%c0_18, %c0_19] : memref<1x128xf32, #tpu.memory_space<vmem>>, vector<1x128xf32>
    %cst_20 = arith.constant 0.000000e+00 : f32
    %38 = vector.broadcast %cst_20 : f32 to vector<10x10x64xf32>
    %c0_21 = arith.constant 0 : index
    %c0_22 = arith.constant 0 : index
    %c0_23 = arith.constant 0 : index
    %39 = vector.load %arg18[%c0_21, %c0_22, %c0_23] : memref<10x10x64xf32, #tpu.memory_space<vmem>>, vector<10x10x64xf32>
    tpu.vector_store %arg18[%c0_21, %c0_22, %c0_23], %38 {strides = array<i32>} : memref<10x10x64xf32, #tpu.memory_space<vmem>>, vector<10x10x64xf32>,
    %c1 = arith.constant 1 : index
    %c1_24 = arith.constant 1 : index
    %c0_25 = arith.constant 0 : index
    %40 = vector.load %arg18[%c1, %c1_24, %c0_25] : memref<10x10x64xf32, #tpu.memory_space<vmem>>, vector<8x8x64xf32>
    tpu.vector_store %arg18[%c1, %c1_24, %c0_25], %36 {strides = array<i32>} : memref<10x10x64xf32, #tpu.memory_space<vmem>>, vector<8x8x64xf32>,
    %c0_26 = arith.constant 0 : index
    %c0_27 = arith.constant 0 : index
    %c0_28 = arith.constant 0 : index
    %41 = vector.load %arg18[%c0_26, %c0_27, %c0_28] : memref<10x10x64xf32, #tpu.memory_space<vmem>>, vector<10x10x64xf32>
    %cst_29 = arith.constant 0.000000e+00 : f32
    %42 = vector.broadcast %cst_29 : f32 to vector<64x128xf32>
    %43 = vector.extract_strided_slice %41 {offsets = [0, 0, 0], sizes = [8, 8, 64], strides = [1, 1, 1]} : vector<10x10x64xf32> to vector<8x8x64xf32>
    %44 = vector.shape_cast %43 : vector<8x8x64xf32> to vector<64x64xf32>
    %45 = arith.truncf %44 : vector<64x64xf32> to vector<64x64xbf16>
    %c0_30 = arith.constant 0 : index
    %c0_31 = arith.constant 0 : index
    %c0_32 = arith.constant 0 : index
    %46 = vector.load %arg5[%c0_30, %c0_31, %c0_32] : memref<9x64x128xbf16, #tpu.memory_space<vmem>>, vector<1x64x128xbf16>
    %47 = vector.shape_cast %46 : vector<1x64x128xbf16> to vector<64x128xbf16>
    %cst_33 = arith.constant dense<0.000000e+00> : vector<64x128xf32>
    %48 = tpu.matmul %45, %47, %cst_33 {dimension_numbers = #tpu.dot_dimension_numbers<[1], [0], [0], [1], [0, 0, 1, 1], [], []>} : vector<64x64xbf16>, vector<64x128xbf16>, vector<64x128xf32> -> vector<64x128xf32>
    %49 = arith.addf %42, %48 : vector<64x128xf32>
    %50 = vector.extract_strided_slice %41 {offsets = [0, 1, 0], sizes = [8, 8, 64], strides = [1, 1, 1]} : vector<10x10x64xf32> to vector<8x8x64xf32>
    %51 = vector.shape_cast %50 : vector<8x8x64xf32> to vector<64x64xf32>
    %52 = arith.truncf %51 : vector<64x64xf32> to vector<64x64xbf16>
    %c1_34 = arith.constant 1 : index
    %c0_35 = arith.constant 0 : index
    %c0_36 = arith.constant 0 : index
    %53 = vector.load %arg5[%c1_34, %c0_35, %c0_36] : memref<9x64x128xbf16, #tpu.memory_space<vmem>>, vector<1x64x128xbf16>
    %54 = vector.shape_cast %53 : vector<1x64x128xbf16> to vector<64x128xbf16>
    %cst_37 = arith.constant dense<0.000000e+00> : vector<64x128xf32>
    %55 = tpu.matmul %52, %54, %cst_37 {dimension_numbers = #tpu.dot_dimension_numbers<[1], [0], [0], [1], [0, 0, 1, 1], [], []>} : vector<64x64xbf16>, vector<64x128xbf16>, vector<64x128xf32> -> vector<64x128xf32>
    %56 = arith.addf %49, %55 : vector<64x128xf32>
    %57 = vector.extract_strided_slice %41 {offsets = [0, 2, 0], sizes = [8, 8, 64], strides = [1, 1, 1]} : vector<10x10x64xf32> to vector<8x8x64xf32>
    %58 = vector.shape_cast %57 : vector<8x8x64xf32> to vector<64x64xf32>
    %59 = arith.truncf %58 : vector<64x64xf32> to vector<64x64xbf16>
    %c2 = arith.constant 2 : index
    %c0_38 = arith.constant 0 : index
    %c0_39 = arith.constant 0 : index
    %60 = vector.load %arg5[%c2, %c0_38, %c0_39] : memref<9x64x128xbf16, #tpu.memory_space<vmem>>, vector<1x64x128xbf16>
    %61 = vector.shape_cast %60 : vector<1x64x128xbf16> to vector<64x128xbf16>
    %cst_40 = arith.constant dense<0.000000e+00> : vector<64x128xf32>
    %62 = tpu.matmul %59, %61, %cst_40 {dimension_numbers = #tpu.dot_dimension_numbers<[1], [0], [0], [1], [0, 0, 1, 1], [], []>} : vector<64x64xbf16>, vector<64x128xbf16>, vector<64x128xf32> -> vector<64x128xf32>
    %63 = arith.addf %56, %62 : vector<64x128xf32>
    %64 = vector.extract_strided_slice %41 {offsets = [1, 0, 0], sizes = [8, 8, 64], strides = [1, 1, 1]} : vector<10x10x64xf32> to vector<8x8x64xf32>
    %65 = vector.shape_cast %64 : vector<8x8x64xf32> to vector<64x64xf32>
    %66 = arith.truncf %65 : vector<64x64xf32> to vector<64x64xbf16>
    %c3 = arith.constant 3 : index
    %c0_41 = arith.constant 0 : index
    %c0_42 = arith.constant 0 : index
    %67 = vector.load %arg5[%c3, %c0_41, %c0_42] : memref<9x64x128xbf16, #tpu.memory_space<vmem>>, vector<1x64x128xbf16>
    %68 = vector.shape_cast %67 : vector<1x64x128xbf16> to vector<64x128xbf16>
    %cst_43 = arith.constant dense<0.000000e+00> : vector<64x128xf32>
    %69 = tpu.matmul %66, %68, %cst_43 {dimension_numbers = #tpu.dot_dimension_numbers<[1], [0], [0], [1], [0, 0, 1, 1], [], []>} : vector<64x64xbf16>, vector<64x128xbf16>, vector<64x128xf32> -> vector<64x128xf32>
    %70 = arith.addf %63, %69 : vector<64x128xf32>
    %71 = vector.extract_strided_slice %41 {offsets = [1, 1, 0], sizes = [8, 8, 64], strides = [1, 1, 1]} : vector<10x10x64xf32> to vector<8x8x64xf32>
    %72 = vector.shape_cast %71 : vector<8x8x64xf32> to vector<64x64xf32>
    %73 = arith.truncf %72 : vector<64x64xf32> to vector<64x64xbf16>
    %c4 = arith.constant 4 : index
    %c0_44 = arith.constant 0 : index
    %c0_45 = arith.constant 0 : index
    %74 = vector.load %arg5[%c4, %c0_44, %c0_45] : memref<9x64x128xbf16, #tpu.memory_space<vmem>>, vector<1x64x128xbf16>
    %75 = vector.shape_cast %74 : vector<1x64x128xbf16> to vector<64x128xbf16>
    %cst_46 = arith.constant dense<0.000000e+00> : vector<64x128xf32>
    %76 = tpu.matmul %73, %75, %cst_46 {dimension_numbers = #tpu.dot_dimension_numbers<[1], [0], [0], [1], [0, 0, 1, 1], [], []>} : vector<64x64xbf16>, vector<64x128xbf16>, vector<64x128xf32> -> vector<64x128xf32>
    %77 = arith.addf %70, %76 : vector<64x128xf32>
    %78 = vector.extract_strided_slice %41 {offsets = [1, 2, 0], sizes = [8, 8, 64], strides = [1, 1, 1]} : vector<10x10x64xf32> to vector<8x8x64xf32>
    %79 = vector.shape_cast %78 : vector<8x8x64xf32> to vector<64x64xf32>
    %80 = arith.truncf %79 : vector<64x64xf32> to vector<64x64xbf16>
    %c5 = arith.constant 5 : index
    %c0_47 = arith.constant 0 : index
    %c0_48 = arith.constant 0 : index
    %81 = vector.load %arg5[%c5, %c0_47, %c0_48] : memref<9x64x128xbf16, #tpu.memory_space<vmem>>, vector<1x64x128xbf16>
    %82 = vector.shape_cast %81 : vector<1x64x128xbf16> to vector<64x128xbf16>
    %cst_49 = arith.constant dense<0.000000e+00> : vector<64x128xf32>
    %83 = tpu.matmul %80, %82, %cst_49 {dimension_numbers = #tpu.dot_dimension_numbers<[1], [0], [0], [1], [0, 0, 1, 1], [], []>} : vector<64x64xbf16>, vector<64x128xbf16>, vector<64x128xf32> -> vector<64x128xf32>
    %84 = arith.addf %77, %83 : vector<64x128xf32>
    %85 = vector.extract_strided_slice %41 {offsets = [2, 0, 0], sizes = [8, 8, 64], strides = [1, 1, 1]} : vector<10x10x64xf32> to vector<8x8x64xf32>
    %86 = vector.shape_cast %85 : vector<8x8x64xf32> to vector<64x64xf32>
    %87 = arith.truncf %86 : vector<64x64xf32> to vector<64x64xbf16>
    %c6 = arith.constant 6 : index
    %c0_50 = arith.constant 0 : index
    %c0_51 = arith.constant 0 : index
    %88 = vector.load %arg5[%c6, %c0_50, %c0_51] : memref<9x64x128xbf16, #tpu.memory_space<vmem>>, vector<1x64x128xbf16>
    %89 = vector.shape_cast %88 : vector<1x64x128xbf16> to vector<64x128xbf16>
    %cst_52 = arith.constant dense<0.000000e+00> : vector<64x128xf32>
    %90 = tpu.matmul %87, %89, %cst_52 {dimension_numbers = #tpu.dot_dimension_numbers<[1], [0], [0], [1], [0, 0, 1, 1], [], []>} : vector<64x64xbf16>, vector<64x128xbf16>, vector<64x128xf32> -> vector<64x128xf32>
    %91 = arith.addf %84, %90 : vector<64x128xf32>
    %92 = vector.extract_strided_slice %41 {offsets = [2, 1, 0], sizes = [8, 8, 64], strides = [1, 1, 1]} : vector<10x10x64xf32> to vector<8x8x64xf32>
    %93 = vector.shape_cast %92 : vector<8x8x64xf32> to vector<64x64xf32>
    %94 = arith.truncf %93 : vector<64x64xf32> to vector<64x64xbf16>
    %c7 = arith.constant 7 : index
    %c0_53 = arith.constant 0 : index
    %c0_54 = arith.constant 0 : index
    %95 = vector.load %arg5[%c7, %c0_53, %c0_54] : memref<9x64x128xbf16, #tpu.memory_space<vmem>>, vector<1x64x128xbf16>
    %96 = vector.shape_cast %95 : vector<1x64x128xbf16> to vector<64x128xbf16>
    %cst_55 = arith.constant dense<0.000000e+00> : vector<64x128xf32>
    %97 = tpu.matmul %94, %96, %cst_55 {dimension_numbers = #tpu.dot_dimension_numbers<[1], [0], [0], [1], [0, 0, 1, 1], [], []>} : vector<64x64xbf16>, vector<64x128xbf16>, vector<64x128xf32> -> vector<64x128xf32>
    %98 = arith.addf %91, %97 : vector<64x128xf32>
    %99 = vector.extract_strided_slice %41 {offsets = [2, 2, 0], sizes = [8, 8, 64], strides = [1, 1, 1]} : vector<10x10x64xf32> to vector<8x8x64xf32>
    %100 = vector.shape_cast %99 : vector<8x8x64xf32> to vector<64x64xf32>
    %101 = arith.truncf %100 : vector<64x64xf32> to vector<64x64xbf16>
    %c8 = arith.constant 8 : index
    %c0_56 = arith.constant 0 : index
    %c0_57 = arith.constant 0 : index
    %102 = vector.load %arg5[%c8, %c0_56, %c0_57] : memref<9x64x128xbf16, #tpu.memory_space<vmem>>, vector<1x64x128xbf16>
    %103 = vector.shape_cast %102 : vector<1x64x128xbf16> to vector<64x128xbf16>
    %cst_58 = arith.constant dense<0.000000e+00> : vector<64x128xf32>
    %104 = tpu.matmul %101, %103, %cst_58 {dimension_numbers = #tpu.dot_dimension_numbers<[1], [0], [0], [1], [0, 0, 1, 1], [], []>} : vector<64x64xbf16>, vector<64x128xbf16>, vector<64x128xf32> -> vector<64x128xf32>
    %105 = arith.addf %98, %104 : vector<64x128xf32>
    %106 = vector.broadcast %37 : vector<1x128xf32> to vector<64x128xf32>
    %107 = arith.addf %105, %106 : vector<64x128xf32>
    %c0_59 = arith.constant 0 : index
    %c0_60 = arith.constant 0 : index
    %c0_61 = arith.constant 0 : index
    %108 = vector.load %arg7[%c0_59, %c0_60, %c0_61] : memref<1x1x128xf32, #tpu.memory_space<vmem>>, vector<1x1x128xf32>
    %109 = vector.shape_cast %108 : vector<1x1x128xf32> to vector<1x128xf32>
    %110 = arith.negf %109 : vector<1x128xf32>
    %111 = math.exp %110 : vector<1x128xf32>
    %cst_62 = arith.constant 1.000000e+00 : f32
    %112 = vector.broadcast %cst_62 : f32 to vector<1x128xf32>
    %113 = arith.addf %112, %111 : vector<1x128xf32>
    %114 = arith.divf %112, %113 : vector<1x128xf32>
    %115 = arith.mulf %109, %114 : vector<1x128xf32>
    %116 = arith.truncf %115 : vector<1x128xf32> to vector<1x128xbf16>
    %c0_63 = arith.constant 0 : index
    %c0_64 = arith.constant 0 : index
    %117 = vector.load %arg8[%c0_63, %c0_64] : memref<128x128xbf16, #tpu.memory_space<vmem>>, vector<128x128xbf16>
    %cst_65 = arith.constant dense<0.000000e+00> : vector<1x128xf32>
    %118 = tpu.matmul %116, %117, %cst_65 {dimension_numbers = #tpu.dot_dimension_numbers<[1], [0], [0], [1], [0, 0, 1, 1], [], []>} : vector<1x128xbf16>, vector<128x128xbf16>, vector<1x128xf32> -> vector<1x128xf32>
    %c0_66 = arith.constant 0 : index
    %c0_67 = arith.constant 0 : index
    %119 = vector.load %arg9[%c0_66, %c0_67] : memref<1x128xf32, #tpu.memory_space<vmem>>, vector<1x128xf32>
    %120 = arith.addf %118, %119 : vector<1x128xf32>
    %121 = vector.broadcast %120 : vector<1x128xf32> to vector<64x128xf32>
    %122 = arith.addf %107, %121 : vector<64x128xf32>
    %c0_68 = arith.constant 0 : index
    %c0_69 = arith.constant 0 : index
    %123 = vector.load %arg11[%c0_68, %c0_69] : memref<1x128xf32, #tpu.memory_space<vmem>>, vector<1x128xf32>
    %c0_70 = arith.constant 0 : index
    %c0_71 = arith.constant 0 : index
    %124 = vector.load %arg12[%c0_70, %c0_71] : memref<1x128xf32, #tpu.memory_space<vmem>>, vector<1x128xf32>
    %c0_72 = arith.constant 0 : index
    %c0_73 = arith.constant 0 : index
    %125 = vector.load %arg10[%c0_72, %c0_73] : memref<32x128xf32, #tpu.memory_space<vmem>>, vector<32x128xf32>
    %cst_74 = arith.constant dense<0.000000e+00> : vector<128xf32>
    %126 = vector.multi_reduction <add>, %122, %cst_74 [0] : vector<64x128xf32> to vector<128xf32>
    %127 = vector.shape_cast %126 : vector<128xf32> to vector<1x128xf32>
    %cst_75 = arith.constant dense<0.000000e+00> : vector<1x32xf32>
    %128 = tpu.matmul %127, %125, %cst_75 {dimension_numbers = #tpu.dot_dimension_numbers<[1], [1], [0], [0], [0, 0, 1, 0], [], []>} : vector<1x128xf32>, vector<32x128xf32>, vector<1x32xf32> -> vector<1x32xf32>
    %cst_76 = arith.constant dense<0.000000e+00> : vector<1x128xf32>
    %129 = tpu.matmul %128, %125, %cst_76 {dimension_numbers = #tpu.dot_dimension_numbers<[1], [0], [0], [1], [0, 0, 1, 1], [], []>} : vector<1x32xf32>, vector<32x128xf32>, vector<1x128xf32> -> vector<1x128xf32>
    %cst_77 = arith.constant 2.560000e+02 : f32
    %130 = vector.broadcast %cst_77 : f32 to vector<1x128xf32>
    %131 = arith.divf %129, %130 : vector<1x128xf32>
    %132 = vector.broadcast %131 : vector<1x128xf32> to vector<64x128xf32>
    %133 = arith.subf %122, %132 : vector<64x128xf32>
    %134 = arith.mulf %133, %133 : vector<64x128xf32>
    %cst_78 = arith.constant dense<0.000000e+00> : vector<128xf32>
    %135 = vector.multi_reduction <add>, %134, %cst_78 [0] : vector<64x128xf32> to vector<128xf32>
    %136 = vector.shape_cast %135 : vector<128xf32> to vector<1x128xf32>
    %cst_79 = arith.constant dense<0.000000e+00> : vector<1x32xf32>
    %137 = tpu.matmul %136, %125, %cst_79 {dimension_numbers = #tpu.dot_dimension_numbers<[1], [1], [0], [0], [0, 0, 1, 0], [], []>} : vector<1x128xf32>, vector<32x128xf32>, vector<1x32xf32> -> vector<1x32xf32>
    %cst_80 = arith.constant dense<0.000000e+00> : vector<1x128xf32>
    %138 = tpu.matmul %137, %125, %cst_80 {dimension_numbers = #tpu.dot_dimension_numbers<[1], [0], [0], [1], [0, 0, 1, 1], [], []>} : vector<1x32xf32>, vector<32x128xf32>, vector<1x128xf32> -> vector<1x128xf32>
    %cst_81 = arith.constant 2.560000e+02 : f32
    %139 = vector.broadcast %cst_81 : f32 to vector<1x128xf32>
    %140 = arith.divf %138, %139 : vector<1x128xf32>
    %cst_82 = arith.constant 9.99999997E-7 : f32
    %141 = vector.broadcast %cst_82 : f32 to vector<1x128xf32>
    %142 = arith.addf %140, %141 : vector<1x128xf32>
    %143 = math.rsqrt %142 : vector<1x128xf32>
    %144 = vector.broadcast %143 : vector<1x128xf32> to vector<64x128xf32>
    %145 = arith.mulf %133, %144 : vector<64x128xf32>
    %146 = vector.broadcast %123 : vector<1x128xf32> to vector<64x128xf32>
    %147 = arith.mulf %145, %146 : vector<64x128xf32>
    %148 = vector.broadcast %124 : vector<1x128xf32> to vector<64x128xf32>
    %149 = arith.addf %147, %148 : vector<64x128xf32>
    %150 = arith.negf %149 : vector<64x128xf32>
    %151 = math.exp %150 : vector<64x128xf32>
    %cst_83 = arith.constant 1.000000e+00 : f32
    %152 = vector.broadcast %cst_83 : f32 to vector<64x128xf32>
    %153 = arith.addf %152, %151 : vector<64x128xf32>
    %154 = arith.divf %152, %153 : vector<64x128xf32>
    %155 = arith.mulf %149, %154 : vector<64x128xf32>
    %156 = vector.shape_cast %155 : vector<64x128xf32> to vector<8x8x128xf32>
    %c0_84 = arith.constant 0 : index
    %c0_85 = arith.constant 0 : index
    %157 = vector.load %arg14[%c0_84, %c0_85] : memref<1x128xf32, #tpu.memory_space<vmem>>, vector<1x128xf32>
    %cst_86 = arith.constant 0.000000e+00 : f32
    %158 = vector.broadcast %cst_86 : f32 to vector<10x10x128xf32>
    %c0_87 = arith.constant 0 : index
    %c0_88 = arith.constant 0 : index
    %c0_89 = arith.constant 0 : index
    %159 = vector.load %arg19[%c0_87, %c0_88, %c0_89] : memref<10x10x128xf32, #tpu.memory_space<vmem>>, vector<10x10x128xf32>
    tpu.vector_store %arg19[%c0_87, %c0_88, %c0_89], %158 {strides = array<i32>} : memref<10x10x128xf32, #tpu.memory_space<vmem>>, vector<10x10x128xf32>,
    %c1_90 = arith.constant 1 : index
    %c1_91 = arith.constant 1 : index
    %c0_92 = arith.constant 0 : index
    %160 = vector.load %arg19[%c1_90, %c1_91, %c0_92] : memref<10x10x128xf32, #tpu.memory_space<vmem>>, vector<8x8x128xf32>
    tpu.vector_store %arg19[%c1_90, %c1_91, %c0_92], %156 {strides = array<i32>} : memref<10x10x128xf32, #tpu.memory_space<vmem>>, vector<8x8x128xf32>,
    %c0_93 = arith.constant 0 : index
    %c0_94 = arith.constant 0 : index
    %c0_95 = arith.constant 0 : index
    %161 = vector.load %arg19[%c0_93, %c0_94, %c0_95] : memref<10x10x128xf32, #tpu.memory_space<vmem>>, vector<10x10x128xf32>
    %cst_96 = arith.constant 0.000000e+00 : f32
    %162 = vector.broadcast %cst_96 : f32 to vector<64x128xf32>
    %163 = vector.extract_strided_slice %161 {offsets = [0, 0, 0], sizes = [8, 8, 128], strides = [1, 1, 1]} : vector<10x10x128xf32> to vector<8x8x128xf32>
    %164 = vector.shape_cast %163 : vector<8x8x128xf32> to vector<64x128xf32>
    %165 = arith.truncf %164 : vector<64x128xf32> to vector<64x128xbf16>
    %c0_97 = arith.constant 0 : index
    %c0_98 = arith.constant 0 : index
    %c0_99 = arith.constant 0 : index
    %166 = vector.load %arg13[%c0_97, %c0_98, %c0_99] : memref<9x128x128xbf16, #tpu.memory_space<vmem>>, vector<1x128x128xbf16>
    %167 = vector.shape_cast %166 : vector<1x128x128xbf16> to vector<128x128xbf16>
    %cst_100 = arith.constant dense<0.000000e+00> : vector<64x128xf32>
    %168 = tpu.matmul %165, %167, %cst_100 {dimension_numbers = #tpu.dot_dimension_numbers<[1], [0], [0], [1], [0, 0, 1, 1], [], []>} : vector<64x128xbf16>, vector<128x128xbf16>, vector<64x128xf32> -> vector<64x128xf32>
    %169 = arith.addf %162, %168 : vector<64x128xf32>
    %170 = vector.extract_strided_slice %161 {offsets = [0, 1, 0], sizes = [8, 8, 128], strides = [1, 1, 1]} : vector<10x10x128xf32> to vector<8x8x128xf32>
    %171 = vector.shape_cast %170 : vector<8x8x128xf32> to vector<64x128xf32>
    %172 = arith.truncf %171 : vector<64x128xf32> to vector<64x128xbf16>
    %c1_101 = arith.constant 1 : index
    %c0_102 = arith.constant 0 : index
    %c0_103 = arith.constant 0 : index
    %173 = vector.load %arg13[%c1_101, %c0_102, %c0_103] : memref<9x128x128xbf16, #tpu.memory_space<vmem>>, vector<1x128x128xbf16>
    %174 = vector.shape_cast %173 : vector<1x128x128xbf16> to vector<128x128xbf16>
    %cst_104 = arith.constant dense<0.000000e+00> : vector<64x128xf32>
    %175 = tpu.matmul %172, %174, %cst_104 {dimension_numbers = #tpu.dot_dimension_numbers<[1], [0], [0], [1], [0, 0, 1, 1], [], []>} : vector<64x128xbf16>, vector<128x128xbf16>, vector<64x128xf32> -> vector<64x128xf32>
    %176 = arith.addf %169, %175 : vector<64x128xf32>
    %177 = vector.extract_strided_slice %161 {offsets = [0, 2, 0], sizes = [8, 8, 128], strides = [1, 1, 1]} : vector<10x10x128xf32> to vector<8x8x128xf32>
    %178 = vector.shape_cast %177 : vector<8x8x128xf32> to vector<64x128xf32>
    %179 = arith.truncf %178 : vector<64x128xf32> to vector<64x128xbf16>
    %c2_105 = arith.constant 2 : index
    %c0_106 = arith.constant 0 : index
    %c0_107 = arith.constant 0 : index
    %180 = vector.load %arg13[%c2_105, %c0_106, %c0_107] : memref<9x128x128xbf16, #tpu.memory_space<vmem>>, vector<1x128x128xbf16>
    %181 = vector.shape_cast %180 : vector<1x128x128xbf16> to vector<128x128xbf16>
    %cst_108 = arith.constant dense<0.000000e+00> : vector<64x128xf32>
    %182 = tpu.matmul %179, %181, %cst_108 {dimension_numbers = #tpu.dot_dimension_numbers<[1], [0], [0], [1], [0, 0, 1, 1], [], []>} : vector<64x128xbf16>, vector<128x128xbf16>, vector<64x128xf32> -> vector<64x128xf32>
    %183 = arith.addf %176, %182 : vector<64x128xf32>
    %184 = vector.extract_strided_slice %161 {offsets = [1, 0, 0], sizes = [8, 8, 128], strides = [1, 1, 1]} : vector<10x10x128xf32> to vector<8x8x128xf32>
    %185 = vector.shape_cast %184 : vector<8x8x128xf32> to vector<64x128xf32>
    %186 = arith.truncf %185 : vector<64x128xf32> to vector<64x128xbf16>
    %c3_109 = arith.constant 3 : index
    %c0_110 = arith.constant 0 : index
    %c0_111 = arith.constant 0 : index
    %187 = vector.load %arg13[%c3_109, %c0_110, %c0_111] : memref<9x128x128xbf16, #tpu.memory_space<vmem>>, vector<1x128x128xbf16>
    %188 = vector.shape_cast %187 : vector<1x128x128xbf16> to vector<128x128xbf16>
    %cst_112 = arith.constant dense<0.000000e+00> : vector<64x128xf32>
    %189 = tpu.matmul %186, %188, %cst_112 {dimension_numbers = #tpu.dot_dimension_numbers<[1], [0], [0], [1], [0, 0, 1, 1], [], []>} : vector<64x128xbf16>, vector<128x128xbf16>, vector<64x128xf32> -> vector<64x128xf32>
    %190 = arith.addf %183, %189 : vector<64x128xf32>
    %191 = vector.extract_strided_slice %161 {offsets = [1, 1, 0], sizes = [8, 8, 128], strides = [1, 1, 1]} : vector<10x10x128xf32> to vector<8x8x128xf32>
    %192 = vector.shape_cast %191 : vector<8x8x128xf32> to vector<64x128xf32>
    %193 = arith.truncf %192 : vector<64x128xf32> to vector<64x128xbf16>
    %c4_113 = arith.constant 4 : index
    %c0_114 = arith.constant 0 : index
    %c0_115 = arith.constant 0 : index
    %194 = vector.load %arg13[%c4_113, %c0_114, %c0_115] : memref<9x128x128xbf16, #tpu.memory_space<vmem>>, vector<1x128x128xbf16>
    %195 = vector.shape_cast %194 : vector<1x128x128xbf16> to vector<128x128xbf16>
    %cst_116 = arith.constant dense<0.000000e+00> : vector<64x128xf32>
    %196 = tpu.matmul %193, %195, %cst_116 {dimension_numbers = #tpu.dot_dimension_numbers<[1], [0], [0], [1], [0, 0, 1, 1], [], []>} : vector<64x128xbf16>, vector<128x128xbf16>, vector<64x128xf32> -> vector<64x128xf32>
    %197 = arith.addf %190, %196 : vector<64x128xf32>
    %198 = vector.extract_strided_slice %161 {offsets = [1, 2, 0], sizes = [8, 8, 128], strides = [1, 1, 1]} : vector<10x10x128xf32> to vector<8x8x128xf32>
    %199 = vector.shape_cast %198 : vector<8x8x128xf32> to vector<64x128xf32>
    %200 = arith.truncf %199 : vector<64x128xf32> to vector<64x128xbf16>
    %c5_117 = arith.constant 5 : index
    %c0_118 = arith.constant 0 : index
    %c0_119 = arith.constant 0 : index
    %201 = vector.load %arg13[%c5_117, %c0_118, %c0_119] : memref<9x128x128xbf16, #tpu.memory_space<vmem>>, vector<1x128x128xbf16>
    %202 = vector.shape_cast %201 : vector<1x128x128xbf16> to vector<128x128xbf16>
    %cst_120 = arith.constant dense<0.000000e+00> : vector<64x128xf32>
    %203 = tpu.matmul %200, %202, %cst_120 {dimension_numbers = #tpu.dot_dimension_numbers<[1], [0], [0], [1], [0, 0, 1, 1], [], []>} : vector<64x128xbf16>, vector<128x128xbf16>, vector<64x128xf32> -> vector<64x128xf32>
    %204 = arith.addf %197, %203 : vector<64x128xf32>
    %205 = vector.extract_strided_slice %161 {offsets = [2, 0, 0], sizes = [8, 8, 128], strides = [1, 1, 1]} : vector<10x10x128xf32> to vector<8x8x128xf32>
    %206 = vector.shape_cast %205 : vector<8x8x128xf32> to vector<64x128xf32>
    %207 = arith.truncf %206 : vector<64x128xf32> to vector<64x128xbf16>
    %c6_121 = arith.constant 6 : index
    %c0_122 = arith.constant 0 : index
    %c0_123 = arith.constant 0 : index
    %208 = vector.load %arg13[%c6_121, %c0_122, %c0_123] : memref<9x128x128xbf16, #tpu.memory_space<vmem>>, vector<1x128x128xbf16>
    %209 = vector.shape_cast %208 : vector<1x128x128xbf16> to vector<128x128xbf16>
    %cst_124 = arith.constant dense<0.000000e+00> : vector<64x128xf32>
    %210 = tpu.matmul %207, %209, %cst_124 {dimension_numbers = #tpu.dot_dimension_numbers<[1], [0], [0], [1], [0, 0, 1, 1], [], []>} : vector<64x128xbf16>, vector<128x128xbf16>, vector<64x128xf32> -> vector<64x128xf32>
    %211 = arith.addf %204, %210 : vector<64x128xf32>
    %212 = vector.extract_strided_slice %161 {offsets = [2, 1, 0], sizes = [8, 8, 128], strides = [1, 1, 1]} : vector<10x10x128xf32> to vector<8x8x128xf32>
    %213 = vector.shape_cast %212 : vector<8x8x128xf32> to vector<64x128xf32>
    %214 = arith.truncf %213 : vector<64x128xf32> to vector<64x128xbf16>
    %c7_125 = arith.constant 7 : index
    %c0_126 = arith.constant 0 : index
    %c0_127 = arith.constant 0 : index
    %215 = vector.load %arg13[%c7_125, %c0_126, %c0_127] : memref<9x128x128xbf16, #tpu.memory_space<vmem>>, vector<1x128x128xbf16>
    %216 = vector.shape_cast %215 : vector<1x128x128xbf16> to vector<128x128xbf16>
    %cst_128 = arith.constant dense<0.000000e+00> : vector<64x128xf32>
    %217 = tpu.matmul %214, %216, %cst_128 {dimension_numbers = #tpu.dot_dimension_numbers<[1], [0], [0], [1], [0, 0, 1, 1], [], []>} : vector<64x128xbf16>, vector<128x128xbf16>, vector<64x128xf32> -> vector<64x128xf32>
    %218 = arith.addf %211, %217 : vector<64x128xf32>
    %219 = vector.extract_strided_slice %161 {offsets = [2, 2, 0], sizes = [8, 8, 128], strides = [1, 1, 1]} : vector<10x10x128xf32> to vector<8x8x128xf32>
    %220 = vector.shape_cast %219 : vector<8x8x128xf32> to vector<64x128xf32>
    %221 = arith.truncf %220 : vector<64x128xf32> to vector<64x128xbf16>
    %c8_129 = arith.constant 8 : index
    %c0_130 = arith.constant 0 : index
    %c0_131 = arith.constant 0 : index
    %222 = vector.load %arg13[%c8_129, %c0_130, %c0_131] : memref<9x128x128xbf16, #tpu.memory_space<vmem>>, vector<1x128x128xbf16>
    %223 = vector.shape_cast %222 : vector<1x128x128xbf16> to vector<128x128xbf16>
    %cst_132 = arith.constant dense<0.000000e+00> : vector<64x128xf32>
    %224 = tpu.matmul %221, %223, %cst_132 {dimension_numbers = #tpu.dot_dimension_numbers<[1], [0], [0], [1], [0, 0, 1, 1], [], []>} : vector<64x128xbf16>, vector<128x128xbf16>, vector<64x128xf32> -> vector<64x128xf32>
    %225 = arith.addf %218, %224 : vector<64x128xf32>
    %226 = vector.broadcast %157 : vector<1x128xf32> to vector<64x128xf32>
    %227 = arith.addf %225, %226 : vector<64x128xf32>
    %228 = arith.truncf %2 : vector<64x64xf32> to vector<64x64xbf16>
    %c0_133 = arith.constant 0 : index
    %c0_134 = arith.constant 0 : index
    %229 = vector.load %arg15[%c0_133, %c0_134] : memref<64x128xbf16, #tpu.memory_space<vmem>>, vector<64x128xbf16>
    %cst_135 = arith.constant dense<0.000000e+00> : vector<64x128xf32>
    %230 = tpu.matmul %228, %229, %cst_135 {dimension_numbers = #tpu.dot_dimension_numbers<[1], [0], [0], [1], [0, 0, 1, 1], [], []>} : vector<64x64xbf16>, vector<64x128xbf16>, vector<64x128xf32> -> vector<64x128xf32>
    %c0_136 = arith.constant 0 : index
    %c0_137 = arith.constant 0 : index
    %231 = vector.load %arg16[%c0_136, %c0_137] : memref<1x128xf32, #tpu.memory_space<vmem>>, vector<1x128xf32>
    %232 = vector.broadcast %231 : vector<1x128xf32> to vector<64x128xf32>
    %233 = arith.addf %230, %232 : vector<64x128xf32>
    %234 = arith.addf %233, %227 : vector<64x128xf32>
    %235 = vector.shape_cast %234 : vector<64x128xf32> to vector<8x8x128xf32>
    %c0_138 = arith.constant 0 : index
    %c0_139 = arith.constant 0 : index
    %c0_140 = arith.constant 0 : index
    %c0_141 = arith.constant 0 : index
    %236 = vector.load %arg17[%c0_138, %c0_139, %c0_140, %c0_141] : memref<1x8x8x128xf32, #tpu.memory_space<vmem>>, vector<1x8x8x128xf32>
    %237 = vector.shape_cast %236 : vector<1x8x8x128xf32> to vector<8x8x128xf32>
    %238 = vector.shape_cast %235 : vector<8x8x128xf32> to vector<1x8x8x128xf32>
    tpu.vector_store %arg17[%c0_138, %c0_139, %c0_140, %c0_141], %238 {strides = array<i32>} : memref<1x8x8x128xf32, #tpu.memory_space<vmem>>, vector<1x8x8x128xf32>,
    return
  }
  func.func @transform_0(%arg0: i32) -> (i32, i32, i32, i32) {
    %c0_i32 = arith.constant 0 : i32
    %c0_i32_0 = arith.constant 0 : i32
    %c0_i32_1 = arith.constant 0 : i32
    %c0_i32_2 = arith.constant 0 : i32
    return %arg0, %c0_i32, %c0_i32_0, %c0_i32_1 : i32, i32, i32, i32
  }
  func.func @transform_1(%arg0: i32) -> (i32, i32) {
    %c0_i32 = arith.constant 0 : i32
    %c0_i32_0 = arith.constant 0 : i32
    %c0_i32_1 = arith.constant 0 : i32
    return %c0_i32, %c0_i32_0 : i32, i32
  }
  func.func @transform_2(%arg0: i32) -> (i32, i32) {
    %c0_i32 = arith.constant 0 : i32
    %c0_i32_0 = arith.constant 0 : i32
    %c0_i32_1 = arith.constant 0 : i32
    return %c0_i32, %c0_i32_0 : i32, i32
  }
  func.func @transform_3(%arg0: i32) -> (i32, i32) {
    %c0_i32 = arith.constant 0 : i32
    %c0_i32_0 = arith.constant 0 : i32
    %c0_i32_1 = arith.constant 0 : i32
    return %c0_i32, %c0_i32_0 : i32, i32
  }
  func.func @transform_4(%arg0: i32) -> (i32, i32, i32) {
    %c0_i32 = arith.constant 0 : i32
    %c0_i32_0 = arith.constant 0 : i32
    %c0_i32_1 = arith.constant 0 : i32
    %c0_i32_2 = arith.constant 0 : i32
    return %c0_i32, %c0_i32_0, %c0_i32_1 : i32, i32, i32
  }
  func.func @transform_5(%arg0: i32) -> (i32, i32) {
    %c0_i32 = arith.constant 0 : i32
    %c0_i32_0 = arith.constant 0 : i32
    %c0_i32_1 = arith.constant 0 : i32
    return %c0_i32, %c0_i32_0 : i32, i32
  }
  func.func @transform_6(%arg0: i32) -> (i32, i32, i32) {
    %c0_i32 = arith.constant 0 : i32
    %c0_i32_0 = arith.constant 0 : i32
    %c0_i32_1 = arith.constant 0 : i32
    return %arg0, %c0_i32, %c0_i32_0 : i32, i32, i32
  }
  func.func @transform_7(%arg0: i32) -> (i32, i32) {
    %c0_i32 = arith.constant 0 : i32
    %c0_i32_0 = arith.constant 0 : i32
    %c0_i32_1 = arith.constant 0 : i32
    return %c0_i32, %c0_i32_0 : i32, i32
  }
  func.func @transform_8(%arg0: i32) -> (i32, i32) {
    %c0_i32 = arith.constant 0 : i32
    %c0_i32_0 = arith.constant 0 : i32
    %c0_i32_1 = arith.constant 0 : i32
    return %c0_i32, %c0_i32_0 : i32, i32
  }
  func.func @transform_9(%arg0: i32) -> (i32, i32) {
    %c0_i32 = arith.constant 0 : i32
    %c0_i32_0 = arith.constant 0 : i32
    %c0_i32_1 = arith.constant 0 : i32
    return %c0_i32, %c0_i32_0 : i32, i32
  }
  func.func @transform_10(%arg0: i32) -> (i32, i32) {
    %c0_i32 = arith.constant 0 : i32
    %c0_i32_0 = arith.constant 0 : i32
    %c0_i32_1 = arith.constant 0 : i32
    return %c0_i32, %c0_i32_0 : i32, i32
  }
  func.func @transform_11(%arg0: i32) -> (i32, i32) {
    %c0_i32 = arith.constant 0 : i32
    %c0_i32_0 = arith.constant 0 : i32
    %c0_i32_1 = arith.constant 0 : i32
    return %c0_i32, %c0_i32_0 : i32, i32
  }
  func.func @transform_12(%arg0: i32) -> (i32, i32, i32) {
    %c0_i32 = arith.constant 0 : i32
    %c0_i32_0 = arith.constant 0 : i32
    %c0_i32_1 = arith.constant 0 : i32
    %c0_i32_2 = arith.constant 0 : i32
    return %c0_i32, %c0_i32_0, %c0_i32_1 : i32, i32, i32
  }
  func.func @transform_13(%arg0: i32) -> (i32, i32) {
    %c0_i32 = arith.constant 0 : i32
    %c0_i32_0 = arith.constant 0 : i32
    %c0_i32_1 = arith.constant 0 : i32
    return %c0_i32, %c0_i32_0 : i32, i32
  }
  func.func @transform_14(%arg0: i32) -> (i32, i32) {
    %c0_i32 = arith.constant 0 : i32
    %c0_i32_0 = arith.constant 0 : i32
    %c0_i32_1 = arith.constant 0 : i32
    return %c0_i32, %c0_i32_0 : i32, i32
  }
  func.func @transform_15(%arg0: i32) -> (i32, i32) {
    %c0_i32 = arith.constant 0 : i32
    %c0_i32_0 = arith.constant 0 : i32
    %c0_i32_1 = arith.constant 0 : i32
    return %c0_i32, %c0_i32_0 : i32, i32
  }
  func.func @transform_16(%arg0: i32) -> (i32, i32, i32, i32) {
    %c0_i32 = arith.constant 0 : i32
    %c0_i32_0 = arith.constant 0 : i32
    %c0_i32_1 = arith.constant 0 : i32
    %c0_i32_2 = arith.constant 0 : i32
    return %arg0, %c0_i32, %c0_i32_0, %c0_i32_1 : i32, i32, i32, i32
  }
}

</mosaic_0001>

<bundles_post_ra>
// kernel: tpu_custom_call.1
= control target key start
LH: loop header
LB: loop body
LE: loop exit
PB: predicated region body
PF: predicated region fallthrough
CT: control target
= control target key end

     0   :  { %s7463_s0 = inlined_call_operand.hbm [shape: f32[2,8,8,64], index: 0, kind: input, shape index: {}]   ;;  %s7464_s1 = inlined_call_operand.hbm [shape: f32[32,64], index: 1, kind: input, shape index: {}]   ;;  %s7465_s2 = inlined_call_operand.vmem [shape: f32[1,64], index: 2, kind: input, shape index: {}]   ;;  %s7466_s3 = inlined_call_operand.vmem [shape: f32[1,64], index: 3, kind: input, shape index: {}]   ;;  %s7467_s4 = inlined_call_operand.hbm [shape: bf16[9,64,128], index: 4, kind: input, shape index: {}]   ;;  %s7468_s5 = inlined_call_operand.vmem [shape: f32[1,128], index: 5, kind: input, shape index: {}]   ;;  %s7469_s6 = inlined_call_operand.vmem [shape: f32[2,1,128], index: 6, kind: input, shape index: {}]   ;;  %s7470_s7 = inlined_call_operand.hbm [shape: bf16[128,128], index: 7, kind: input, shape index: {}]   ;;  %s7471_s8 = inlined_call_operand.vmem [shape: f32[1,128], index: 8, kind: input, shape index: {}]   ;;  %s7472_s9 = inlined_call_operand.hbm [shape: f32[32,128], index: 9, kind: input, shape index: {}]   ;;  %s7473_s10 = inlined_call_operand.vmem [shape: f32[1,128], index: 10, kind: input, shape index: {}]   ;;  %s7474_s11 = inlined_call_operand.vmem [shape: f32[1,128], index: 11, kind: input, shape index: {}]   ;;  %s7475_s12 = inlined_call_operand.hbm [shape: bf16[9,128,128], index: 12, kind: input, shape index: {}]   ;;  %s7476_s13 = inlined_call_operand.vmem [shape: f32[1,128], index: 13, kind: input, shape index: {}]   ;;  %s7477_s14 = inlined_call_operand.hbm [shape: bf16[64,128], index: 14, kind: input, shape index: {}]   ;;  %s7478_s15 = inlined_call_operand.vmem [shape: f32[1,128], index: 15, kind: input, shape index: {}]   ;;  %s7479_s16 = inlined_call_operand.hbm [shape: f32[2,8,8,128], index: 16, kind: output, shape index: {}]  }
   0x1   :  { %7505 = sst [smem:[#allocation40_spill]] %s7463_s0 }
   0x2   :  { %7506 = sst [smem:[#allocation41_spill]] %s7464_s1 }
   0x3   :  { %7507 = sst [smem:[#allocation42_spill]] %s7467_s4 }
   0x4   :  { %7508 = sst [smem:[#allocation43_spill]] %s7470_s7 }
   0x5   :  { %7509 = sst [smem:[#allocation44_spill]] %s7472_s9 }
   0x6   :  { %7510 = sst [smem:[#allocation45_spill]] %s7475_s12 }
   0x7   :  { %7511 = sst [smem:[#allocation46_spill]] %s7476_s13 }
   0x8   :  { %7512 = sst [smem:[#allocation47_spill]] %s7477_s14 }
   0x9   :  { %7513 = sst [smem:[#allocation48_spill]] %s7478_s15 }
   0xa   :  { %7514 = sst [smem:[#allocation49_spill]] %s7479_s16 }
   0xb   :  { %21 = vsyncpa [#allocation5], 0 }
   0xc   :  { %23 = vsyncpa [#allocation5 + $0x1], 0 }
   0xd   :  { %24 = vsyncpa [#allocation8], 0 }
   0xe   :  { %25 = vsyncpa [#allocation11], 0 }
   0xf   :  { %26 = vsyncpa [#allocation14], 0 }
  0x10   :  { %27 = vsyncpa [#allocation6], 0 }
  0x11   :  { %29 = vsyncpa [#allocation6 + $0x1], 0  ;;  %s6234_s21 = smov 0   ;;  %s6236_s22 = smov 0  }
  0x12   :  { %s6238_s23 = smov 0   ;;  %s6240_s24 = smov 0  }
  0x13 LB: > { %7515 = sst [smem:[#allocation22_spill]] %s6127_s23  ;;  %s6133_s25 = smov [#allocation7]   ;;  %s6131_s24 = sphi %s6240_s24, %s7601_s24   ;;  %s6127_s23 = sphi %s6238_s23, %s7603_s23   ;;  %s6123_s22 = sphi %s6236_s22, %s7605_s22   ;;  %s6119_s21 = sphi %s6234_s21, %s7604_s21  }
  0x14   : > { %s424_s26 = sshll.u32 %s6133_s25, 4  ;;  %s6255_s27 = sadd.s32 4294967295, %s6131_s24   ;;  %s425_s26 = int_to_ptr.vmem [resolvable:$true] %s424_s26 }
  0x15   : > { %p4608_p0 = scmp.ge.s32.totalorder %s6131_s24, 1  ;;  %p7487_p1 = scmp.eq.s32.totalorder %s6255_s27, 0 }
  0x16   : > { %p412_p2 = scmp.lt.s32.totalorder %s6131_s24, 3  ;;  %s6134_s30 = smov [#allocation10]  }
  0x17   : > { %s459_s0 = sshll.u32 %s6134_s30, 4  ;;  %s6135_s17 = smov [#allocation13]   ;;  %s6273_s0 = int_to_ptr.vmem [resolvable:$true] %s459_s0 }
  0x18   : > { %p6260_p3 = pnand %p4608_p0, %p412_p2  ;;  %s6275_s18 = sshll.u32 %s6135_s17, 4  ;;  %s495_s18 = int_to_ptr.vmem [resolvable:$true] %s6275_s18 }
  0x19   : > { %s5882_s20 = scalar_lea.vmem %s425_s26, 512  ;;  %p5890_p11 = scmp.lt.s32.totalorder %s425_s26, %s425_s26 }
  0x1a   : > { %s7516_s28 = scalar_select %p6260_p3, 1, 0 }
  0x1b   : > { %p5582_p5 = pneg %p6260_p3  ;;  %p5883_p8 = scmp.ne.s32.totalorder %s425_s26, %s5882_s20 }
  0x1c   : > { %p5891_p12 = scmp.lt.s32.totalorder %s5882_s20, %s5882_s20 }
  0x1d   : > { %p6269_p6 = pnand %p5582_p5, %p7487_p1 }
  0x1e   : > { %p5892_p13 = por %p5891_p12, %p5890_p11 }
  0x1f   : > { %p6279_p7 = pneg %p6269_p6 }
  0x21   : > { %p5885_p9 = pnand %p5883_p8, %p6279_p7 }
  0x23   : > { %p5886_p10 = pneg %p5885_p9 }
  0x25   : > { %p5893_p0 = pnand %p5892_p13, %p5886_p10 }
  0x27   : > { %5896 = shalt.err (!%p5893_p0)
}
  0x28   : > { %s7482_s25 = smov 128   ;;  %s7484_s30 = smov 8  }
  0x29   : > { %s7519_s1 = sld [smem:[#allocation41_spill]]  ;;  %s5908_s13 = scalar_lea.vmem %s6273_s0, 1024 }
  0x2a   : > { %p5909_p2 = scmp.ne.s32.totalorder %s6273_s0, %s5908_s13  ;;  %p5916_p9 = scmp.lt.s32.totalorder %s6273_s0, %s6273_s0 }
  0x2b   : > { %p5917_p10 = scmp.lt.s32.totalorder %s5908_s13, %s5908_s13 }
  0x2c   : > { %p5911_p5 = pnand %p5909_p2, %p6279_p7 }
  0x2d   : > { %p5918_p11 = por %p5917_p10, %p5916_p9 }
  0x2e   : > { %p5912_p8 = pneg %p5911_p5 }
  0x2f   : > { %5585 = dma.hbm_to_vmem [thread:$0]  (!%p6269_p6), %s7519_s1, 512, %s425_s26, [#allocation8], %s7482_s25, %s7482_s25, %s7484_s30  }
  0x30   : > { %p5919_p12 = pnand %p5918_p11, %p5912_p8 }
  0x32   : > { %5922 = shalt.err (!%p5919_p12)
}
  0x33   : > { %s6138_s20 = smov 64   ;;  %s6139_s15 = smov 4  }
  0x34   : > { %s7520_s7 = sld [smem:[#allocation43_spill]]  ;;  %s5934_s17 = scalar_lea.vmem %s495_s18, 9216 }
  0x35   : > { %p5935_p13 = scmp.ne.s32.totalorder %s495_s18, %s5934_s17  ;;  %p5942_p5 = scmp.lt.s32.totalorder %s495_s18, %s495_s18 }
  0x36   : > { %p5943_p8 = scmp.lt.s32.totalorder %s5934_s17, %s5934_s17 }
  0x37   : > { %p5937_p0 = pnand %p5935_p13, %p6279_p7 }
  0x38   : > { %p5944_p9 = por %p5943_p8, %p5942_p5 }
  0x39   : > { %p5938_p2 = pneg %p5937_p0 }
  0x3a   : > { %5591 = dma.hbm_to_vmem [thread:$0]  (!%p6269_p6), %s7520_s7, 1024, %s6273_s0, [#allocation11], %s6138_s20, %s6138_s20, %s6139_s15  }
  0x3b   : > { %p5945_p10 = pnand %p5944_p9, %p5938_p2 }
  0x3d   : > { %5948 = shalt.err (!%p5945_p10)
}
  0x3e   : > { %s7521_s12 = sld [smem:[#allocation45_spill]]  ;;  %s6140_s0 = smov [#allocation9]  }
  0x3f   : > { %s443_s16 = sshll.u32 %s6140_s0, 4  ;;  %s6141_s26 = smov [#allocation12]   ;;  %s444_s16 = int_to_ptr.vmem [resolvable:$true] %s443_s16 }
  0x40   : > { %s475_s30 = sshll.u32 %s6141_s26, 4  ;;  %s5960_s1 = scalar_lea.vmem %s444_s16, 4608  ;;  %s476_s30 = int_to_ptr.vmem [resolvable:$true] %s475_s30 }
  0x41   : > { %p5961_p11 = scmp.ne.s32.totalorder %s444_s16, %s5960_s1  ;;  %p5968_p0 = scmp.lt.s32.totalorder %s444_s16, %s444_s16 }
  0x42   : > { %p5969_p2 = scmp.lt.s32.totalorder %s5960_s1, %s5960_s1 }
  0x43   : > { %p5963_p12 = pnand %p5961_p11, %p6279_p7 }
  0x44   : > { %5597 = dma.hbm_to_vmem [thread:$0]  (!%p6269_p6), %s7521_s12, 9216, %s495_s18, [#allocation14], %s6138_s20, %s6138_s20, %s6139_s15  }
  0x45   : > { %p5964_p13 = pneg %p5963_p12  ;;  %p5970_p5 = por %p5969_p2, %p5968_p0 }
  0x47   : > { %p5971_p8 = pnand %p5970_p5, %p5964_p13 }
  0x49   : > { %5974 = shalt.err (!%p5971_p8)
}
  0x4a   : > { %s7522_s4 = sld [smem:[#allocation42_spill]]  ;;  %s5986_s17 = scalar_lea.vmem %s476_s30, 512 }
  0x4b   : > { %p5987_p9 = scmp.ne.s32.totalorder %s476_s30, %s5986_s17  ;;  %p5994_p12 = scmp.lt.s32.totalorder %s476_s30, %s476_s30 }
  0x4c   : > { %p5995_p0 = scmp.lt.s32.totalorder %s5986_s17, %s5986_s17 }
  0x4d   : > { %p5989_p10 = pnand %p5987_p9, %p6279_p7 }
  0x4e   : > { %p5996_p13 = por %p5995_p0, %p5994_p12 }
  0x4f   : > { %p5990_p11 = pneg %p5989_p10 }
  0x50   : > { %5588 = dma.hbm_to_vmem [thread:$0]  (!%p6269_p6), %s7522_s4, 4608, %s444_s16, [#allocation8], %s6138_s20, %s6138_s20, %s6139_s15  }
  0x51   : > { %p5997_p2 = pnand %p5996_p13, %p5990_p11 }
  0x53   : > { %6000 = shalt.err (!%p5997_p2)
}
  0x54   : > { %s7523_s1 = smov 8   ;;  %s7524_s13 = smov 128  }
  0x55   : > { %s7525_s9 = sld [smem:[#allocation44_spill]]  ;;  %s6142_s16 = smov [#allocation15]  }
  0x56   : > { %s510_s18 = sshll.u32 %s6142_s16, 4  ;;  %s511_s18 = int_to_ptr.vmem [resolvable:$true] %s510_s18 }
  0x57   : > { %s6012_s25 = scalar_lea.vmem %s511_s18, 512  ;;  %p6020_p10 = scmp.lt.s32.totalorder %s511_s18, %s511_s18 }
  0x58   : > { %p6013_p5 = scmp.ne.s32.totalorder %s511_s18, %s6012_s25  ;;  %p6021_p11 = scmp.lt.s32.totalorder %s6012_s25, %s6012_s25 }
  0x5a   : > { %p6015_p8 = pnand %p6013_p5, %p6279_p7  ;;  %p6022_p12 = por %p6021_p11, %p6020_p10 }
  0x5b   : > { %5594 = dma.hbm_to_vmem [thread:$0]  (!%p6269_p6), %s7525_s9, 512, %s476_s30, [#allocation11], %s7524_s13, %s7524_s13, %s7523_s1  }
  0x5c   : > { %p6016_p9 = pneg %p6015_p8 }
  0x5e   : > { %p6023_p0 = pnand %p6022_p12, %p6016_p9 }
  0x60   : > { %6026 = shalt.err (!%p6023_p0)
}
  0x61   : > { %s7526_s14 = sld [smem:[#allocation47_spill]]  ;;  %s4607_s29 = sadd.s32 4294967294, %s6131_s24  }
  0x62   : > { %s6351_s19 = sadd.s32 1, %s6131_s24   ;;  %s42_s26 = sadd.s32 1, %s6127_s23 }
  0x63   : > { %7527 = sst [smem:[#allocation23_spill]] %s6351_s19  ;;  %s39_s0 = ssub.s32 %s6131_s24, %s6351_s19 }
  0x64   : > { %p40_p7 = scmp.eq.s32.totalorder %s39_s0, 0  ;;  %p49_p13 = scmp.ne.s32.totalorder %s6127_s23, %s6123_s22 }
  0x65   : > { %p50_p2 = scmp.eq.s32.totalorder %s6131_s24, 0  ;;  %p55_p5 = scmp.ne.s32.totalorder %s6123_s22, %s6119_s21 }
  0x66   : > { %s6362_s16 = scalar_select %p40_p7, %s6127_s23, %s42_s26  }
  0x67   : > { %5600 = dma.hbm_to_vmem [thread:$0]  (!%p6269_p6), %s7526_s14, 512, %s511_s18, [#allocation14], %s6138_s20, %s6138_s20, %s6139_s15  }
  0x68   : > { %7528 = sst [smem:[#allocation24_spill]] %s6362_s16  ;;  %p6364_p8 = por %p50_p2, %p49_p13 }
  0x69   : > { %p6370_p6 = por %p7487_p1, %p55_p5  ;;  %p399_p9 = scmp.eq.s32.totalorder %s6255_s27, 1 }
  0x6a   : > { %p405_p10 = scmp.eq.s32.totalorder %s4607_s29, 1  ;;  %p5615_p11 = scmp.lt.s32.totalorder %s6131_s24, 2 }
  0x6b   : > { %s7530_s15 = scalar_select %p6370_p6, 1, 0 }
  0x6c   : > { %s527_s20 = sand.u32 1, %s6127_s23   ;;  %p6377_p12 = por %p399_p9, %p49_p13 }
  0x6d   : > { %p6381_p0 = por %p405_p10, %p55_p5  ;;  %s4616_s30 = sshll.u32 %s527_s20, 6 }
  0x6e   : > { %s7531_s18 = scalar_select %p6377_p12, 1, 0 }
  0x6f   : > { %s7532_s17 = scalar_select %p6381_p0, 1, 0 }
  0x70   : > { %s4831_s0 = sshll.u32 %s6131_s24, 10  ;;  %s7533_s7 = sld [smem:[#allocation40_spill]] }
  0x71   : > { %s531_s29 = scalar_lea.vmem [#allocation4], %s4616_s30  ;;  %p6395_p7 = pnand %p5615_p11, %p6364_p8 }
  0x72   : > { %s538_s12 = sshll.u32 %s531_s29, 4  ;;  %s6399_s16 = scalar_lea.sflag [#allocation5], %s527_s20  ;;  %s6391_s12 = int_to_ptr.vmem [resolvable:$true] %s538_s12 }
  0x73   : > { %p6029_p2 = pneg %p6395_p7 }
  0x76   : > { %s6389_s9 = scalar_lea.hbm %s7533_s7, %s4831_s0  ;;  %s6032_s30 = scalar_lea.hbm %s7533_s7, 2048 }
  0x77   : > { %s6027_s23 = scalar_lea.hbm %s6389_s9, 1024  ;;  %p6033_p8 = scmp.lt.s32.totalorder %s6389_s9, %s7533_s7 }
  0x78   : > { %p6028_p13 = scmp.ne.s32.totalorder %s6389_s9, %s6027_s23  ;;  %p6034_p10 = scmp.lt.s32.totalorder %s6032_s30, %s6027_s23 }
  0x7a   : > { %p6030_p5 = pnand %p6029_p2, %p6028_p13  ;;  %p6035_p11 = por %p6034_p10, %p6033_p8 }
  0x7c   : > { %p6031_p9 = pneg %p6030_p5 }
  0x7e   : > { %p6036_p4 = pnand %p6035_p11, %p6031_p9 }
  0x80   : > { %6039 = shalt.err (!%p6036_p4)
}
  0x81   : > { %s6040_s25 = scalar_lea.vmem %s6391_s12, 1024  ;;  %s6143_s20 = smov [#allocation4]  }
  0x82   : > { %p6041_p1 = scmp.ne.s32.totalorder %s6391_s12, %s6040_s25  ;;  %s6045_s19 = sshll.u32 %s6143_s20, 4  ;;  %s6046_s19 = int_to_ptr.vmem [resolvable:$false] %s6045_s19 }
  0x83   : > { %s6047_s4 = scalar_lea.vmem %s6046_s19, 2048  ;;  %p6048_p5 = scmp.lt.s32.totalorder %s6391_s12, %s6046_s19 }
  0x84   : > { %p6043_p0 = pnand %p6041_p1, %p6029_p2  ;;  %p6049_p12 = scmp.lt.s32.totalorder %s6047_s4, %s6040_s25 }
  0x86   : > { %p6044_p13 = pneg %p6043_p0  ;;  %p6050_p6 = por %p6049_p12, %p6048_p5 }
  0x88   : > { %p6051_p3 = pnand %p6050_p6, %p6044_p13 }
  0x8a   : > { %6054 = shalt.err (!%p6051_p3)
}
  0x8b   : > { %5604 = dma.hbm_to_vmem [thread:$0]  (!%p6395_p7), %s6389_s9, 1024, %s6391_s12, %s6399_s16, %s7524_s13, %s7524_s13, %s7523_s1  }
  0x8c   : > { %p7535_p1 = scmp.ne.s32.totalorder %s7516_s28, 0 }
  0x8e   : > { %556 = sbr.rel (%p7535_p1) target bundleno = 2612 (0xa34), region = 84 }
  0x93   : > { %s6426_s23 = sand.u32 1, %s6123_s22   ;;  %p7536_p3 = scmp.ne.s32.totalorder %s7530_s15, 0 }
  0x94   : > { %s4620_s19 = sshll.u32 %s6426_s23, 6  ;;  %s559_s0 = scalar_lea.sflag [#allocation5], %s6426_s23 }
  0x95   : > { %s6432_s14 = scalar_lea.vmem [#allocation4], %s4620_s19 }
  0x96   : > { %6098 = dma.done.wait (%p7536_p3), %s559_s0, 1024  }
  0x97   : > { %6100 = vsyncadd (%p7536_p3), %s559_s0, 4294966272  ;;  %p7537_p4 = scmp.eq.s32.totalorder %s6255_s27, 0 }
  0x99   : > { %6102 = dma.done.wait (%p7537_p4), [#allocation8], 5120   ;;  %p7538_p6 = pmov %p7537_p4 }
  0x9a   : > { %p7539_p12 = pmov %p7537_p4 }
  0x9b   : > { %6104 = vsyncadd (%p7538_p6), [#allocation8], 4294962176 }
  0x9c   : > { %6106 = dma.done.wait (%p7539_p12), [#allocation11], 1536   ;;  %p7540_p0 = pmov %p7537_p4 }
  0x9e   : > { %6108 = vsyncadd (%p7540_p0), [#allocation11], 4294965760  ;;  %p7541_p7 = pmov %p7540_p0 }
  0x9f   : > { %p7542_p2 = pmov %p7540_p0 }
  0xa0   : > { %6110 = dma.done.wait (%p7541_p7), [#allocation14], 9728  }
  0xa1   : > { %6112 = vsyncadd (%p7542_p2), [#allocation14], 4294957568  ;;  %vm656_vm0 = vcmask 523264   ;;  %v6144_v0 = vmov 0.0   ;;  %vm6145_vm1 = vmmov 0   ;;  %v6495_v1 = vld [vmem:[#allocation7 + $0x18] sm:$0xff]  ;;  %v839_v36 = vlaneseq }
  0xa2   : > { %5070 = vmatprep.subr.mxu0 %v6144_v0  ;;  %2903 = vst [vmem:[#allocation3] sm:$0xff] %v6144_v0  ;;  %2904 = vst [vmem:[#allocation3 + $0x8] sm:$0x3] %v6144_v0  ;;  %5078 = vmatprep.mubr.msk.f32.mxu0 %vm6145_vm1, %v6144_v0  ;;  %v6499_v2 = vld [vmem:[#allocation7 + $0x10] sm:$0xff]  ;;  %v6502_v3 = vld [vmem:[%s6432_s14] sm:$0xff]  ;;  %vm763_vm2 = vcmask 261120  }
  0xa3   : > { %2905 = vst [vmem:[#allocation3 + $0x10] sm:$0xff] %v6144_v0  ;;  %2906 = vst [vmem:[#allocation3 + $0x18] sm:$0x3] %v6144_v0  ;;  %5081 = vmatprep.subr.mxu1 %v6144_v0  ;;  %5089 = vmatprep.mubr.msk.f32.mxu1 %vm6145_vm1, %v6144_v0  ;;  %v6505_v4 = vld [vmem:[%s6432_s14 + $0x8] sm:$0xff]  ;;  %v6512_v6 = vld [vmem:[%s6432_s14 + $0x10] sm:$0xff]  ;;  %v657_v9 = vsel %vm656_vm0, %v6502_v3, 0.0 }
  0xa4   : > { %2907 = vst [vmem:[#allocation3 + $0x20] sm:$0xff] %v6144_v0  ;;  %2908 = vst [vmem:[#allocation3 + $0x28] sm:$0x3] %v6144_v0  ;;  %5071 = vmatpush3.xpose.msk.msra.mxu0 %vm656_vm0, %v6495_v1  ;;  %5082 = vmatpush3.msra.mxu1 %v6495_v1  ;;  %v6509_v5 = vld [vmem:[#allocation7 + $0x8] sm:$0xff]  ;;  %v6515_v7 = vld [vmem:[%s6432_s14 + $0x18] sm:$0xff]  ;;  %v658_v10 = vsel %vm656_vm0, %v6505_v4, 0.0 }
  0xa5   : > { %2909 = vst [vmem:[#allocation3 + $0x30] sm:$0xff] %v6144_v0  ;;  %2910 = vst [vmem:[#allocation3 + $0x38] sm:$0x3] %v6144_v0  ;;  %5072 = vmatprep.subr.mxu0 %v6144_v0  ;;  %v6518_v8 = vld [vmem:[%s6432_s14 + $0x20] sm:$0xff]  ;;  %5083 = vmatprep.subr.mxu1 %v6144_v0  ;;  %v6526_v11 = vld [vmem:[%s6432_s14 + $0x28] sm:$0xff]  ;;  %v659_v14 = vadd.f32 %v658_v10, %v657_v9  ;;  %v660_v15 = vsel %vm656_vm0, %v6512_v6, 0.0 }
  0xa6   : > { %2911 = vst [vmem:[#allocation3 + $0x40] sm:$0xff] %v6144_v0  ;;  %2912 = vst [vmem:[#allocation3 + $0x48] sm:$0x3] %v6144_v0  ;;  %v6529_v12 = vld [vmem:[%s6432_s14 + $0x30] sm:$0xff]  ;;  %v6532_v13 = vld [vmem:[%s6432_s14 + $0x38] sm:$0xff]  ;;  %v662_v16 = vsel %vm656_vm0, %v6515_v7, 0.0  ;;  %5084 = vmatpush3.msra.mxu1 %v6499_v2 }
  0xa7   : > { %2913 = vst [vmem:[#allocation3 + $0x50] sm:$0xff] %v6144_v0  ;;  %2914 = vst [vmem:[#allocation3 + $0x58] sm:$0x3] %v6144_v0  ;;  %v6539_v17 = vld [vmem:[#allocation7] sm:$0xff]  ;;  %v664_v18 = vsel %vm656_vm0, %v6518_v8, 0.0  ;;  %v666_v19 = vsel %vm656_vm0, %v6526_v11, 0.0  ;;  %5085 = vmatprep.subr.mxu1 %v6144_v0  ;;  %v661_v22 = vadd.f32 %v660_v15, %v659_v14 }
  0xa8   : > { %2915 = vst [vmem:[#allocation3 + $0x60] sm:$0xff] %v6144_v0  ;;  %2916 = vst [vmem:[#allocation3 + $0x68] sm:$0x3] %v6144_v0  ;;  %v668_v20 = vsel %vm656_vm0, %v6529_v12, 0.0  ;;  %v670_v21 = vsel %vm656_vm0, %v6532_v13, 0.0  ;;  %5073 = vmatpush3.xpose.msk.msra.mxu0 %vm656_vm0, %v6499_v2  ;;  %5086 = vmatpush3.msra.mxu1 %v6509_v5  ;;  %v840_v37 = vshrl.u32 %v839_v36, 7 }
  0xa9   : > { %2917 = vst [vmem:[#allocation3 + $0x70] sm:$0xff] %v6144_v0  ;;  %2918 = vst [vmem:[#allocation3 + $0x78] sm:$0x3] %v6144_v0  ;;  %5074 = vmatprep.subr.mxu0 %v6144_v0  ;;  %5087 = vmatprep.subr.mxu1 %v6144_v0  ;;  %v663_v23 = vadd.f32 %v662_v16, %v661_v22  ;;  %vm1127_vm3 = vcmask 517120   ;;  %vm1204_vm4 = vcmask 1046528   ;;  %vm1452_vm5 = vcmask 1045504  }
  0xaa   : > { %2919 = vst [vmem:[#allocation3 + $0x80] sm:$0xff] %v6144_v0  ;;  %2920 = vst [vmem:[#allocation3 + $0x88] sm:$0x3] %v6144_v0  ;;  %5088 = vmatpush3.msra.mxu1 %v6539_v17  ;;  %v6578_v38 = vsub.s32 0, %v840_v37  ;;  %p638_p9 = scmp.lt.s32.totalorder %s6255_s27, 1  ;;  %s7584_s1 = sld [smem:[#allocation48_spill]] }
  0xab   : > { %2922 = vst [vmem:[#allocation3 + $0x98] sm:$0x3] %v6144_v0  ;;  %1126 = vst.msk [vmem:[#allocation2] sm:$0xff] %vm656_vm0, %v6144_v0  ;;  %5092 = vmatprep.subr.mxu1 %v6144_v0  ;;  %v665_v24 = vadd.f32 %v664_v18, %v663_v23  ;;  %v5670_v23 = vld [vmem:[#allocation9 + $0x38] sm:$0xff]   ;;  %s7586_s15 = sld [smem:[#allocation46_spill]]  ;;  %p7598_p10 = scmp.ne.s32.totalorder %s7531_s18, 0 }
  0xac   : > { %1129 = vst.msk [vmem:[#allocation2 + $0x10] sm:$0xff] %vm656_vm0, %v6144_v0  ;;  %1131 = vst.msk [vmem:[#allocation2 + $0x20] sm:$0xff] %vm656_vm0, %v6144_v0  ;;  %5075 = vmatpush3.xpose.msk.msra.mxu0 %vm656_vm0, %v6509_v5  ;;  %s639_s13 = scalar_select %p638_p9, %s6255_s27, 1 }
  0xad   : > { %1133 = vst.msk [vmem:[#allocation2 + $0x30] sm:$0xff] %vm656_vm0, %v6144_v0  ;;  %1135 = vst.msk [vmem:[#allocation2 + $0x40] sm:$0xff] %vm656_vm0, %v6144_v0  ;;  %5076 = vmatprep.subr.mxu0 %v6144_v0  ;;  %v667_v25 = vadd.f32 %v666_v19, %v665_v24  ;;  %v5671_v24 = vld [vmem:[#allocation9 + $0x10] sm:$0xff]   ;;  %s7597_s20 = sld [smem:[#allocation49_spill]]  ;;  %s6146_s9 = smov [#allocation16]  }
  0xae   : > { %1137 = vst.msk [vmem:[#allocation2 + $0x50] sm:$0xff] %vm656_vm0, %v6144_v0  ;;  %1139 = vst.msk [vmem:[#allocation2 + $0x60] sm:$0xff] %vm656_vm0, %v6144_v0  ;;  %s640_s30 = scalar_lea.vmem %s7469_s6, %s639_s13  ;;  %s6059_s12 = sshll.u32 %s6146_s9, 4  ;;  %s6060_s12 = int_to_ptr.vmem [resolvable:$false] %s6059_s12 }
  0xaf   : > { %1141 = vst.msk [vmem:[#allocation2 + $0x70] sm:$0xff] %vm656_vm0, %v6144_v0  ;;  %1143 = vst.msk [vmem:[#allocation2 + $0x80] sm:$0xff] %vm656_vm0, %v6144_v0  ;;  %v669_v26 = vadd.f32 %v668_v20, %v667_v25  ;;  %v5673_v25 = vld [vmem:[#allocation9 + $0x8] sm:$0xff]  }
  0xb0   : > { %1145 = vst.msk [vmem:[#allocation2 + $0x90] sm:$0xff] %vm656_vm0, %v6144_v0  ;;  %5077 = vmatpush3.xpose.msk.msra.mxu0 %vm656_vm0, %v6539_v17  ;;  %7543 = vst [vmem:[#allocation25_spill] sm:$0xff] %v6578_v38 }
  0xb1   : > { %v671_v27 = vadd.f32 %v670_v21, %v669_v26  ;;  %5114 = vmatprep.subr.bf16.mxu0 %v5670_v23  ;;  %1130 = vst.msk [vmem:[#allocation2 + $0x18] sm:$0x3] %vm1127_vm3, %v6144_v0  ;;  %1128 = vst.msk [vmem:[#allocation2 + $0x8] sm:$0x3] %vm1127_vm3, %v6144_v0  ;;  %v5676_v26 = vld [vmem:[#allocation9 + $0x20] sm:$0xff]  }
  0xb2   : > { %1132 = vst.msk [vmem:[#allocation2 + $0x28] sm:$0x3] %vm1127_vm3, %v6144_v0  ;;  %1134 = vst.msk [vmem:[#allocation2 + $0x38] sm:$0x3] %vm1127_vm3, %v6144_v0 }
  0xb3   : > { %v672_v28 = vrot.slane %v671_v27, 4  ;;  %1136 = vst.msk [vmem:[#allocation2 + $0x48] sm:$0x3] %vm1127_vm3, %v6144_v0  ;;  %1138 = vst.msk [vmem:[#allocation2 + $0x58] sm:$0x3] %vm1127_vm3, %v6144_v0 }
  0xb4   : > { %1140 = vst.msk [vmem:[#allocation2 + $0x68] sm:$0x3] %vm1127_vm3, %v6144_v0  ;;  %1142 = vst.msk [vmem:[#allocation2 + $0x78] sm:$0x3] %vm1127_vm3, %v6144_v0 }
  0xb5   : > { %v673_v29 = vadd.f32 %v672_v28, %v671_v27  ;;  %1144 = vst.msk [vmem:[#allocation2 + $0x88] sm:$0x3] %vm1127_vm3, %v6144_v0  ;;  %1146 = vst.msk [vmem:[#allocation2 + $0x98] sm:$0x3] %vm1127_vm3, %v6144_v0  ;;  %v6650_v27 = vld [vmem:[#allocation9 + $0x78] sm:$0xff]  }
  0xb6   : > { %v6653_v28 = vld [vmem:[#allocation9 + $0x58] sm:$0xff]  }
  0xb7   : > { %v674_v30 = vrot.slane %v673_v29, 2 }
  0xb9   : > { %v675_v31 = vadd.f32 %v674_v30, %v673_v29 }
  0xbb   : > { %v676_v32 = vrot.slane %v675_v31, 1 }
  0xbd   : > { %v677_v33 = vadd.f32 %v676_v32, %v675_v31 }
  0xbf   : > { %5079 = vmatmul.mubr.msk.f32.vlgmr.msra.gmra.mxu0 %vm656_vm0, %v677_v33 }
  0xc0   : > { %5115 = vmatpush3.bf16.msra.mxu0 %v5670_v23 }
 0x17f   : > { %v759_v34 = vpop.f32.mrf.mxu0 }
 0x180   : > { %5090 = vmatmul.mubr.msk.f32.vlgmr.msra.gmra.mxu1 %vm763_vm2, %v759_v34  ;;  %v4640_v34 = vld [vmem:[%s7465_s2] ss:$0 sm:$0xff] }
 0x181   : > { %v5080_v35 = vpop.f32.mrf.mxu0  ;;  %5093 = vmatpush3.xpose.msk.msra.mxu1 %vm656_vm0, %v6495_v1  ;;  %5100 = vmatprep.mubr.msk.f32.mxu1 %vm6145_vm1, %v6144_v0 }
 0x182   : > { %5094 = vmatprep.subr.mxu1 %v6144_v0 }
 0x185   : > { %5095 = vmatpush3.xpose.msk.msra.mxu1 %vm656_vm0, %v6499_v2 }
 0x186   : > { %5096 = vmatprep.subr.mxu1 %v6144_v0 }
 0x189   : > { %5097 = vmatpush3.xpose.msk.msra.mxu1 %vm656_vm0, %v6509_v5 }
 0x18a   : > { %5098 = vmatprep.subr.mxu1 %v6144_v0 }
 0x18d   : > { %5099 = vmatpush3.xpose.msk.msra.mxu1 %vm656_vm0, %v6539_v17 }
 0x18e   : > { %5103 = vmatprep.subr.mxu1 %v6144_v0 }
 0x240   : > { %v833_v39 = vpop.f32.mrf.mxu1 }
 0x241   : > { %v838_v40 = vmul.f32 0.0078125, %v833_v39 }
 0x242   : > { %v5091_v41 = vpop.f32.mrf.mxu1 }
 0x243   : > { %v842_v42 = vrot.slane %v838_v40, %v6578_v38  ;;  %v4641_v40 = vld [vmem:[%s7466_s3] ss:$0 sm:$0xff] }
 0x245   : > { %v6582_v43 = vsub.f32 %v6502_v3, %v842_v42  ;;  %v6585_v44 = vsub.f32 %v6505_v4, %v842_v42  ;;  %v6588_v45 = vsub.f32 %v6512_v6, %v842_v42  ;;  %v6591_v46 = vsub.f32 %v6515_v7, %v842_v42 }
 0x246   : > { %v6594_v47 = vsub.f32 %v6518_v8, %v842_v42  ;;  %v6603_v51 = vsub.f32 %v6526_v11, %v842_v42  ;;  %v6610_v56 = vsub.f32 %v6529_v12, %v842_v42  ;;  %v6616_v60 = vsub.f32 %v6532_v13, %v842_v42 }
 0x247   : > { %v851_v48 = vmul.f32 %v6582_v43, %v6582_v43  ;;  %v852_v49 = vmul.f32 %v6585_v44, %v6585_v44  ;;  %v853_v50 = vmul.f32 %v6588_v45, %v6588_v45  ;;  %v854_v52 = vmul.f32 %v6591_v46, %v6591_v46 }
 0x248   : > { %v855_v57 = vmul.f32 %v6594_v47, %v6594_v47  ;;  %v856_v61 = vmul.f32 %v6603_v51, %v6603_v51  ;;  %v857_v3 = vmul.f32 %v6610_v56, %v6610_v56  ;;  %v858_v7 = vmul.f32 %v6616_v60, %v6616_v60 }
 0x249   : > { %v859_v53 = vsel %vm656_vm0, %v851_v48, 0.0  ;;  %v860_v54 = vsel %vm656_vm0, %v852_v49, 0.0  ;;  %v862_v58 = vsel %vm656_vm0, %v853_v50, 0.0  ;;  %v864_v62 = vsel %vm656_vm0, %v854_v52, 0.0 }
 0x24a   : > { %v861_v55 = vadd.f32 %v860_v54, %v859_v53  ;;  %v866_v4 = vsel %vm656_vm0, %v855_v57, 0.0  ;;  %v868_v8 = vsel %vm656_vm0, %v856_v61, 0.0  ;;  %v870_v10 = vsel %vm656_vm0, %v857_v3, 0.0 }
 0x24b   : > { %v872_v12 = vsel %vm656_vm0, %v858_v7, 0.0 }
 0x24c   : > { %v863_v59 = vadd.f32 %v862_v58, %v861_v55 }
 0x24e   : > { %v865_v63 = vadd.f32 %v864_v62, %v863_v59 }
 0x250   : > { %v867_v6 = vadd.f32 %v866_v4, %v865_v63 }
 0x252   : > { %v869_v9 = vadd.f32 %v868_v8, %v867_v6 }
 0x254   : > { %v871_v11 = vadd.f32 %v870_v10, %v869_v9 }
 0x256   : > { %v873_v13 = vadd.f32 %v872_v12, %v871_v11 }
 0x258   : > { %v874_v14 = vrot.slane %v873_v13, 4 }
 0x25a   : > { %v875_v15 = vadd.f32 %v874_v14, %v873_v13 }
 0x25c   : > { %v876_v16 = vrot.slane %v875_v15, 2 }
 0x25e   : > { %v877_v18 = vadd.f32 %v876_v16, %v875_v15 }
 0x260   : > { %v878_v19 = vrot.slane %v877_v18, 1 }
 0x262   : > { %v879_v20 = vadd.f32 %v878_v19, %v877_v18 }
 0x264   : > { %5101 = vmatmul.mubr.msk.f32.vlgmr.msra.gmra.mxu1 %vm656_vm0, %v879_v20 }
 0x265   : > { %5104 = vmatpush3.msra.mxu1 %v6495_v1  ;;  %5111 = vmatprep.mubr.msk.f32.mxu1 %vm6145_vm1, %v6144_v0  ;;  %v5669_v1 = vld [vmem:[#allocation9 + $0x18] sm:$0xff]  }
 0x266   : > { %5105 = vmatprep.subr.mxu1 %v6144_v0 }
 0x267   : > { %5106 = vmatpush3.msra.mxu1 %v6499_v2  ;;  %v5672_v2 = vld [vmem:[#allocation9 + $0x30] sm:$0xff]  }
 0x268   : > { %5107 = vmatprep.subr.mxu1 %v6144_v0  ;;  %5116 = vmatprep.subr.bf16.mxu0 %v5672_v2 }
 0x269   : > { %5108 = vmatpush3.msra.mxu1 %v6509_v5  ;;  %v5674_v5 = vld [vmem:[#allocation9 + $0x28] sm:$0xff]   ;;  %5117 = vmatpush3.bf16.msra.mxu0 %v5672_v2 }
 0x26a   : > { %5109 = vmatprep.subr.mxu1 %v6144_v0  ;;  %5118 = vmatprep.subr.bf16.mxu0 %v5674_v5 }
 0x26b   : > { %5110 = vmatpush3.msra.mxu1 %v6539_v17  ;;  %v5675_v17 = vld [vmem:[#allocation9] sm:$0xff]  }
 0x26c   : > { %5130 = vmatprep.subr.bf16.mxu1 %v5669_v1 }
 0x26d   : > { %5119 = vmatpush3.bf16.msra.mxu0 %v5674_v5 }
 0x26e   : > { %5120 = vmatprep.subr.bf16.mxu0 %v5676_v26 }
 0x271   : > { %5121 = vmatpush3.bf16.msra.mxu0 %v5676_v26 }
 0x272   : > { %5146 = vmatprep.subr.bf16.mxu0 %v6653_v28 }
 0x324   : > { %v949_v21 = vpop.f32.mrf.mxu1 }
 0x325   : > { %5112 = vmatmul.mubr.msk.f32.vlgmr.msra.gmra.mxu1 %vm763_vm2, %v949_v21 }
 0x326   : > { %v5102_v22 = vpop.f32.mrf.mxu1  ;;  %5131 = vmatpush3.bf16.msra.mxu1 %v5669_v1 }
 0x327   : > { %5132 = vmatprep.subr.bf16.mxu1 %v5671_v24 }
 0x32a   : > { %5133 = vmatpush3.bf16.msra.mxu1 %v5671_v24 }
 0x32b   : > { %5134 = vmatprep.subr.bf16.mxu1 %v5673_v25 }
 0x32e   : > { %5135 = vmatpush3.bf16.msra.mxu1 %v5673_v25 }
 0x32f   : > { %5136 = vmatprep.subr.bf16.mxu1 %v5675_v17 }
 0x332   : > { %5137 = vmatpush3.bf16.msra.mxu1 %v5675_v17 }
 0x333   : > { %5162 = vmatprep.subr.bf16.mxu1 %v6650_v27 }
 0x3e5   : > { %v1022_v0 = vpop.f32.mrf.mxu1 }
 0x3e6   : > { %v1026_v29 = vmul.f32 0.0078125, %v1022_v0 }
 0x3e7   : > { %v5113_v30 = vpop.f32.mrf.mxu1 }
 0x3e8   : > { %v1027_v31 = vadd.f32 1e-06, %v1026_v29 }
 0x3ea   : > { %5789 = vrsqrt.f32 %v1027_v31 }
 0x3f7   : > { %v5790_v32 = vpop.eup %5789 }
 0x3f8   : > { %v1032_v33 = vrot.slane %v5790_v32, %v6578_v38  ;;  %v6672_v32 = vld [vmem:[#allocation2] sm:$0xff] }
 0x3fa   : > { %v1033_v35 = vmul.f32 %v1032_v33, %v6582_v43  ;;  %v1034_v36 = vmul.f32 %v1032_v33, %v6585_v44  ;;  %v1035_v37 = vmul.f32 %v1032_v33, %v6588_v45  ;;  %v1036_v39 = vmul.f32 %v1032_v33, %v6591_v46 }
 0x3fb   : > { %v1037_v41 = vmul.f32 %v1032_v33, %v6594_v47  ;;  %v1038_v42 = vmul.f32 %v1032_v33, %v6603_v51  ;;  %v1039_v48 = vmul.f32 %v1032_v33, %v6610_v56  ;;  %v1040_v49 = vmul.f32 %v1032_v33, %v6616_v60  ;;  %v6675_v33 = vld [vmem:[#allocation2 + $0x8] sm:$0x3] }
 0x3fc   : > { %v1047_v50 = vmul.f32 %v4640_v34, %v1033_v35  ;;  %v1048_v43 = vmul.f32 %v4640_v34, %v1034_v36  ;;  %v1049_v52 = vmul.f32 %v4640_v34, %v1035_v37  ;;  %v1050_v44 = vmul.f32 %v4640_v34, %v1036_v39 }
 0x3fd   : > { %v1051_v53 = vmul.f32 %v4640_v34, %v1037_v41  ;;  %v1052_v45 = vmul.f32 %v4640_v34, %v1038_v42  ;;  %v1053_v54 = vmul.f32 %v4640_v34, %v1039_v48  ;;  %v1054_v46 = vmul.f32 %v4640_v34, %v1040_v49 }
 0x3fe   : > { %v1061_v55 = vadd.f32 %v4641_v40, %v1047_v50  ;;  %v1062_v57 = vadd.f32 %v4641_v40, %v1048_v43  ;;  %v1063_v58 = vadd.f32 %v4641_v40, %v1049_v52  ;;  %v1064_v59 = vadd.f32 %v4641_v40, %v1050_v44 }
 0x3ff   : > { %v1065_v61 = vadd.f32 %v4641_v40, %v1051_v53  ;;  %v1066_v47 = vadd.f32 %v4641_v40, %v1052_v45  ;;  %v1067_v62 = vadd.f32 %v4641_v40, %v1053_v54  ;;  %v1068_v3 = vadd.f32 %v4641_v40, %v1054_v46 }
 0x400   : > { %v4642_v51 = vmul.f32 -1.442695, %v1061_v55  ;;  %v4643_v63 = vmul.f32 -1.442695, %v1062_v57  ;;  %v4644_v56 = vmul.f32 -1.442695, %v1063_v58 }
 0x401   : > { %v4645_v60 = vmul.f32 -1.442695, %v1064_v59  ;;  %v4646_v4 = vmul.f32 -1.442695, %v1065_v61  ;;  %v4647_v6 = vmul.f32 -1.442695, %v1066_v47 }
 0x402   : > { %5791 = vpow2.f32 %v4642_v51  ;;  %v4648_v7 = vmul.f32 -1.442695, %v1067_v62  ;;  %v4649_v8 = vmul.f32 -1.442695, %v1068_v3  ;;  %v1205_v41 = vrot.slane %v6672_v32, 1  ;;  %v5679_v51 = vld [vmem:[#allocation9 + $0x70] sm:$0xff]  }
 0x403   : > { %5793 = vpow2.f32 %v4643_v63  ;;  %v1206_v42 = vrot.slane %v6675_v33, 1 }
 0x404   : > { %5795 = vpow2.f32 %v4644_v56 }
 0x405   : > { %5797 = vpow2.f32 %v4645_v60  ;;  %v1207_v44 = vsel %vm1204_vm4, %v1205_v41, %v1206_v42 }
 0x406   : > { %5799 = vpow2.f32 %v4646_v4 }
 0x407   : > { %5801 = vpow2.f32 %v4647_v6 }
 0x408   : > { %5803 = vpow2.f32 %v4648_v7 }
 0x409   : > { %5805 = vpow2.f32 %v4649_v8 }
 0x40f   : > { %v5792_v9 = vpop.eup %5791 }
 0x410   : > { %v5794_v10 = vpop.eup %5793  ;;  %v1093_v11 = vadd.f32 1.0, %v5792_v9 }
 0x411   : > { %v5796_v12 = vpop.eup %5795  ;;  %v1094_v13 = vadd.f32 1.0, %v5794_v10 }
 0x412   : > { %v5798_v14 = vpop.eup %5797  ;;  %v1095_v15 = vadd.f32 1.0, %v5796_v12  ;;  %5807 = vrcp.f32 %v1093_v11 }
 0x413   : > { %v5800_v16 = vpop.eup %5799  ;;  %v1096_v18 = vadd.f32 1.0, %v5798_v14  ;;  %5809 = vrcp.f32 %v1094_v13 }
 0x414   : > { %v5802_v19 = vpop.eup %5801  ;;  %v1097_v20 = vadd.f32 1.0, %v5800_v16  ;;  %5811 = vrcp.f32 %v1095_v15 }
 0x415   : > { %v5804_v21 = vpop.eup %5803  ;;  %v1098_v22 = vadd.f32 1.0, %v5802_v19  ;;  %5813 = vrcp.f32 %v1096_v18  ;;  %v1453_v18 = vrot.slane %v6672_v32, 2  ;;  %v5680_v19 = vld [vmem:[#allocation9 + $0x50] sm:$0xff]  }
 0x416   : > { %v5806_v1 = vpop.eup %5805  ;;  %v1099_v23 = vadd.f32 1.0, %v5804_v21  ;;  %5815 = vrcp.f32 %v1097_v20 }
 0x417   : > { %v1100_v24 = vadd.f32 1.0, %v5806_v1  ;;  %5817 = vrcp.f32 %v1098_v22 }
 0x418   : > { %5819 = vrcp.f32 %v1099_v23  ;;  %v5681_v23 = vld [vmem:[#allocation9 + $0x68] sm:$0xff]  }
 0x419   : > { %5821 = vrcp.f32 %v1100_v24 }
 0x41f   : > { %v5808_v2 = vpop.eup %5807 }
 0x420   : > { %v5810_v25 = vpop.eup %5809  ;;  %v1117_v5 = vmul.f32 %v5808_v2, %v1061_v55 }
 0x421   : > { %v5812_v17 = vpop.eup %5811  ;;  %v1118_v26 = vmul.f32 %v5810_v25, %v1062_v57 }
 0x422   : > { %v5814_v0 = vpop.eup %5813  ;;  %v1119_v29 = vmul.f32 %v5812_v17, %v1063_v58  ;;  %1148 = vst.msk [vmem:[#allocation2 + $0x11] sm:$0xff] %vm656_vm0, %v1117_v5  ;;  %v1454_v5 = vrot.slane %v6675_v33, 2 }
 0x423   : > { %v5816_v30 = vpop.eup %5815  ;;  %v1120_v31 = vmul.f32 %v5814_v0, %v1064_v59  ;;  %1149 = vst.msk [vmem:[#allocation2 + $0x21] sm:$0xff] %vm656_vm0, %v1118_v26 }
 0x424   : > { %v5818_v34 = vpop.eup %5817  ;;  %v1121_v35 = vmul.f32 %v5816_v30, %v1065_v61  ;;  %1150 = vst.msk [vmem:[#allocation2 + $0x31] sm:$0xff] %vm656_vm0, %v1119_v29  ;;  %v5682_v29 = vld [vmem:[#allocation9 + $0x48] sm:$0xff]   ;;  %v1455_v33 = vsel %vm1452_vm5, %v1453_v18, %v1454_v5 }
 0x425   : > { %v5820_v36 = vpop.eup %5819  ;;  %v1122_v37 = vmul.f32 %v5818_v34, %v1066_v47  ;;  %1151 = vst.msk [vmem:[#allocation2 + $0x41] sm:$0xff] %vm656_vm0, %v1120_v31 }
 0x426   : > { %v5822_v39 = vpop.eup %5821  ;;  %v1123_v40 = vmul.f32 %v5820_v36, %v1067_v62  ;;  %1152 = vst.msk [vmem:[#allocation2 + $0x51] sm:$0xff] %vm656_vm0, %v1121_v35 }
 0x427   : > { %v1124_v48 = vmul.f32 %v5822_v39, %v1068_v3  ;;  %1153 = vst.msk [vmem:[#allocation2 + $0x61] sm:$0xff] %vm656_vm0, %v1122_v37  ;;  %v5684_v37 = vld [vmem:[#allocation9 + $0x40] sm:$0xff]  }
 0x428   : > { %1154 = vst.msk [vmem:[#allocation2 + $0x71] sm:$0xff] %vm656_vm0, %v1123_v40 }
 0x429   : > { %v6684_v49 = vld [vmem:[#allocation2 + $0x10] sm:$0xff]  ;;  %1155 = vst.msk [vmem:[#allocation2 + $0x81] sm:$0xff] %vm656_vm0, %v1124_v48  ;;  %v6687_v50 = vld [vmem:[#allocation2 + $0x18] sm:$0x3] }
 0x42a   : > { %v1176_v43 = vpack.c.bf16 %v6684_v49, %v6672_v32  ;;  %v6691_v52 = vld [vmem:[#allocation2 + $0x20] sm:$0xff]  ;;  %v1208_v53 = vrot.slane %v6684_v49, 1  ;;  %v1209_v45 = vrot.slane %v6687_v50, 1  ;;  %v6696_v54 = vld [vmem:[#allocation2 + $0x28] sm:$0x3]  ;;  %v1456_v17 = vrot.slane %v6684_v49, 2 }
 0x42b   : > { %v6698_v46 = vld [vmem:[#allocation2 + $0x30] sm:$0xff]  ;;  %v6700_v55 = vld [vmem:[#allocation2 + $0x38] sm:$0x3]  ;;  %v1211_v57 = vrot.slane %v6691_v52, 1  ;;  %v1212_v58 = vrot.slane %v6696_v54, 1  ;;  %v1457_v26 = vrot.slane %v6687_v50, 2 }
 0x42c   : > { %5138 = vmatprep.mubr.msk.bf16.mxu1 %vm656_vm0, %v1176_v43  ;;  %v6707_v59 = vpack.c.bf16 %v6698_v46, %v6691_v52  ;;  %v6709_v61 = vld [vmem:[#allocation2 + $0x40] sm:$0xff]  ;;  %v6712_v47 = vsel %vm1204_vm4, %v1208_v53, %v1209_v45  ;;  %v1214_v62 = vrot.slane %v6698_v46, 1  ;;  %v6715_v63 = vld [vmem:[#allocation2 + $0x48] sm:$0x3]  ;;  %v1215_v4 = vrot.slane %v6700_v55, 1  ;;  %v5685_v48 = vld [vmem:[#allocation9 + $0xb8] sm:$0xff]  }
 0x42d   : > { %v6717_v56 = vld [vmem:[#allocation2 + $0x50] sm:$0xff]  ;;  %v1237_v3 = vpack.c.bf16 %v6712_v47, %v1207_v44  ;;  %v6721_v60 = vsel %vm1204_vm4, %v1211_v57, %v1212_v58  ;;  %v6724_v6 = vld [vmem:[#allocation2 + $0x58] sm:$0x3]  ;;  %v1217_v8 = vrot.slane %v6709_v61, 1  ;;  %v1218_v12 = vrot.slane %v6715_v63, 1  ;;  %v5683_v32 = vld [vmem:[#allocation9 + $0x60] sm:$0xff]  }
 0x42e   : > { %5139 = vmatmul.mubr.msk.bf16.vlgmr.msra.gmra.mxu1 %vm656_vm0, %v6707_v59  ;;  %v6730_v7 = vpack.c.bf16 %v6717_v56, %v6709_v61  ;;  %v6733_v9 = vld [vmem:[#allocation2 + $0x60] sm:$0xff]  ;;  %v6735_v10 = vld [vmem:[#allocation2 + $0x68] sm:$0x3]  ;;  %v6740_v11 = vsel %vm1204_vm4, %v1214_v62, %v1215_v4  ;;  %v1220_v13 = vrot.slane %v6717_v56, 1  ;;  %v1221_v14 = vrot.slane %v6724_v6, 1 }
 0x42f   : > { %5163 = vmatpush3.bf16.msra.mxu1 %v6650_v27  ;;  %5122 = vmatprep.mubr.msk.bf16.mxu0 %vm656_vm0, %v1237_v3  ;;  %v6745_v15 = vld [vmem:[#allocation2 + $0x70] sm:$0xff]  ;;  %v6747_v16 = vld [vmem:[#allocation2 + $0x78] sm:$0x3]  ;;  %v6754_v27 = vpack.c.bf16 %v6740_v11, %v6721_v60  ;;  %v1223_v20 = vrot.slane %v6733_v9, 1  ;;  %v1224_v21 = vrot.slane %v6735_v10, 1  ;;  %v6759_v22 = vsel %vm1204_vm4, %v1217_v8, %v1218_v12 }
 0x430   : > { %5142 = vmatprep.mubr.msk.bf16.mxu1 %vm656_vm0, %v6730_v7  ;;  %5164 = vmatprep.subr.bf16.mxu1 %v5679_v51  ;;  %v6762_v1 = vsel %vm1204_vm4, %v1220_v13, %v1221_v14  ;;  %v1226_v24 = vrot.slane %v6745_v15, 1  ;;  %v1227_v2 = vrot.slane %v6747_v16, 1  ;;  %v6780_v0 = vpack.c.bf16 %v6745_v15, %v6733_v9  ;;  %v6834_v8 = vld [vmem:[#allocation2 + $0x80] sm:$0xff]  ;;  %v5690_v13 = vld [vmem:[#allocation9 + $0x88] sm:$0xff]  }
 0x431   : > { %5123 = vmatmul.mubr.msk.bf16.vlgmr.msra.gmra.mxu0 %vm656_vm0, %v6754_v27  ;;  %v6770_v25 = vpack.c.bf16 %v6762_v1, %v6759_v22  ;;  %v6783_v30 = vsel %vm1204_vm4, %v1223_v20, %v1224_v21  ;;  %v6794_v34 = vsel %vm1452_vm5, %v1456_v17, %v1457_v26  ;;  %v1459_v35 = vrot.slane %v6691_v52, 2  ;;  %v5691_v14 = vld [vmem:[#allocation9 + $0xa0] sm:$0xff]   ;;  %v5693_v20 = vld [vmem:[#allocation9 + $0xf8] sm:$0xff]   ;;  %v1173_v21 = vld [vmem:[#allocation2 + $0x88] sm:$0x3] }
 0x432   : > { %5147 = vmatpush3.bf16.msra.mxu0 %v6653_v28  ;;  %v6786_v31 = vsel %vm1204_vm4, %v1226_v24, %v1227_v2  ;;  %v1607_v28 = vpack.c.bf16 %v6691_v52, %v6684_v49  ;;  %v1462_v39 = vrot.slane %v6698_v46, 2  ;;  %v1460_v40 = vrot.slane %v6696_v54, 2  ;;  %v5686_v54 = vld [vmem:[#allocation9 + $0x98] sm:$0xff]  }
 0x433   : > { %5165 = vmatpush3.bf16.msra.mxu1 %v5679_v51  ;;  %5126 = vmatprep.mubr.msk.bf16.mxu0 %vm656_vm0, %v6770_v25  ;;  %v6800_v36 = vpack.c.bf16 %v6786_v31, %v6783_v30  ;;  %v1463_v41 = vrot.slane %v6700_v55, 2  ;;  %v1485_v42 = vpack.c.bf16 %v6794_v34, %v1455_v33  ;;  %v1465_v49 = vrot.slane %v6709_v61, 2  ;;  %v5687_v55 = vld [vmem:[#allocation9 + $0xb0] sm:$0xff]   ;;  %v5694_v2 = vld [vmem:[#allocation9 + $0xd8] sm:$0xff]   ;;  %v5697_v33 = vld [vmem:[#allocation9 + $0xe8] sm:$0xff]  }
 0x434   : > { %5148 = vmatprep.subr.bf16.mxu0 %v5680_v19  ;;  %5166 = vmatprep.subr.bf16.mxu1 %v5681_v23  ;;  %v1466_v50 = vrot.slane %v6715_v63, 2  ;;  %v1468_v43 = vrot.slane %v6717_v56, 2  ;;  %v1469_v52 = vrot.slane %v6724_v6, 2  ;;  %v1608_v44 = vpack.c.bf16 %v6709_v61, %v6698_v46  ;;  %v5688_v61 = vld [vmem:[#allocation9 + $0x90] sm:$0xff]  }
 0x435   : > { %v1461_v53 = vsel %vm1452_vm5, %v1459_v35, %v1460_v40  ;;  %v1464_v45 = vsel %vm1452_vm5, %v1462_v39, %v1463_v41  ;;  %v1609_v57 = vpack.c.bf16 %v6733_v9, %v6717_v56  ;;  %v1471_v51 = vrot.slane %v6733_v9, 2  ;;  %v5689_v56 = vld [vmem:[#allocation9 + $0xa8] sm:$0xff]   ;;  %v5700_v40 = vld [vmem:[#allocation9 + $0xc0] sm:$0xff]   ;;  %v1174_v41 = vld [vmem:[#allocation2 + $0x90] sm:$0xff] }
 0x436   : > { %5143 = vmatmul.mubr.msk.bf16.gmra.mxu1 %vm656_vm0, %v6780_v0  ;;  %5149 = vmatpush3.bf16.msra.mxu0 %v5680_v19  ;;  %v1467_v58 = vsel %vm1452_vm5, %v1465_v49, %v1466_v50  ;;  %v1470_v62 = vsel %vm1452_vm5, %v1468_v43, %v1469_v52  ;;  %v6823_v46 = vpack.c.bf16 %v1464_v45, %v1461_v53  ;;  %v1472_v3 = vrot.slane %v6735_v10, 2  ;;  %v5692_v19 = vld [vmem:[#allocation9 + $0x80] sm:$0xff]   ;;  %v5704_v52 = vld [vmem:[#allocation9 + $0x110] sm:$0xff]  }
 0x437   : > { %5167 = vmatpush3.bf16.msra.mxu1 %v5681_v23  ;;  %5170 = vmatprep.mubr.msk.bf16.mxu1 %vm656_vm0, %v1607_v28  ;;  %v6826_v63 = vpack.c.bf16 %v1470_v62, %v1467_v58  ;;  %v1474_v4 = vrot.slane %v6745_v15, 2  ;;  %v1475_v6 = vrot.slane %v6747_v16, 2  ;;  %v1610_v9 = vpack.c.bf16 %v6834_v8, %v6745_v15  ;;  %v6856_v23 = vld [vmem:[%s640_s30] sm:$0x1]  ;;  %s7388_s30 = scalar_lea.vmem [#allocation16], %s4620_s19  ;;  %s4832_s19 = sshll.u32 %s6255_s27, 10 }
 0x438   : > { %5150 = vmatprep.subr.bf16.mxu0 %v5682_v29  ;;  %5168 = vmatprep.subr.bf16.mxu1 %v5683_v32  ;;  %v1473_v10 = vsel %vm1452_vm5, %v1471_v51, %v1472_v3  ;;  %v1861_v16 = vpack.c.bf16 %v1461_v53, %v6794_v34  ;;  %v1735_v15 = vpack.c.bf16 %v6721_v60, %v6712_v47  ;;  %v5695_v47 = vld [vmem:[#allocation9 + $0xf0] sm:$0xff]   ;;  %v1857_v5 = vrot.slane %v6834_v8, 2  ;;  %v6881_v49 = vld [vmem:[#allocation3] sm:$0xff]  ;;  %v5705_v53 = vld [vmem:[#allocation10 + $0x28] sm:$0xff]   ;;  %s4468_s26 = sshll.u32 %s7388_s30, 4  ;;  %s7416_s4 = scalar_lea.hbm %s7597_s20, %s4832_s19  ;;  %s7418_s26 = int_to_ptr.vmem [resolvable:$true] %s4468_s26 }
 0x439   : > { %5127 = vmatmul.mubr.msk.bf16.gmra.mxu0 %vm656_vm0, %v6800_v36  ;;  %v1476_v12 = vsel %vm1452_vm5, %v1474_v4, %v1475_v6  ;;  %v1862_v24 = vpack.c.bf16 %v1467_v58, %v1464_v45  ;;  %v1863_v60 = vpack.c.bf16 %v1473_v10, %v1470_v62  ;;  %v1858_v17 = vrot.slane %v1173_v21, 2  ;;  %7544 = vst [vmem:[#allocation26_spill] sm:$0xff] %v6881_v49  ;;  %v5706_v45 = vld [vmem:[#allocation9 + $0x108] sm:$0xff]   ;;  %v5712_v4 = vld [vmem:[#allocation10] sm:$0xff]   ;;  %v6921_v6 = vld [vmem:[#allocation12 + $0x18] sm:$0xff]  ;;  %s4455_s27 = scalar_lea.sflag [#allocation6], %s6426_s23  ;;  %p6062_p5 = scmp.lt.s32.totalorder %s7418_s26, %s6060_s12 }
 0x43a   : > { %5151 = vmatpush3.bf16.msra.mxu0 %v5682_v29  ;;  %5154 = vmatprep.mubr.msk.bf16.mxu0 %vm656_vm0, %v1485_v42  ;;  %v6846_v18 = vpack.c.bf16 %v1476_v12, %v1473_v10  ;;  %v4723_v26 = vmul.f32 -1.442695, %v6856_v23  ;;  %v1736_v29 = vpack.c.bf16 %v6759_v22, %v6740_v11  ;;  %v1737_v28 = vpack.c.bf16 %v6783_v30, %v6762_v1  ;;  %v5698_v1 = vld [vmem:[#allocation9 + $0xc8] sm:$0xff]   ;;  %v5699_v30 = vld [vmem:[#allocation9 + $0xe0] sm:$0xff]   ;;  %v1175_v42 = vld [vmem:[#allocation2 + $0x98] sm:$0x3] }
 0x43b   : > { %5169 = vmatpush3.bf16.msra.mxu1 %v5683_v32  ;;  %5152 = vmatprep.subr.bf16.mxu0 %v5684_v37  ;;  %v5696_v32 = vld [vmem:[#allocation9 + $0xd0] sm:$0xff]   ;;  %v1731_v34 = vrot.slane %v6834_v8, 1  ;;  %v1732_v35 = vrot.slane %v1173_v21, 1  ;;  %v2096_v50 = vrot.slane %v1175_v42, 1  ;;  %v2209_v58 = vrot.slane %v1174_v41, 2  ;;  %7545 = vst [vmem:[#allocation27_spill] sm:$0xff] %v6921_v6 }
 0x43c   : > { %5194 = vmatprep.subr.bf16.mxu1 %v5685_v48  ;;  %5823 = vpow2.f32 %v4723_v26  ;;  %v2210_v62 = vrot.slane %v1175_v42, 2  ;;  %v6938_v10 = vld [vmem:[#allocation12] sm:$0xff]  ;;  %s6055_s0 = scalar_lea.vmem %s7418_s26, 1024 }
 0x43d   : > { %v1733_v22 = vsel %vm1204_vm4, %v1731_v34, %v1732_v35  ;;  %7548 = vst [vmem:[#allocation30_spill] sm:$0xff] %v6938_v10  ;;  %p6056_p8 = scmp.ne.s32.totalorder %s7418_s26, %s6055_s0 }
 0x43e   : > { %5153 = vmatpush3.bf16.msra.mxu0 %v5684_v37  ;;  %5171 = vmatmul.mubr.msk.bf16.vlgmr.msra.gmra.mxu1 %vm656_vm0, %v1608_v44  ;;  %v6869_v37 = vsel %vm1452_vm5, %v1857_v5, %v1858_v17  ;;  %v1738_v39 = vpack.c.bf16 %v1733_v22, %v6786_v31  ;;  %v2095_v31 = vrot.slane %v1174_v41, 1  ;;  %v2211_v51 = vsel %vm1452_vm5, %v2209_v58, %v2210_v62 }
 0x43f   : > { %5195 = vmatpush3.bf16.msra.mxu1 %v5685_v48  ;;  %5174 = vmatprep.mubr.msk.bf16.mxu1 %vm656_vm0, %v1609_v57  ;;  %v1864_v11 = vpack.c.bf16 %v6869_v37, %v1476_v12  ;;  %v5701_v48 = vld [vmem:[#allocation10 + $0x38] sm:$0xff]   ;;  %v5710_v57 = vld [vmem:[#allocation10 + $0x10] sm:$0xff]   ;;  %v2213_v3 = vpack.c.bf16 %v2211_v51, %v6869_v37  ;;  %p6057_p11 = pnand %p6056_p8, %p7598_p10 }
 0x440   : > { %5178 = vmatprep.subr.bf16.mxu0 %v5686_v54  ;;  %5196 = vmatprep.subr.bf16.mxu1 %v5687_v55  ;;  %v2097_v44 = vsel %vm1204_vm4, %v2095_v31, %v2096_v50 }
 0x441   : > { %5155 = vmatmul.mubr.msk.bf16.vlgmr.msra.gmra.mxu0 %vm656_vm0, %v6823_v46  ;;  %p6058_p13 = pneg %p6057_p11 }
 0x442   : > { %5158 = vmatprep.mubr.msk.bf16.mxu0 %vm656_vm0, %v6826_v63  ;;  %5179 = vmatpush3.bf16.msra.mxu0 %v5686_v54  ;;  %v5707_v54 = vld [vmem:[#allocation10 + $0x20] sm:$0xff]  }
 0x443   : > { %5197 = vmatpush3.bf16.msra.mxu1 %v5687_v55  ;;  %5180 = vmatprep.subr.bf16.mxu0 %v5688_v61  ;;  %v5708_v55 = vld [vmem:[#allocation9 + $0x100] sm:$0xff]  }
 0x444   : > { %5198 = vmatprep.subr.bf16.mxu1 %v5689_v56 }
 0x446   : > { %5175 = vmatmul.mubr.msk.bf16.gmra.mxu1 %vm656_vm0, %v1610_v9  ;;  %5181 = vmatpush3.bf16.msra.mxu0 %v5688_v61  ;;  %v5711_v61 = vld [vmem:[#allocation10 + $0x8] sm:$0xff]  }
 0x447   : > { %5199 = vmatpush3.bf16.msra.mxu1 %v5689_v56  ;;  %5202 = vmatprep.mubr.msk.bf16.mxu1 %vm656_vm0, %v1861_v16  ;;  %v6932_v9 = vld [vmem:[#allocation12 + $0x8] sm:$0xff] }
 0x448   : > { %5182 = vmatprep.subr.bf16.mxu0 %v5690_v13  ;;  %5200 = vmatprep.subr.bf16.mxu1 %v5691_v14  ;;  %7547 = vst [vmem:[#allocation29_spill] sm:$0xff] %v6932_v9 }
 0x449   : > { %5159 = vmatmul.mubr.msk.bf16.gmra.mxu0 %vm656_vm0, %v6846_v18  ;;  %v5824_v43 = vpop.eup %5823 }
 0x44a   : > { %5183 = vmatpush3.bf16.msra.mxu0 %v5690_v13  ;;  %5186 = vmatprep.mubr.msk.bf16.mxu0 %vm656_vm0, %v1735_v15 }
 0x44b   : > { %5201 = vmatpush3.bf16.msra.mxu1 %v5691_v14  ;;  %5184 = vmatprep.subr.bf16.mxu0 %v5692_v19 }
 0x44c   : > { %5226 = vmatprep.subr.bf16.mxu1 %v5693_v20 }
 0x44e   : > { %5185 = vmatpush3.bf16.msra.mxu0 %v5692_v19  ;;  %5203 = vmatmul.mubr.msk.bf16.vlgmr.msra.gmra.mxu1 %vm656_vm0, %v1862_v24 }
 0x44f   : > { %5227 = vmatpush3.bf16.msra.mxu1 %v5693_v20  ;;  %5206 = vmatprep.mubr.msk.bf16.mxu1 %vm656_vm0, %v1863_v60 }
 0x450   : > { %5210 = vmatprep.subr.bf16.mxu0 %v5694_v2  ;;  %5228 = vmatprep.subr.bf16.mxu1 %v5695_v47 }
 0x451   : > { %5187 = vmatmul.mubr.msk.bf16.vlgmr.msra.gmra.mxu0 %vm656_vm0, %v1736_v29 }
 0x452   : > { %5190 = vmatprep.mubr.msk.bf16.mxu0 %vm656_vm0, %v1737_v28  ;;  %5211 = vmatpush3.bf16.msra.mxu0 %v5694_v2 }
 0x453   : > { %5229 = vmatpush3.bf16.msra.mxu1 %v5695_v47  ;;  %5212 = vmatprep.subr.bf16.mxu0 %v5696_v32 }
 0x454   : > { %5230 = vmatprep.subr.bf16.mxu1 %v5697_v33 }
 0x456   : > { %5207 = vmatmul.mubr.msk.bf16.gmra.mxu1 %vm656_vm0, %v1864_v11  ;;  %5213 = vmatpush3.bf16.msra.mxu0 %v5696_v32 }
 0x457   : > { %5231 = vmatpush3.bf16.msra.mxu1 %v5697_v33  ;;  %5234 = vmatprep.mubr.msk.bf16.mxu1 %vm656_vm0, %v6754_v27  ;;  %v5702_v27 = vld [vmem:[#allocation9 + $0x118] sm:$0xff]  }
 0x458   : > { %5214 = vmatprep.subr.bf16.mxu0 %v5698_v1  ;;  %5232 = vmatprep.subr.bf16.mxu1 %v5699_v30 }
 0x459   : > { %5191 = vmatmul.mubr.msk.bf16.gmra.mxu0 %vm656_vm0, %v1738_v39 }
 0x45a   : > { %5215 = vmatpush3.bf16.msra.mxu0 %v5698_v1  ;;  %5218 = vmatprep.mubr.msk.bf16.mxu0 %vm656_vm0, %v6707_v59  ;;  %v5703_v59 = vld [vmem:[#allocation10 + $0x30] sm:$0xff]  }
 0x45b   : > { %5233 = vmatpush3.bf16.msra.mxu1 %v5699_v30  ;;  %5216 = vmatprep.subr.bf16.mxu0 %v5700_v40 }
 0x45c   : > { %5258 = vmatprep.subr.bf16.mxu1 %v6881_v49 }
 0x45e   : > { %5217 = vmatpush3.bf16.msra.mxu0 %v5700_v40  ;;  %5235 = vmatmul.mubr.msk.bf16.vlgmr.msra.gmra.mxu1 %vm656_vm0, %v6770_v25  ;;  %v2341_v25 = vadd.f32 1.0, %v5824_v43 }
 0x45f   : > { %5259 = vmatpush3.bf16.msra.mxu1 %v5701_v48  ;;  %5238 = vmatprep.mubr.msk.bf16.mxu1 %vm656_vm0, %v6800_v36  ;;  %v2099_v36 = vpack.c.bf16 %v2097_v44, %v1733_v22 }
 0x460   : > { %5242 = vmatprep.subr.bf16.mxu0 %v5702_v27  ;;  %5260 = vmatprep.subr.bf16.mxu1 %v6881_v49  ;;  %5825 = vrcp.f32 %v2341_v25 }
 0x461   : > { %5219 = vmatmul.mubr.msk.bf16.vlgmr.msra.gmra.mxu0 %vm656_vm0, %v6730_v7  ;;  %v1983_v7 = vpack.c.bf16 %v1174_v41, %v6834_v8  ;;  %v6926_v8 = vld [vmem:[#allocation12 + $0x10] sm:$0xff] }
 0x462   : > { %5222 = vmatprep.mubr.msk.bf16.mxu0 %vm656_vm0, %v6780_v0  ;;  %5243 = vmatpush3.bf16.msra.mxu0 %v5702_v27  ;;  %v5709_v0 = vld [vmem:[#allocation10 + $0x18] sm:$0xff]   ;;  %7546 = vst [vmem:[#allocation28_spill] sm:$0xff] %v6926_v8 }
 0x463   : > { %5261 = vmatpush3.bf16.msra.mxu1 %v5703_v59  ;;  %5244 = vmatprep.subr.bf16.mxu0 %v5704_v52 }
 0x464   : > { %5262 = vmatprep.subr.bf16.mxu1 %v6881_v49 }
 0x466   : > { %5239 = vmatmul.mubr.msk.bf16.gmra.mxu1 %vm656_vm0, %v2099_v36  ;;  %5245 = vmatpush3.bf16.msra.mxu0 %v5704_v52 }
 0x467   : > { %5263 = vmatpush3.bf16.msra.mxu1 %v5705_v53  ;;  %5246 = vmatprep.subr.bf16.mxu0 %v5706_v45 }
 0x468   : > { %5264 = vmatprep.subr.bf16.mxu1 %v6881_v49  ;;  %5274 = vmatprep.mubr.msk.bf16.mxu1 %vm6145_vm1, %v6881_v49 }
 0x469   : > { %5223 = vmatmul.mubr.msk.bf16.gmra.mxu0 %vm656_vm0, %v1983_v7 }
 0x46a   : > { %5247 = vmatpush3.bf16.msra.mxu0 %v5706_v45  ;;  %5250 = vmatprep.mubr.msk.bf16.mxu0 %vm656_vm0, %v6823_v46 }
 0x46b   : > { %5265 = vmatpush3.bf16.msra.mxu1 %v5707_v54  ;;  %5248 = vmatprep.subr.bf16.mxu0 %v5708_v55 }
 0x46c   : > { %5266 = vmatprep.subr.bf16.mxu1 %v6881_v49 }
 0x46d   : > { %v5826_v46 = vpop.eup %5825 }
 0x46e   : > { %5249 = vmatpush3.bf16.msra.mxu0 %v5708_v55  ;;  %v2344_v56 = vmul.f32 %v5826_v46, %v6856_v23 }
 0x46f   : > { %5267 = vmatpush3.bf16.msra.mxu1 %v5709_v0  ;;  %5278 = vmatprep.subr.mxu0 %v6881_v49 }
 0x470   : > { %5268 = vmatprep.subr.bf16.mxu1 %v6881_v49 }
 0x471   : > { %5251 = vmatmul.mubr.msk.bf16.vlgmr.msra.gmra.mxu0 %vm656_vm0, %v6826_v63  ;;  %v2345_v63 = vpack.c.bf16 %v2344_v56, %v2344_v56 }
 0x472   : > { %5254 = vmatprep.mubr.msk.bf16.mxu0 %vm656_vm0, %v6846_v18  ;;  %5279 = vmatpush3.xpose.msra.mxu0 %v6921_v6 }
 0x473   : > { %5269 = vmatpush3.bf16.msra.mxu1 %v5710_v57  ;;  %5280 = vmatprep.subr.mxu0 %v6881_v49 }
 0x474   : > { %5270 = vmatprep.subr.bf16.mxu1 %v6881_v49 }
 0x476   : > { %5281 = vmatpush3.xpose.msra.mxu0 %v6926_v8 }
 0x477   : > { %5271 = vmatpush3.bf16.msra.mxu1 %v5711_v61  ;;  %5282 = vmatprep.subr.mxu0 %v6881_v49 }
 0x478   : > { %5272 = vmatprep.subr.bf16.mxu1 %v6881_v49 }
 0x479   : > { %5255 = vmatmul.mubr.msk.bf16.gmra.mxu0 %vm656_vm0, %v2213_v3 }
 0x47a   : > { %5286 = vmatprep.mubr.msk.f32.mxu0 %vm6145_vm1, %v6881_v49  ;;  %5283 = vmatpush3.xpose.msra.mxu0 %v6932_v9 }
 0x47b   : > { %5273 = vmatpush3.bf16.msra.mxu1 %v5712_v4  ;;  %5284 = vmatprep.subr.mxu0 %v6881_v49 }
 0x47c   : > { %5300 = vmatprep.subr.mxu1 %v6881_v49 }
 0x47e   : > { %5275 = vmatmul.mubr.bf16.vlgmr.msra.gmra.mxu1 %v2345_v63  ;;  %5285 = vmatpush3.xpose.msra.mxu0 %v6938_v10 }
 0x47f   : > { %5308 = vmatprep.mubr.msk.f32.mxu1 %vm6145_vm1, %v6881_v49  ;;  %5301 = vmatpush3.xpose.msra.mxu1 %v6921_v6 }
 0x480   : > { %5302 = vmatprep.subr.mxu1 %v6881_v49  ;;  %5289 = vmatprep.subr.mxu0 %v6881_v49 }
 0x483   : > { %5303 = vmatpush3.xpose.msra.mxu1 %v6926_v8 }
 0x484   : > { %5304 = vmatprep.subr.mxu1 %v6881_v49 }
 0x487   : > { %5305 = vmatpush3.xpose.msra.mxu1 %v6932_v9 }
 0x488   : > { %5306 = vmatprep.subr.mxu1 %v6881_v49 }
 0x48b   : > { %5307 = vmatpush3.xpose.msra.mxu1 %v6938_v10 }
 0x4ee   : > { %v5140_v12 = vpop.f32.mrf.mxu1 }
 0x4f0   : > { %v1421_v13 = vpop.f32.mrf.mxu1 }
 0x4f1   : > { %v5124_v14 = vpop.f32.mrf.mxu0 }
 0x4f2   : > { %v5141_v16 = vpop.f32.mrf.mxu1  ;;  %v1430_v10 = vadd.f32 %v5140_v12, %v5124_v14 }
 0x4f3   : > { %v1320_v18 = vpop.f32.mrf.mxu0 }
 0x4f4   : > { %v1424_v19 = vpop.f32.mrf.mxu1  ;;  %v1422_v3 = vadd.f32 %v1421_v13, %v1320_v18 }
 0x4f5   : > { %v5125_v15 = vpop.f32.mrf.mxu0 }
 0x4f6   : > { %v6944_v20 = vpop.f32.mrf.mxu1  ;;  %v1433_v38 = vadd.f32 %v5141_v16, %v5125_v15 }
 0x4f7   : > { %v1323_v21 = vpop.f32.mrf.mxu0 }
 0x4f8   : > { %v1437_v23 = vpop.f32.mrf.mxu1  ;;  %v1425_v4 = vadd.f32 %v1424_v19, %v1323_v21 }
 0x4f9   : > { %v6946_v24 = vpop.f32.mrf.mxu0 }
 0x4fa   : > { %v6948_v2 = vpop.f32.mrf.mxu1  ;;  %v1446_v16 = vadd.f32 %v6944_v20, %v6946_v24 }
 0x4fb   : > { %v1336_v47 = vpop.f32.mrf.mxu0 }
 0x4fc   : > { %v1440_v60 = vpop.f32.mrf.mxu1 }
 0x4fd   : > { %v6950_v5 = vpop.f32.mrf.mxu0 }
 0x4fe   : > { %v5172_v17 = vpop.f32.mrf.mxu1 }
 0x4ff   : > { %v1339_v26 = vpop.f32.mrf.mxu0 }
 0x500   : > { %v1690_v29 = vpop.f32.mrf.mxu1 }
 0x501   : > { %v5156_v32 = vpop.f32.mrf.mxu0 }
 0x502   : > { %v6952_v28 = vpop.f32.mrf.mxu1 }
 0x503   : > { %v1568_v33 = vpop.f32.mrf.mxu0 }
 0x504   : > { %v1693_v34 = vpop.f32.mrf.mxu1  ;;  %v1599_v9 = vadd.f32 %v1568_v33, %v1422_v3 }
 0x505   : > { %v5157_v35 = vpop.f32.mrf.mxu0 }
 0x506   : > { %v6954_v37 = vpop.f32.mrf.mxu1 }
 0x507   : > { %v1571_v11 = vpop.f32.mrf.mxu0 }
 0x508   : > { %v1706_v22 = vpop.f32.mrf.mxu1  ;;  %v1600_v8 = vadd.f32 %v1571_v11, %v1425_v4 }
 0x509   : > { %v5160_v1 = vpop.f32.mrf.mxu0 }
 0x50a   : > { %v6956_v30 = vpop.f32.mrf.mxu1 }
 0x50b   : > { %7549 = vst [vmem:[#allocation31_spill] sm:$0xff] %v6956_v30  ;;  %v1584_v39 = vpop.f32.mrf.mxu0 }
 0x50c   : > { %v1709_v40 = vpop.f32.mrf.mxu1 }
 0x50d   : > { %v5161_v41 = vpop.f32.mrf.mxu0 }
 0x50e   : > { %v6958_v42 = vpop.f32.mrf.mxu1 }
 0x50f   : > { %v1587_v48 = vpop.f32.mrf.mxu0 }
 0x510   : > { %v1944_v27 = vpop.f32.mrf.mxu1 }
 0x511   : > { %v5188_v31 = vpop.f32.mrf.mxu0 }
 0x512   : > { %v6960_v50 = vpop.f32.mrf.mxu1 }
 0x513   : > { %7550 = vst [vmem:[#allocation32_spill] sm:$0xff] %v6960_v50  ;;  %v1818_v43 = vpop.f32.mrf.mxu0  ;;  %v1722_v50 = vadd.f32 %v1693_v34, %v1600_v8  ;;  %v1605_v8 = vadd.f32 %v5160_v1, %v1446_v16 }
 0x514   : > { %v1947_v59 = vpop.f32.mrf.mxu1 }
 0x515   : > { %v5189_v52 = vpop.f32.mrf.mxu0 }
 0x516   : > { %v6962_v44 = vpop.f32.mrf.mxu1 }
 0x517   : > { %7551 = vst [vmem:[#allocation33_spill] sm:$0xff] %v6962_v44  ;;  %v1821_v25 = vpop.f32.mrf.mxu0 }
 0x518   : > { %v6964_v53 = vpop.f32.mrf.mxu1  ;;  %v1850_v14 = vadd.f32 %v1821_v25, %v1722_v50 }
 0x519   : > { %7552 = vst [vmem:[#allocation34_spill] sm:$0xff] %v6964_v53  ;;  %v6966_v45 = vpop.f32.mrf.mxu0  ;;  %v1602_v53 = vadd.f32 %v5157_v35, %v1433_v38 }
 0x51a   : > { %7553 = vst [vmem:[#allocation35_spill] sm:$0xff] %v6966_v45  ;;  %v6968_v36 = vpop.f32.mrf.mxu1  ;;  %v1721_v45 = vadd.f32 %v1690_v29, %v1599_v9 }
 0x51b   : > { %7554 = vst [vmem:[#allocation36_spill] sm:$0xff] %v6968_v36  ;;  %v1834_v7 = vpop.f32.mrf.mxu0  ;;  %v1601_v36 = vadd.f32 %v5156_v32, %v1430_v10  ;;  %v1449_v10 = vadd.f32 %v6948_v2, %v6950_v5  ;;  %v1724_v38 = vadd.f32 %v6952_v28, %v1602_v53  ;;  %v1976_v32 = vadd.f32 %v1947_v59, %v1850_v14  ;;  %v7558_v28 = vld [vmem:[#allocation31_spill] sm:$0xff]  ;;  %v4722_v14 = vld [vmem:[%s7468_s5] ss:$0 sm:$0xff] }
 0x51c   : > { %v6970_v54 = vpop.f32.mrf.mxu1  ;;  %v1849_v12 = vadd.f32 %v1818_v43, %v1721_v45  ;;  %v1727_v5 = vadd.f32 %v6954_v37, %v1605_v8 }
 0x51d   : > { %7555 = vst [vmem:[#allocation37_spill] sm:$0xff] %v6970_v54  ;;  %v5193_v55 = vpop.f32.mrf.mxu0  ;;  %v1441_v54 = vadd.f32 %v1440_v60, %v1339_v26  ;;  %v1723_v19 = vadd.f32 %v5172_v17, %v1601_v36  ;;  %v1852_v29 = vadd.f32 %v5189_v52, %v1724_v38 }
 0x51e   : > { %v6972_v57 = vpop.f32.mrf.mxu1  ;;  %v1975_v17 = vadd.f32 %v1944_v27, %v1849_v12 }
 0x51f   : > { %v1837_v0 = vpop.f32.mrf.mxu0  ;;  %7556 = vst [vmem:[#allocation38_spill] sm:$0xff] %v6972_v57  ;;  %v1438_v57 = vadd.f32 %v1437_v23, %v1336_v47  ;;  %v1604_v13 = vadd.f32 %v1587_v48, %v1441_v54  ;;  %v1851_v15 = vadd.f32 %v5188_v31, %v1723_v19  ;;  %v1606_v23 = vadd.f32 %v5161_v41, %v1449_v10 }
 0x520   : > { %v2170_v46 = vpop.f32.mrf.mxu1  ;;  %v7561_v43 = vld [vmem:[#allocation34_spill] sm:$0xff] }
 0x521   : > { %v5220_v58 = vpop.f32.mrf.mxu0  ;;  %v1726_v60 = vadd.f32 %v1709_v40, %v1604_v13  ;;  %v1977_v20 = vadd.f32 %v6958_v42, %v1851_v15  ;;  %v7560_v31 = vld [vmem:[#allocation35_spill] sm:$0xff] }
 0x522   : > { %v6974_v56 = vpop.f32.mrf.mxu1  ;;  %v1855_v27 = vadd.f32 %v7560_v31, %v1727_v5  ;;  %v7565_v4 = vld [vmem:[#allocation36_spill] sm:$0xff] }
 0x523   : > { %v2054_v62 = vpop.f32.mrf.mxu0  ;;  %7557 = vst [vmem:[#allocation39_spill] sm:$0xff] %v6974_v56  ;;  %v1603_v56 = vadd.f32 %v1584_v39, %v1438_v57  ;;  %v1854_v35 = vadd.f32 %v1837_v0, %v1726_v60  ;;  %v1728_v39 = vadd.f32 %v7558_v28, %v1606_v23  ;;  %v2087_v41 = vadd.f32 %v5220_v58, %v1977_v20  ;;  %v2362_v0 = vld [vmem:[%s7471_s8] sm:$0x1] }
 0x524   : > { %v2173_v6 = vpop.f32.mrf.mxu1  ;;  %v2085_v24 = vadd.f32 %v2054_v62, %v1975_v17  ;;  %v7562_v52 = vld [vmem:[#allocation37_spill] sm:$0xff] }
 0x525   : > { %v5221_v61 = vpop.f32.mrf.mxu0  ;;  %v1725_v47 = vadd.f32 %v1706_v22, %v1603_v56  ;;  %v7559_v22 = vld [vmem:[#allocation32_spill] sm:$0xff]  ;;  %v1856_v50 = vadd.f32 %v5193_v55, %v1728_v39  ;;  %v1980_v25 = vadd.f32 %v7562_v52, %v1854_v35  ;;  %v7564_v56 = vld [vmem:[#allocation33_spill] sm:$0xff] }
 0x526   : > { %v6980_v18 = vpop.f32.mrf.mxu1  ;;  %v1978_v40 = vadd.f32 %v7559_v22, %v1852_v29  ;;  %v2201_v53 = vadd.f32 %v2170_v46, %v2085_v24  ;;  %v7563_v57 = vld [vmem:[#allocation38_spill] sm:$0xff]  ;;  %v1981_v3 = vadd.f32 %v7564_v56, %v1855_v27 }
 0x527   : > { %v2057_v51 = vpop.f32.mrf.mxu0  ;;  %v1853_v34 = vadd.f32 %v1834_v7, %v1725_v47  ;;  %v2203_v58 = vadd.f32 %v7563_v57, %v2087_v41  ;;  %v1982_v13 = vadd.f32 %v7565_v4, %v1856_v50  ;;  %v7567_v47 = vld [vmem:[#allocation25_spill] sm:$0xff] }
 0x528   : > { %v2186_v26 = vpop.f32.mrf.mxu1  ;;  %v2086_v11 = vadd.f32 %v2057_v51, %v1976_v32  ;;  %v2088_v42 = vadd.f32 %v5221_v61, %v1978_v40  ;;  %v7571_v57 = vld [vmem:[#allocation29_spill] sm:$0xff] }
 0x529   : > { %v6976_v63 = vpop.f32.mrf.mxu0  ;;  %v1979_v59 = vadd.f32 %v7561_v43, %v1853_v34 }
 0x52a   : > { %v5241_v1 = vpop.f32.mrf.mxu1  ;;  %v2202_v45 = vadd.f32 %v2173_v6, %v2086_v11  ;;  %v7566_v6 = vld [vmem:[#allocation39_spill] sm:$0xff] }
 0x52b   : > { %v2070_v49 = vpop.f32.mrf.mxu0  ;;  %v2204_v19 = vadd.f32 %v7566_v6, %v2088_v42 }
 0x52c   : > { %v2089_v7 = vadd.f32 %v2070_v49, %v1979_v59  ;;  %v2189_v37 = vpop.f32.mrf.mxu1 }
 0x52d   : > { %v6978_v44 = vpop.f32.mrf.mxu0 }
 0x52e   : > { %v2092_v12 = vadd.f32 %v6978_v44, %v1982_v13  ;;  %v2205_v16 = vadd.f32 %v2186_v26, %v2089_v7 }
 0x52f   : > { %v2073_v30 = vpop.f32.mrf.mxu0 }
 0x530   : > { %v2090_v54 = vadd.f32 %v2073_v30, %v1980_v25  ;;  %v2091_v30 = vadd.f32 %v6976_v63, %v1981_v3  ;;  %v2208_v24 = vadd.f32 %v5241_v1, %v2092_v12 }
 0x531   : > { %v5252_v21 = vpop.f32.mrf.mxu0 }
 0x532   : > { %v2317_v46 = vadd.f32 %v5252_v21, %v2203_v58  ;;  %v2206_v10 = vadd.f32 %v2189_v37, %v2090_v54  ;;  %v2207_v44 = vadd.f32 %v6980_v18, %v2091_v30  ;;  %v7568_v37 = vld [vmem:[#allocation27_spill] sm:$0xff]  ;;  %v7569_v54 = vld [vmem:[#allocation26_spill] sm:$0xff] }
 0x533   : > { %v2284_v9 = vpop.f32.mrf.mxu0  ;;  %v7572_v58 = vld [vmem:[#allocation30_spill] sm:$0xff] }
 0x534   : > { %v2315_v62 = vadd.f32 %v2284_v9, %v2201_v53  ;;  %v2331_v17 = vadd.f32 %v4722_v14, %v2317_v46 }
 0x535   : > { %v5253_v33 = vpop.f32.mrf.mxu0 }
 0x536   : > { %v2329_v9 = vadd.f32 %v4722_v14, %v2315_v62  ;;  %v2318_v8 = vadd.f32 %v5253_v33, %v2204_v19 }
 0x537   : > { %v2287_v2 = vpop.f32.mrf.mxu0 }
 0x538   : > { %v2316_v51 = vadd.f32 %v2287_v2, %v2202_v45  ;;  %v2332_v20 = vadd.f32 %v4722_v14, %v2318_v8 }
 0x539   : > { %v5256_v48 = vpop.f32.mrf.mxu0 }
 0x53a   : > { %v2330_v23 = vadd.f32 %v4722_v14, %v2316_v51  ;;  %v2321_v2 = vadd.f32 %v5256_v48, %v2207_v44 }
 0x53b   : > { %v2300_v36 = vpop.f32.mrf.mxu0 }
 0x53c   : > { %v2319_v60 = vadd.f32 %v2300_v36, %v2205_v16  ;;  %v2335_v31 = vadd.f32 %v4722_v14, %v2321_v2 }
 0x53d   : > { %v5257_v55 = vpop.f32.mrf.mxu0 }
 0x53e   : > { %v2445_v61 = vpop.f32.mrf.mxu1  ;;  %v2333_v5 = vadd.f32 %v4722_v14, %v2319_v60  ;;  %v2322_v28 = vadd.f32 %v5257_v55, %v2208_v24 }
 0x53f   : > { %v2446_v49 = vadd.f32 %v2445_v61, %v2362_v0  ;;  %v2303_v15 = vpop.f32.mrf.mxu0  ;;  %v7570_v0 = vld [vmem:[#allocation28_spill] sm:$0xff] }
 0x540   : > { %v5276_v38 = vpop.f32.mrf.mxu1  ;;  %v2320_v32 = vadd.f32 %v2303_v15, %v2206_v10  ;;  %v2336_v27 = vadd.f32 %v4722_v14, %v2322_v28  ;;  %v5713_v28 = vld [vmem:[#allocation13 + $0x38] sm:$0xff]  }
 0x541   : > { %v2454_v21 = vrot.slane %v2446_v49, %v7567_v47  ;;  %5346 = vmatprep.subr.bf16.mxu1 %v5713_v28 }
 0x542   : > { %v2448_v29 = vpop.f32.mrf.mxu1  ;;  %v2334_v33 = vadd.f32 %v4722_v14, %v2320_v32 }
 0x543   : > { %v2455_v63 = vadd.f32 %v2454_v21, %v2329_v9  ;;  %v2456_v34 = vadd.f32 %v2454_v21, %v2330_v23  ;;  %v2457_v26 = vadd.f32 %v2454_v21, %v2331_v17  ;;  %v2458_v39 = vadd.f32 %v2454_v21, %v2332_v20 }
 0x544   : > { %v5277_v35 = vpop.f32.mrf.mxu1  ;;  %v2459_v22 = vadd.f32 %v2454_v21, %v2333_v5  ;;  %v2460_v50 = vadd.f32 %v2454_v21, %v2334_v33  ;;  %v2461_v59 = vadd.f32 %v2454_v21, %v2335_v31  ;;  %v2462_v18 = vadd.f32 %v2454_v21, %v2336_v27  ;;  %v5714_v33 = vld [vmem:[#allocation13 + $0x78] sm:$0xff]   ;;  %v5719_v31 = vld [vmem:[#allocation13 + $0x20] sm:$0xff]  }
 0x545   : > { %v2469_v11 = vadd.f32 %v2456_v34, %v2455_v63  ;;  %v5720_v27 = vld [vmem:[#allocation13 + $0x60] sm:$0xff]  }
 0x547   : > { %v2470_v41 = vadd.f32 %v2469_v11, %v2457_v26 }
 0x549   : > { %v2471_v40 = vadd.f32 %v2470_v41, %v2458_v39  ;;  %v5716_v41 = vld [vmem:[#allocation13 + $0x70] sm:$0xff]  }
 0x54b   : > { %v2472_v43 = vadd.f32 %v2471_v40, %v2459_v22  ;;  %v5718_v40 = vld [vmem:[#allocation13 + $0x68] sm:$0xff]  }
 0x54d   : > { %v2473_v52 = vadd.f32 %v2472_v43, %v2460_v50  ;;  %v5722_v43 = vld [vmem:[#allocation13 + $0x58] sm:$0xff]  }
 0x54f   : > { %v2474_v25 = vadd.f32 %v2473_v52, %v2461_v59  ;;  %v5724_v52 = vld [vmem:[#allocation13 + $0x50] sm:$0xff]  }
 0x551   : > { %v2475_v42 = vadd.f32 %v2474_v25, %v2462_v18  ;;  %v5726_v25 = vld [vmem:[#allocation13 + $0x48] sm:$0xff]  }
 0x553   : > { %v2476_v1 = vrot.slane %v2475_v42, 4 }
 0x555   : > { %v2477_v53 = vadd.f32 %v2476_v1, %v2475_v42  ;;  %v5727_v42 = vld [vmem:[#allocation13] sm:$0xff]  }
 0x556   : > { %v5728_v1 = vld [vmem:[#allocation13 + $0x40] sm:$0xff]  }
 0x557   : > { %v2478_v45 = vrot.slane %v2477_v53, 2 }
 0x559   : > { %v2479_v48 = vadd.f32 %v2478_v45, %v2477_v53  ;;  %v7062_v53 = vld [vmem:[#allocation13 + $0xf8] sm:$0xff]  }
 0x55a   : > { %v7064_v45 = vld [vmem:[#allocation13 + $0xb8] sm:$0xff]  }
 0x55b   : > { %v2480_v36 = vrot.slane %v2479_v48, 1 }
 0x55d   : > { %v2481_v7 = vadd.f32 %v2480_v36, %v2479_v48 }
 0x55f   : > { %5287 = vmatmul.mubr.f32.vlgmr.msra.gmra.mxu0 %v2481_v7 }
 0x560   : > { %5290 = vmatpush3.msra.mxu0 %v7568_v37  ;;  %5297 = vmatprep.mubr.msk.f32.mxu0 %vm6145_vm1, %v7569_v54 }
 0x561   : > { %5291 = vmatprep.subr.mxu0 %v7569_v54 }
 0x562   : > { %5292 = vmatpush3.msra.mxu0 %v7570_v0 }
 0x563   : > { %5293 = vmatprep.subr.mxu0 %v7569_v54 }
 0x564   : > { %5294 = vmatpush3.msra.mxu0 %v7571_v57 }
 0x565   : > { %5295 = vmatprep.subr.mxu0 %v7569_v54 }
 0x566   : > { %5296 = vmatpush3.msra.mxu0 %v7572_v58 }
 0x567   : > { %5311 = vmatprep.subr.mxu0 %v7569_v54 }
 0x61f   : > { %v2548_v62 = vpop.f32.mrf.mxu0 }
 0x620   : > { %5298 = vmatmul.mubr.msk.f32.vlgmr.msra.gmra.mxu0 %vm763_vm2, %v2548_v62 }
 0x621   : > { %v5288_v51 = vpop.f32.mrf.mxu0  ;;  %5312 = vmatpush3.msra.mxu0 %v7568_v37  ;;  %5319 = vmatprep.mubr.msk.f32.mxu0 %vm6145_vm1, %v7569_v54 }
 0x622   : > { %5313 = vmatprep.subr.mxu0 %v7569_v54 }
 0x623   : > { %5314 = vmatpush3.msra.mxu0 %v7570_v0 }
 0x624   : > { %5315 = vmatprep.subr.mxu0 %v7569_v54 }
 0x625   : > { %5316 = vmatpush3.msra.mxu0 %v7571_v57 }
 0x626   : > { %5317 = vmatprep.subr.mxu0 %v7569_v54 }
 0x627   : > { %5318 = vmatpush3.msra.mxu0 %v7572_v58  ;;  %v4734_v58 = vld [vmem:[%s7473_s10] ss:$0 sm:$0xff] }
 0x628   : > { %5322 = vmatprep.subr.bf16.mxu0 %v5714_v33 }
 0x6e0   : > { %v2621_v55 = vpop.f32.mrf.mxu0 }
 0x6e1   : > { %v2626_v56 = vmul.f32 0.00390625, %v2621_v55 }
 0x6e2   : > { %v5299_v3 = vpop.f32.mrf.mxu0 }
 0x6e3   : > { %v2630_v4 = vrot.slane %v2626_v56, %v7567_v47  ;;  %v4735_v3 = vld [vmem:[%s7474_s11] ss:$0 sm:$0xff] }
 0x6e5   : > { %v7029_v13 = vsub.f32 %v2455_v63, %v2630_v4  ;;  %v7031_v61 = vsub.f32 %v2456_v34, %v2630_v4  ;;  %v7033_v46 = vsub.f32 %v2457_v26, %v2630_v4  ;;  %v7035_v6 = vsub.f32 %v2458_v39, %v2630_v4  ;;  %v5715_v39 = vld [vmem:[#allocation13 + $0x30] sm:$0xff]  }
 0x6e6   : > { %v7041_v30 = vsub.f32 %v2459_v22, %v2630_v4  ;;  %v7045_v16 = vsub.f32 %v2460_v50, %v2630_v4  ;;  %v7049_v38 = vsub.f32 %v2461_v59, %v2630_v4  ;;  %v7053_v23 = vsub.f32 %v2462_v18, %v2630_v4  ;;  %v5717_v22 = vld [vmem:[#allocation13 + $0x28] sm:$0xff]   ;;  %v5721_v50 = vld [vmem:[#allocation13 + $0x18] sm:$0xff]   ;;  %v5723_v59 = vld [vmem:[#allocation13 + $0x10] sm:$0xff]  }
 0x6e7   : > { %v2639_v19 = vmul.f32 %v7029_v13, %v7029_v13  ;;  %v2640_v49 = vmul.f32 %v7031_v61, %v7031_v61  ;;  %v2641_v12 = vmul.f32 %v7033_v46, %v7033_v46  ;;  %v2642_v10 = vmul.f32 %v7035_v6, %v7035_v6  ;;  %v5725_v18 = vld [vmem:[#allocation13 + $0x8] sm:$0xff]  }
 0x6e8   : > { %v2643_v9 = vmul.f32 %v7041_v30, %v7041_v30  ;;  %v2644_v21 = vmul.f32 %v7045_v16, %v7045_v16  ;;  %v2645_v29 = vmul.f32 %v7049_v38, %v7049_v38  ;;  %v2646_v32 = vmul.f32 %v7053_v23, %v7053_v23 }
 0x6e9   : > { %v2647_v14 = vadd.f32 %v2640_v49, %v2639_v19 }
 0x6eb   : > { %v2648_v15 = vadd.f32 %v2647_v14, %v2641_v12 }
 0x6ed   : > { %v2649_v8 = vadd.f32 %v2648_v15, %v2642_v10 }
 0x6ef   : > { %v2650_v60 = vadd.f32 %v2649_v8, %v2643_v9 }
 0x6f1   : > { %v2651_v17 = vadd.f32 %v2650_v60, %v2644_v21 }
 0x6f3   : > { %v2652_v63 = vadd.f32 %v2651_v17, %v2645_v29 }
 0x6f5   : > { %v2653_v34 = vadd.f32 %v2652_v63, %v2646_v32 }
 0x6f7   : > { %v2654_v44 = vrot.slane %v2653_v34, 4 }
 0x6f9   : > { %v2655_v35 = vadd.f32 %v2654_v44, %v2653_v34 }
 0x6fb   : > { %v2656_v20 = vrot.slane %v2655_v35, 2 }
 0x6fd   : > { %v2657_v24 = vadd.f32 %v2656_v20, %v2655_v35 }
 0x6ff   : > { %v2658_v26 = vrot.slane %v2657_v24, 1 }
 0x701   : > { %v2659_v11 = vadd.f32 %v2658_v26, %v2657_v24 }
 0x703   : > { %5309 = vmatmul.mubr.f32.vlgmr.msra.gmra.mxu1 %v2659_v11 }
 0x704   : > { %5347 = vmatpush3.bf16.msra.mxu1 %v5713_v28 }
 0x705   : > { %5348 = vmatprep.subr.bf16.mxu1 %v5715_v39 }
 0x708   : > { %5349 = vmatpush3.bf16.msra.mxu1 %v5715_v39 }
 0x709   : > { %5350 = vmatprep.subr.bf16.mxu1 %v5717_v22 }
 0x70c   : > { %5351 = vmatpush3.bf16.msra.mxu1 %v5717_v22 }
 0x70d   : > { %5352 = vmatprep.subr.bf16.mxu1 %v5719_v31 }
 0x710   : > { %5353 = vmatpush3.bf16.msra.mxu1 %v5719_v31 }
 0x711   : > { %5354 = vmatprep.subr.bf16.mxu1 %v5721_v50 }
 0x714   : > { %5355 = vmatpush3.bf16.msra.mxu1 %v5721_v50 }
 0x715   : > { %5356 = vmatprep.subr.bf16.mxu1 %v5723_v59 }
 0x718   : > { %5357 = vmatpush3.bf16.msra.mxu1 %v5723_v59 }
 0x719   : > { %5358 = vmatprep.subr.bf16.mxu1 %v5725_v18 }
 0x71c   : > { %5359 = vmatpush3.bf16.msra.mxu1 %v5725_v18 }
 0x71d   : > { %5360 = vmatprep.subr.bf16.mxu1 %v5727_v42 }
 0x720   : > { %5361 = vmatpush3.bf16.msra.mxu1 %v5727_v42 }
 0x721   : > { %5394 = vmatprep.subr.bf16.mxu1 %v7062_v53 }
 0x7c3   : > { %v2726_v2 = vpop.f32.mrf.mxu1 }
 0x7c4   : > { %5320 = vmatmul.mubr.msk.f32.vlgmr.msra.gmra.mxu0 %vm763_vm2, %v2726_v2 }
 0x7c5   : > { %v5310_v5 = vpop.f32.mrf.mxu1  ;;  %5323 = vmatpush3.bf16.msra.mxu0 %v5714_v33 }
 0x7c6   : > { %5324 = vmatprep.subr.bf16.mxu0 %v5716_v41 }
 0x7c9   : > { %5325 = vmatpush3.bf16.msra.mxu0 %v5716_v41 }
 0x7ca   : > { %5326 = vmatprep.subr.bf16.mxu0 %v5718_v40 }
 0x7cd   : > { %5327 = vmatpush3.bf16.msra.mxu0 %v5718_v40 }
 0x7ce   : > { %5328 = vmatprep.subr.bf16.mxu0 %v5720_v27 }
 0x7d1   : > { %5329 = vmatpush3.bf16.msra.mxu0 %v5720_v27 }
 0x7d2   : > { %5330 = vmatprep.subr.bf16.mxu0 %v5722_v43 }
 0x7d5   : > { %5331 = vmatpush3.bf16.msra.mxu0 %v5722_v43 }
 0x7d6   : > { %5332 = vmatprep.subr.bf16.mxu0 %v5724_v52 }
 0x7d9   : > { %5333 = vmatpush3.bf16.msra.mxu0 %v5724_v52 }
 0x7da   : > { %5334 = vmatprep.subr.bf16.mxu0 %v5726_v25 }
 0x7dd   : > { %5335 = vmatpush3.bf16.msra.mxu0 %v5726_v25 }
 0x7de   : > { %5336 = vmatprep.subr.bf16.mxu0 %v5728_v1 }
 0x7e1   : > { %5337 = vmatpush3.bf16.msra.mxu0 %v5728_v1 }
 0x7e2   : > { %5370 = vmatprep.subr.bf16.mxu0 %v7064_v45 }
 0x884   : > { %v2799_v48 = vpop.f32.mrf.mxu0 }
 0x885   : > { %v2803_v36 = vmul.f32 0.00390625, %v2799_v48 }
 0x886   : > { %v5321_v7 = vpop.f32.mrf.mxu0 }
 0x887   : > { %v2804_v37 = vadd.f32 1e-06, %v2803_v36 }
 0x889   : > { %5827 = vrsqrt.f32 %v2804_v37 }
 0x896   : > { %v5828_v0 = vpop.eup %5827 }
 0x897   : > { %v2809_v57 = vrot.slane %v5828_v0, %v7567_v47 }
 0x899   : > { %v2810_v62 = vmul.f32 %v2809_v57, %v7029_v13  ;;  %v2811_v51 = vmul.f32 %v2809_v57, %v7031_v61  ;;  %v2812_v55 = vmul.f32 %v2809_v57, %v7033_v46  ;;  %v2813_v56 = vmul.f32 %v2809_v57, %v7035_v6 }
 0x89a   : > { %v2814_v4 = vmul.f32 %v2809_v57, %v7041_v30  ;;  %v2815_v47 = vmul.f32 %v2809_v57, %v7045_v16  ;;  %v2816_v19 = vmul.f32 %v2809_v57, %v7049_v38  ;;  %v2817_v49 = vmul.f32 %v2809_v57, %v7053_v23 }
 0x89b   : > { %v2824_v12 = vmul.f32 %v4734_v58, %v2810_v62  ;;  %v2825_v13 = vmul.f32 %v4734_v58, %v2811_v51  ;;  %v2826_v14 = vmul.f32 %v4734_v58, %v2812_v55  ;;  %v2827_v61 = vmul.f32 %v4734_v58, %v2813_v56 }
 0x89c   : > { %v2828_v10 = vmul.f32 %v4734_v58, %v2814_v4  ;;  %v2829_v46 = vmul.f32 %v4734_v58, %v2815_v47  ;;  %v2830_v15 = vmul.f32 %v4734_v58, %v2816_v19  ;;  %v2831_v6 = vmul.f32 %v4734_v58, %v2817_v49  ;;  %v7083_v58 = vld [vmem:[#allocation3 + $0x8] sm:$0x3] }
 0x89d   : > { %v2839_v9 = vadd.f32 %v4735_v3, %v2825_v13  ;;  %v2840_v8 = vadd.f32 %v4735_v3, %v2826_v14  ;;  %v2838_v21 = vadd.f32 %v4735_v3, %v2824_v12  ;;  %v2841_v60 = vadd.f32 %v4735_v3, %v2827_v61 }
 0x89e   : > { %v2842_v29 = vadd.f32 %v4735_v3, %v2828_v10  ;;  %v2843_v30 = vadd.f32 %v4735_v3, %v2829_v46  ;;  %v2844_v38 = vadd.f32 %v4735_v3, %v2830_v15  ;;  %v2845_v23 = vadd.f32 %v4735_v3, %v2831_v6 }
 0x89f   : > { %v4737_v17 = vmul.f32 -1.442695, %v2839_v9  ;;  %v4738_v16 = vmul.f32 -1.442695, %v2840_v8  ;;  %v4736_v32 = vmul.f32 -1.442695, %v2838_v21 }
 0x8a0   : > { %v4739_v63 = vmul.f32 -1.442695, %v2841_v60  ;;  %v4740_v34 = vmul.f32 -1.442695, %v2842_v29  ;;  %v4741_v44 = vmul.f32 -1.442695, %v2843_v30 }
 0x8a1   : > { %5829 = vpow2.f32 %v4737_v17  ;;  %v4742_v35 = vmul.f32 -1.442695, %v2844_v38  ;;  %v4743_v20 = vmul.f32 -1.442695, %v2845_v23  ;;  %v2988_v3 = vrot.slane %v7569_v54, 1 }
 0x8a2   : > { %5831 = vpow2.f32 %v4738_v16  ;;  %v2989_v4 = vrot.slane %v7083_v58, 1 }
 0x8a3   : > { %5833 = vpow2.f32 %v4736_v32 }
 0x8a4   : > { %5835 = vpow2.f32 %v4739_v63  ;;  %v2990_v6 = vsel %vm1204_vm4, %v2988_v3, %v2989_v4  ;;  %v5731_v63 = vld [vmem:[#allocation13 + $0xf0] sm:$0xff]   ;;  %v5736_v4 = vld [vmem:[#allocation13 + $0xa0] sm:$0xff]  }
 0x8a5   : > { %5837 = vpow2.f32 %v4740_v34 }
 0x8a6   : > { %5839 = vpow2.f32 %v4741_v44 }
 0x8a7   : > { %5841 = vpow2.f32 %v4742_v35 }
 0x8a8   : > { %5843 = vpow2.f32 %v4743_v20 }
 0x8ae   : > { %v5830_v24 = vpop.eup %5829 }
 0x8af   : > { %v5832_v26 = vpop.eup %5831  ;;  %v2871_v11 = vadd.f32 1.0, %v5830_v24 }
 0x8b0   : > { %v5834_v2 = vpop.eup %5833  ;;  %v2872_v5 = vadd.f32 1.0, %v5832_v26 }
 0x8b1   : > { %v5836_v28 = vpop.eup %5835  ;;  %5845 = vrcp.f32 %v2871_v11  ;;  %v2870_v33 = vadd.f32 1.0, %v5834_v2 }
 0x8b2   : > { %v5838_v39 = vpop.eup %5837  ;;  %5847 = vrcp.f32 %v2872_v5  ;;  %v2873_v41 = vadd.f32 1.0, %v5836_v28 }
 0x8b3   : > { %v5840_v22 = vpop.eup %5839  ;;  %5849 = vrcp.f32 %v2870_v33  ;;  %v2874_v40 = vadd.f32 1.0, %v5838_v39 }
 0x8b4   : > { %v5842_v31 = vpop.eup %5841  ;;  %5851 = vrcp.f32 %v2873_v41  ;;  %v2875_v27 = vadd.f32 1.0, %v5840_v22  ;;  %v3267_v41 = vrot.slane %v7569_v54, 2 }
 0x8b5   : > { %v5844_v50 = vpop.eup %5843  ;;  %5853 = vrcp.f32 %v2874_v40  ;;  %v2876_v43 = vadd.f32 1.0, %v5842_v31 }
 0x8b6   : > { %5855 = vrcp.f32 %v2875_v27  ;;  %v2877_v59 = vadd.f32 1.0, %v5844_v50  ;;  %v5732_v27 = vld [vmem:[#allocation13 + $0xb0] sm:$0xff]   ;;  %v5733_v50 = vld [vmem:[#allocation13 + $0xe8] sm:$0xff]  }
 0x8b7   : > { %5857 = vrcp.f32 %v2876_v43 }
 0x8b8   : > { %5859 = vrcp.f32 %v2877_v59 }
 0x8be   : > { %v5846_v52 = vpop.eup %5845 }
 0x8bf   : > { %v5848_v18 = vpop.eup %5847  ;;  %v2895_v25 = vmul.f32 %v5846_v52, %v2839_v9 }
 0x8c0   : > { %v5850_v42 = vpop.eup %5849  ;;  %v2896_v1 = vmul.f32 %v5848_v18, %v2840_v8  ;;  %v3268_v18 = vrot.slane %v7083_v58, 2 }
 0x8c1   : > { %v5852_v48 = vpop.eup %5851  ;;  %v2894_v36 = vmul.f32 %v5850_v42, %v2838_v21  ;;  %2925 = vst [vmem:[#allocation3 + $0x21] sm:$0xff] %v2895_v25 }
 0x8c2   : > { %v5854_v7 = vpop.eup %5853  ;;  %2926 = vst [vmem:[#allocation3 + $0x31] sm:$0xff] %v2896_v1  ;;  %v2897_v37 = vmul.f32 %v5852_v48, %v2841_v60  ;;  %v7171_v1 = vld [vmem:[#allocation3 + $0x98] sm:$0x3]  ;;  %v3269_v58 = vsel %vm1452_vm5, %v3267_v41, %v3268_v18  ;;  %v5747_v18 = vld [vmem:[#allocation13 + $0x170] sm:$0xff]  }
 0x8c3   : > { %v5856_v0 = vpop.eup %5855  ;;  %2924 = vst [vmem:[#allocation3 + $0x11] sm:$0xff] %v2894_v36  ;;  %v2898_v57 = vmul.f32 %v5854_v7, %v2842_v29  ;;  %v5734_v36 = vld [vmem:[#allocation13 + $0xa8] sm:$0xff]  }
 0x8c4   : > { %v5858_v62 = vpop.eup %5857  ;;  %2927 = vst [vmem:[#allocation3 + $0x41] sm:$0xff] %v2897_v37  ;;  %v2899_v51 = vmul.f32 %v5856_v0, %v2843_v30  ;;  %v5735_v0 = vld [vmem:[#allocation13 + $0xe0] sm:$0xff]  }
 0x8c5   : > { %v5860_v55 = vpop.eup %5859  ;;  %2928 = vst [vmem:[#allocation3 + $0x51] sm:$0xff] %v2898_v57  ;;  %v2900_v56 = vmul.f32 %v5858_v62, %v2844_v38 }
 0x8c6   : > { %2929 = vst [vmem:[#allocation3 + $0x61] sm:$0xff] %v2899_v51  ;;  %v2901_v47 = vmul.f32 %v5860_v55, %v2845_v23  ;;  %v4162_v55 = vrot.slane %v7171_v1, 2 }
 0x8c7   : > { %2930 = vst [vmem:[#allocation3 + $0x71] sm:$0xff] %v2900_v56 }
 0x8c8   : > { %v7087_v19 = vld [vmem:[#allocation3 + $0x20] sm:$0xff]  ;;  %v7089_v49 = vld [vmem:[#allocation3 + $0x28] sm:$0x3]  ;;  %2931 = vst [vmem:[#allocation3 + $0x81] sm:$0xff] %v2901_v47 }
 0x8c9   : > { %v7091_v12 = vld [vmem:[#allocation3 + $0x30] sm:$0xff]  ;;  %v7093_v13 = vld [vmem:[#allocation3 + $0x38] sm:$0x3]  ;;  %v2994_v14 = vrot.slane %v7087_v19, 1  ;;  %v2995_v61 = vrot.slane %v7089_v49, 1 }
 0x8ca   : > { %v7097_v10 = vld [vmem:[#allocation3 + $0x10] sm:$0xff]  ;;  %v7101_v46 = vpack.c.bf16 %v7091_v12, %v7087_v19  ;;  %v2935_v15 = vld [vmem:[#allocation3 + $0x18] sm:$0x3]  ;;  %v2997_v9 = vrot.slane %v7091_v12, 1  ;;  %v2998_v8 = vrot.slane %v7093_v13, 1 }
 0x8cb   : > { %v2952_v21 = vpack.c.bf16 %v7097_v10, %v7569_v54  ;;  %v7110_v60 = vld [vmem:[#allocation3 + $0x40] sm:$0xff]  ;;  %v2991_v29 = vrot.slane %v7097_v10, 1  ;;  %v2992_v30 = vrot.slane %v2935_v15, 1  ;;  %v7114_v17 = vsel %vm1204_vm4, %v2994_v14, %v2995_v61  ;;  %v7116_v16 = vld [vmem:[#allocation3 + $0x48] sm:$0x3]  ;;  %v5737_v61 = vld [vmem:[#allocation13 + $0xd8] sm:$0xff]  }
 0x8cc   : > { %v7118_v32 = vld [vmem:[#allocation3 + $0x50] sm:$0xff]  ;;  %v7121_v38 = vsel %vm1204_vm4, %v2997_v9, %v2998_v8  ;;  %v7123_v23 = vld [vmem:[#allocation3 + $0x58] sm:$0x3]  ;;  %v3000_v34 = vrot.slane %v7110_v60, 1  ;;  %v3001_v24 = vrot.slane %v7116_v16, 1  ;;  %v3270_v25 = vrot.slane %v7097_v10, 2 }
 0x8cd   : > { %5362 = vmatprep.mubr.bf16.mxu1 %v2952_v21  ;;  %v7128_v44 = vpack.c.bf16 %v7118_v32, %v7110_v60  ;;  %v7131_v35 = vsel %vm1204_vm4, %v2991_v29, %v2992_v30  ;;  %v7135_v20 = vpack.c.bf16 %v7121_v38, %v7114_v17  ;;  %v7138_v26 = vld [vmem:[#allocation3 + $0x60] sm:$0xff]  ;;  %v7140_v11 = vld [vmem:[#allocation3 + $0x68] sm:$0x3]  ;;  %v3003_v5 = vrot.slane %v7118_v32, 1  ;;  %v5738_v9 = vld [vmem:[#allocation13 + $0x98] sm:$0xff]  }
 0x8ce   : > { %5363 = vmatmul.mubr.bf16.vlgmr.msra.gmra.mxu1 %v7101_v46  ;;  %v3020_v2 = vpack.c.bf16 %v7131_v35, %v2990_v6  ;;  %v3004_v28 = vrot.slane %v7123_v23, 1  ;;  %v7146_v33 = vld [vmem:[#allocation3 + $0x70] sm:$0xff]  ;;  %v7148_v39 = vld [vmem:[#allocation3 + $0x78] sm:$0x3]  ;;  %v7154_v22 = vsel %vm1204_vm4, %v3000_v34, %v3001_v24  ;;  %v3006_v40 = vrot.slane %v7138_v26, 1  ;;  %v5741_v30 = vld [vmem:[#allocation13 + $0xc8] sm:$0xff]  }
 0x8cf   : > { %5395 = vmatpush3.bf16.msra.mxu1 %v7062_v53  ;;  %5366 = vmatprep.mubr.bf16.mxu1 %v7128_v44  ;;  %v3007_v43 = vrot.slane %v7140_v11, 1  ;;  %v3009_v59 = vrot.slane %v7146_v33, 1  ;;  %v3010_v53 = vrot.slane %v7148_v39, 1  ;;  %v3271_v42 = vrot.slane %v2935_v15, 2  ;;  %v7192_v51 = vld [vmem:[#allocation3 + $0x88] sm:$0x3] }
 0x8d0   : > { %5338 = vmatprep.mubr.bf16.mxu0 %v3020_v2  ;;  %5396 = vmatprep.subr.bf16.mxu1 %v5731_v63  ;;  %v7158_v31 = vsel %vm1204_vm4, %v3003_v5, %v3004_v28  ;;  %v7176_v48 = vpack.c.bf16 %v7146_v33, %v7138_v26  ;;  %v3441_v57 = vpack.c.bf16 %v7087_v19, %v7097_v10  ;;  %v3732_v10 = vrot.slane %v7192_v51, 2  ;;  %v5739_v8 = vld [vmem:[#allocation13 + $0xd0] sm:$0xff]   ;;  %v5743_v34 = vld [vmem:[#allocation13 + $0xc0] sm:$0xff]  }
 0x8d1   : > { %5339 = vmatmul.mubr.bf16.vlgmr.msra.gmra.mxu0 %v7135_v20  ;;  %v7166_v52 = vpack.c.bf16 %v7158_v31, %v7154_v22  ;;  %v7179_v7 = vsel %vm1204_vm4, %v3006_v40, %v3007_v43  ;;  %v7182_v37 = vsel %vm1204_vm4, %v3009_v59, %v3010_v53  ;;  %v7190_v62 = vsel %vm1452_vm5, %v3270_v25, %v3271_v42  ;;  %v5740_v29 = vld [vmem:[#allocation13 + $0x90] sm:$0xff]   ;;  %v5744_v24 = vld [vmem:[#allocation13 + $0x80] sm:$0xff]   ;;  %v5745_v40 = vld [vmem:[#allocation13 + $0x178] sm:$0xff]  }
 0x8d2   : > { %5371 = vmatpush3.bf16.msra.mxu0 %v7064_v45  ;;  %v7184_v45 = vld [vmem:[#allocation3 + $0x80] sm:$0xff]  ;;  %v7198_v56 = vpack.c.bf16 %v7182_v37, %v7179_v7  ;;  %v3299_v14 = vpack.c.bf16 %v7190_v62, %v3269_v58  ;;  %v7205_v15 = vsel %vm1452_vm5, %v3267_v41, %v4162_v55  ;;  %v3273_v2 = vrot.slane %v7087_v19, 2  ;;  %v5746_v53 = vld [vmem:[#allocation13 + $0x138] sm:$0xff]  }
 0x8d3   : > { %5342 = vmatprep.mubr.bf16.mxu0 %v7166_v52  ;;  %5397 = vmatpush3.bf16.msra.mxu1 %v5731_v63  ;;  %v3731_v47 = vrot.slane %v7184_v45, 2  ;;  %v5742_v63 = vld [vmem:[#allocation13 + $0x88] sm:$0xff]   ;;  %v3276_v5 = vrot.slane %v7091_v12, 2  ;;  %v3274_v28 = vrot.slane %v7089_v49, 2  ;;  %v3277_v41 = vrot.slane %v7093_v13, 2  ;;  %v5864_v54 = vld [vmem:[#allocation3] sm:$0xff] }
 0x8d4   : > { %5372 = vmatprep.subr.bf16.mxu0 %v5732_v27  ;;  %5398 = vmatprep.subr.bf16.mxu1 %v5733_v50  ;;  %v3282_v43 = vrot.slane %v7118_v32, 2  ;;  %v3283_v59 = vrot.slane %v7123_v23, 2  ;;  %v3442_v19 = vpack.c.bf16 %v7110_v60, %v7091_v12  ;;  %v3285_v42 = vrot.slane %v7138_v26, 2 }
 0x8d5   : > { %v7208_v6 = vsel %vm1452_vm5, %v3731_v47, %v3732_v10  ;;  %v3275_v49 = vsel %vm1452_vm5, %v3273_v2, %v3274_v28  ;;  %v7224_v13 = vsel %vm1452_vm5, %v3276_v5, %v3277_v41  ;;  %v3289_v58 = vrot.slane %v7148_v39, 2  ;;  %v5751_v47 = vld [vmem:[#allocation13 + $0x160] sm:$0xff]   ;;  %v5753_v10 = vld [vmem:[#allocation13 + $0x158] sm:$0xff]   ;;  %v5763_v2 = vld [vmem:[#allocation13 + $0x1f0] sm:$0xff]  }
 0x8d6   : > { %5373 = vmatpush3.bf16.msra.mxu0 %v5732_v27  ;;  %5367 = vmatmul.mubr.bf16.gmra.mxu1 %v7176_v48  ;;  %v4165_v21 = vpack.c.bf16 %v7205_v15, %v7208_v6  ;;  %v3279_v27 = vrot.slane %v7110_v60, 2  ;;  %v7232_v23 = vsel %vm1452_vm5, %v3282_v43, %v3283_v59  ;;  %v7235_v12 = vpack.c.bf16 %v7224_v13, %v3275_v49  ;;  %v5748_v60 = vld [vmem:[#allocation13 + $0x130] sm:$0xff]   ;;  %v5766_v59 = vld [vmem:[#allocation13 + $0x1a8] sm:$0xff]  }
 0x8d7   : > { %5399 = vmatpush3.bf16.msra.mxu1 %v5733_v50  ;;  %5410 = vmatprep.mubr.bf16.mxu1 %v3441_v57  ;;  %v3280_v50 = vrot.slane %v7116_v16, 2  ;;  %v3443_v16 = vpack.c.bf16 %v7138_v26, %v7118_v32  ;;  %v3288_v57 = vrot.slane %v7146_v33, 2  ;;  %v3444_v26 = vpack.c.bf16 %v7184_v45, %v7146_v33  ;;  %v5764_v41 = vld [vmem:[#allocation13 + $0x1b0] sm:$0xff]  }
 0x8d8   : > { %5374 = vmatprep.subr.bf16.mxu0 %v5734_v36  ;;  %5400 = vmatprep.subr.bf16.mxu1 %v5735_v0  ;;  %v3735_v39 = vpack.c.bf16 %v3275_v49, %v7190_v62  ;;  %v3589_v33 = vpack.c.bf16 %v7114_v17, %v7131_v35  ;;  %v5754_v62 = vld [vmem:[#allocation13 + $0x118] sm:$0xff]   ;;  %v5758_v17 = vld [vmem:[#allocation13 + $0x108] sm:$0xff]   ;;  %v5759_v35 = vld [vmem:[#allocation13 + $0x140] sm:$0xff]   ;;  %v3590_v28 = vpack.c.bf16 %v7154_v22, %v7121_v38  ;;  %v3586_v43 = vrot.slane %v7192_v51, 1 }
 0x8d9   : > { %5343 = vmatmul.mubr.bf16.gmra.mxu0 %v7198_v56  ;;  %v7229_v25 = vsel %vm1452_vm5, %v3279_v27, %v3280_v50  ;;  %v5765_v27 = vld [vmem:[#allocation13 + $0x1e8] sm:$0xff]   ;;  %v3585_v50 = vrot.slane %v7184_v45, 1  ;;  %v5768_v51 = vld [vmem:[#allocation13 + $0x1a0] sm:$0xff]   ;;  %v5770_v49 = vld [vmem:[#allocation13 + $0x198] sm:$0xff]  }
 0x8da   : > { %5375 = vmatpush3.bf16.msra.mxu0 %v5734_v36  ;;  %5386 = vmatprep.mubr.bf16.mxu0 %v3299_v14  ;;  %v7240_v32 = vpack.c.bf16 %v7232_v23, %v7229_v25  ;;  %v5749_v36 = vld [vmem:[#allocation13 + $0x168] sm:$0xff]  }
 0x8db   : > { %5401 = vmatpush3.bf16.msra.mxu1 %v5735_v0  ;;  %5376 = vmatprep.subr.bf16.mxu0 %v5736_v4  ;;  %v3286_v0 = vrot.slane %v7140_v11, 2  ;;  %v5750_v11 = vld [vmem:[#allocation13 + $0x128] sm:$0xff]   ;;  %v7272_v22 = vsel %vm1204_vm4, %v3585_v50, %v3586_v43 }
 0x8dc   : > { %5402 = vmatprep.subr.bf16.mxu1 %v5737_v61 }
 0x8dd   : > { %v3287_v55 = vsel %vm1452_vm5, %v3285_v42, %v3286_v0  ;;  %v5778_v42 = vld [vmem:[#allocation13 + $0x230] sm:$0xff]   ;;  %v5785_v0 = vld [vmem:[#allocation15 + $0x8] sm:$0xff]  }
 0x8de   : > { %5377 = vmatpush3.bf16.msra.mxu0 %v5736_v4  ;;  %v7251_v4 = vsel %vm1452_vm5, %v3288_v57, %v3289_v58  ;;  %v3737_v5 = vpack.c.bf16 %v3287_v55, %v7232_v23  ;;  %v4019_v23 = vrot.slane %v7171_v1, 1  ;;  %v5779_v1 = vld [vmem:[#allocation13 + $0x228] sm:$0xff]   ;;  %v5862_v57 = vld [vmem:[%s6432_s14] sm:$0xff] }
 0x8df   : > { %5403 = vmatpush3.bf16.msra.mxu1 %v5737_v61  ;;  %5378 = vmatprep.subr.bf16.mxu0 %v5738_v9  ;;  %v7255_v14 = vpack.c.bf16 %v7251_v4, %v3287_v55  ;;  %v5752_v61 = vld [vmem:[#allocation13 + $0x120] sm:$0xff]   ;;  %v3738_v38 = vpack.c.bf16 %v7208_v6, %v7251_v4  ;;  %v5865_v55 = vld [vmem:[%s6432_s14 + $0x10] sm:$0xff]  ;;  %v5866_v4 = vld [vmem:[%s6432_s14 + $0x18] sm:$0xff] }
 0x8e0   : > { %5404 = vmatprep.subr.bf16.mxu1 %v5739_v8 }
 0x8e2   : > { %5379 = vmatpush3.bf16.msra.mxu0 %v5738_v9  ;;  %v5755_v9 = vld [vmem:[#allocation13 + $0x150] sm:$0xff]  }
 0x8e3   : > { %5405 = vmatpush3.bf16.msra.mxu1 %v5739_v8  ;;  %5380 = vmatprep.subr.bf16.mxu0 %v5740_v29  ;;  %v5756_v8 = vld [vmem:[#allocation13 + $0x110] sm:$0xff]  }
 0x8e4   : > { %5406 = vmatprep.subr.bf16.mxu1 %v5741_v30 }
 0x8e6   : > { %5381 = vmatpush3.bf16.msra.mxu0 %v5740_v29  ;;  %v5757_v29 = vld [vmem:[#allocation13 + $0x148] sm:$0xff]  }
 0x8e7   : > { %5407 = vmatpush3.bf16.msra.mxu1 %v5741_v30  ;;  %5382 = vmatprep.subr.bf16.mxu0 %v5742_v63  ;;  %v5760_v30 = vld [vmem:[#allocation13 + $0x100] sm:$0xff]  }
 0x8e8   : > { %5408 = vmatprep.subr.bf16.mxu1 %v5743_v34 }
 0x8ea   : > { %5383 = vmatpush3.bf16.msra.mxu0 %v5742_v63  ;;  %v5761_v63 = vld [vmem:[#allocation13 + $0x1f8] sm:$0xff]  }
 0x8eb   : > { %5409 = vmatpush3.bf16.msra.mxu1 %v5743_v34  ;;  %5384 = vmatprep.subr.bf16.mxu0 %v5744_v24  ;;  %v3736_v34 = vpack.c.bf16 %v7229_v25, %v7224_v13  ;;  %v5771_v13 = vld [vmem:[#allocation13 + $0x1d0] sm:$0xff]   ;;  %v5777_v25 = vld [vmem:[#allocation13 + $0x238] sm:$0xff]  }
 0x8ec   : > { %5442 = vmatprep.subr.bf16.mxu1 %v5745_v40 }
 0x8ee   : > { %5385 = vmatpush3.bf16.msra.mxu0 %v5744_v24  ;;  %5411 = vmatmul.mubr.bf16.vlgmr.msra.gmra.mxu1 %v3442_v19  ;;  %v5762_v24 = vld [vmem:[#allocation13 + $0x1b8] sm:$0xff]  }
 0x8ef   : > { %5414 = vmatprep.mubr.bf16.mxu1 %v3443_v16  ;;  %5443 = vmatpush3.bf16.msra.mxu1 %v5745_v40  ;;  %v3591_v40 = vpack.c.bf16 %v7179_v7, %v7158_v31  ;;  %v5767_v31 = vld [vmem:[#allocation13 + $0x1e0] sm:$0xff]   ;;  %v3592_v7 = vpack.c.bf16 %v7272_v22, %v7182_v37  ;;  %v5769_v19 = vld [vmem:[#allocation13 + $0x1d8] sm:$0xff]   ;;  %v5774_v37 = vld [vmem:[#allocation13 + $0x188] sm:$0xff]  }
 0x8f0   : > { %5418 = vmatprep.subr.bf16.mxu0 %v5746_v53  ;;  %5444 = vmatprep.subr.bf16.mxu1 %v5747_v18  ;;  %v5781_v16 = vld [vmem:[#allocation15 + $0x18] sm:$0xff]  }
 0x8f1   : > { %5387 = vmatmul.mubr.bf16.vlgmr.msra.gmra.mxu0 %v7235_v12 }
 0x8f2   : > { %5390 = vmatprep.mubr.bf16.mxu0 %v7240_v32  ;;  %5419 = vmatpush3.bf16.msra.mxu0 %v5746_v53  ;;  %v5773_v53 = vld [vmem:[#allocation13 + $0x1c8] sm:$0xff]  }
 0x8f3   : > { %5445 = vmatpush3.bf16.msra.mxu1 %v5747_v18  ;;  %5420 = vmatprep.subr.bf16.mxu0 %v5748_v60  ;;  %v5775_v18 = vld [vmem:[#allocation13 + $0x1c0] sm:$0xff]  }
 0x8f4   : > { %5446 = vmatprep.subr.bf16.mxu1 %v5749_v36 }
 0x8f6   : > { %5415 = vmatmul.mubr.bf16.gmra.mxu1 %v3444_v26  ;;  %5421 = vmatpush3.bf16.msra.mxu0 %v5748_v60  ;;  %v5783_v60 = vld [vmem:[#allocation15 + $0x10] sm:$0xff]   ;;  %v5782_v26 = vld [vmem:[#allocation13 + $0x218] sm:$0xff]  }
 0x8f7   : > { %5447 = vmatpush3.bf16.msra.mxu1 %v5749_v36  ;;  %5458 = vmatprep.mubr.bf16.mxu1 %v3735_v39  ;;  %v4020_v36 = vsel %vm1204_vm4, %v2988_v3, %v4019_v23  ;;  %v3877_v3 = vpack.c.bf16 %v5864_v54, %v7184_v45  ;;  %v5867_v45 = vld [vmem:[%s6432_s14 + $0x20] sm:$0xff] }
 0x8f8   : > { %5422 = vmatprep.subr.bf16.mxu0 %v5750_v11  ;;  %5448 = vmatprep.subr.bf16.mxu1 %v5751_v47 }
 0x8f9   : > { %5391 = vmatmul.mubr.bf16.gmra.mxu0 %v7255_v14 }
 0x8fa   : > { %5423 = vmatpush3.bf16.msra.mxu0 %v5750_v11  ;;  %5434 = vmatprep.mubr.bf16.mxu0 %v3589_v33  ;;  %v4319_v11 = vpack.c.bf16 %v5866_v4, %v5865_v55  ;;  %v5869_v33 = vld [vmem:[%s6432_s14 + $0x30] sm:$0xff] }
 0x8fb   : > { %5449 = vmatpush3.bf16.msra.mxu1 %v5751_v47  ;;  %5424 = vmatprep.subr.bf16.mxu0 %v5752_v61  ;;  %v5868_v47 = vld [vmem:[%s6432_s14 + $0x28] sm:$0xff] }
 0x8fc   : > { %5450 = vmatprep.subr.bf16.mxu1 %v5753_v10  ;;  %v4320_v39 = vpack.c.bf16 %v5868_v47, %v5867_v45 }
 0x8fe   : > { %5425 = vmatpush3.bf16.msra.mxu0 %v5752_v61  ;;  %v5784_v61 = vld [vmem:[#allocation13 + $0x210] sm:$0xff]  }
 0x8ff   : > { %5451 = vmatpush3.bf16.msra.mxu1 %v5753_v10  ;;  %5426 = vmatprep.subr.bf16.mxu0 %v5754_v62  ;;  %v5870_v10 = vld [vmem:[%s6432_s14 + $0x38] sm:$0xff] }
 0x900   : > { %5452 = vmatprep.subr.bf16.mxu1 %v5755_v9 }
 0x902   : > { %5427 = vmatpush3.bf16.msra.mxu0 %v5754_v62  ;;  %v4321_v62 = vpack.c.bf16 %v5870_v10, %v5869_v33 }
 0x903   : > { %5453 = vmatpush3.bf16.msra.mxu1 %v5755_v9  ;;  %5428 = vmatprep.subr.bf16.mxu0 %v5756_v8  ;;  %v5788_v9 = vld [vmem:[#allocation13 + $0x200] sm:$0xff]  }
 0x904   : > { %5454 = vmatprep.subr.bf16.mxu1 %v5757_v29 }
 0x906   : > { %5429 = vmatpush3.bf16.msra.mxu0 %v5756_v8 }
 0x907   : > { %5455 = vmatpush3.bf16.msra.mxu1 %v5757_v29  ;;  %5430 = vmatprep.subr.bf16.mxu0 %v5758_v17 }
 0x908   : > { %5456 = vmatprep.subr.bf16.mxu1 %v5759_v35 }
 0x90a   : > { %5431 = vmatpush3.bf16.msra.mxu0 %v5758_v17 }
 0x90b   : > { %5457 = vmatpush3.bf16.msra.mxu1 %v5759_v35  ;;  %5432 = vmatprep.subr.bf16.mxu0 %v5760_v30 }
 0x90c   : > { %5490 = vmatprep.subr.bf16.mxu1 %v5761_v63 }
 0x90e   : > { %5433 = vmatpush3.bf16.msra.mxu0 %v5760_v30  ;;  %5459 = vmatmul.mubr.bf16.vlgmr.msra.gmra.mxu1 %v3736_v34 }
 0x90f   : > { %5462 = vmatprep.mubr.bf16.mxu1 %v3737_v5  ;;  %5491 = vmatpush3.bf16.msra.mxu1 %v5761_v63 }
 0x910   : > { %5466 = vmatprep.subr.bf16.mxu0 %v5762_v24  ;;  %5492 = vmatprep.subr.bf16.mxu1 %v5763_v2 }
 0x911   : > { %5435 = vmatmul.mubr.bf16.vlgmr.msra.gmra.mxu0 %v3590_v28 }
 0x912   : > { %5438 = vmatprep.mubr.bf16.mxu0 %v3591_v40  ;;  %5467 = vmatpush3.bf16.msra.mxu0 %v5762_v24 }
 0x913   : > { %5493 = vmatpush3.bf16.msra.mxu1 %v5763_v2  ;;  %5468 = vmatprep.subr.bf16.mxu0 %v5764_v41 }
 0x914   : > { %5494 = vmatprep.subr.bf16.mxu1 %v5765_v27 }
 0x916   : > { %5463 = vmatmul.mubr.bf16.gmra.mxu1 %v3738_v38  ;;  %5469 = vmatpush3.bf16.msra.mxu0 %v5764_v41 }
 0x917   : > { %5495 = vmatpush3.bf16.msra.mxu1 %v5765_v27  ;;  %5506 = vmatprep.mubr.bf16.mxu1 %v7135_v20  ;;  %v5772_v20 = vld [vmem:[#allocation13 + $0x190] sm:$0xff]  }
 0x918   : > { %5470 = vmatprep.subr.bf16.mxu0 %v5766_v59  ;;  %5496 = vmatprep.subr.bf16.mxu1 %v5767_v31 }
 0x919   : > { %5439 = vmatmul.mubr.bf16.gmra.mxu0 %v3592_v7 }
 0x91a   : > { %5471 = vmatpush3.bf16.msra.mxu0 %v5766_v59  ;;  %5482 = vmatprep.mubr.bf16.mxu0 %v7101_v46  ;;  %v5776_v46 = vld [vmem:[#allocation13 + $0x180] sm:$0xff]  }
 0x91b   : > { %5497 = vmatpush3.bf16.msra.mxu1 %v5767_v31  ;;  %5472 = vmatprep.subr.bf16.mxu0 %v5768_v51 }
 0x91c   : > { %5498 = vmatprep.subr.bf16.mxu1 %v5769_v19 }
 0x91e   : > { %5473 = vmatpush3.bf16.msra.mxu0 %v5768_v51 }
 0x91f   : > { %5499 = vmatpush3.bf16.msra.mxu1 %v5769_v19  ;;  %5474 = vmatprep.subr.bf16.mxu0 %v5770_v49 }
 0x920   : > { %5500 = vmatprep.subr.bf16.mxu1 %v5771_v13 }
 0x922   : > { %5475 = vmatpush3.bf16.msra.mxu0 %v5770_v49 }
 0x923   : > { %5501 = vmatpush3.bf16.msra.mxu1 %v5771_v13  ;;  %5476 = vmatprep.subr.bf16.mxu0 %v5772_v20 }
 0x924   : > { %5502 = vmatprep.subr.bf16.mxu1 %v5773_v53 }
 0x926   : > { %5477 = vmatpush3.bf16.msra.mxu0 %v5772_v20 }
 0x927   : > { %5503 = vmatpush3.bf16.msra.mxu1 %v5773_v53  ;;  %5478 = vmatprep.subr.bf16.mxu0 %v5774_v37 }
 0x928   : > { %5504 = vmatprep.subr.bf16.mxu1 %v5775_v18 }
 0x92a   : > { %5479 = vmatpush3.bf16.msra.mxu0 %v5774_v37 }
 0x92b   : > { %5505 = vmatpush3.bf16.msra.mxu1 %v5775_v18  ;;  %5480 = vmatprep.subr.bf16.mxu0 %v5776_v46 }
 0x92c   : > { %5538 = vmatprep.subr.bf16.mxu1 %v5781_v16 }
 0x92e   : > { %5481 = vmatpush3.bf16.msra.mxu0 %v5776_v46  ;;  %5507 = vmatmul.mubr.bf16.vlgmr.msra.gmra.mxu1 %v7166_v52  ;;  %v5863_v52 = vld [vmem:[%s6432_s14 + $0x8] sm:$0xff]  ;;  %s6061_s14 = scalar_lea.vmem %s6060_s12, 2048 }
 0x92f   : > { %5510 = vmatprep.mubr.bf16.mxu1 %v7198_v56  ;;  %5514 = vmatprep.subr.bf16.mxu0 %v5777_v25  ;;  %v4318_v58 = vpack.c.bf16 %v5863_v52, %v5862_v57  ;;  %v4022_v56 = vpack.c.bf16 %v4020_v36, %v7272_v22  ;;  %p6063_p1 = scmp.lt.s32.totalorder %s6061_s14, %s6055_s0 }
 0x930   : > { %5539 = vmatpush3.bf16.msra.mxu1 %v5781_v16 }
 0x931   : > { %5483 = vmatmul.mubr.bf16.vlgmr.msra.gmra.mxu0 %v7128_v44  ;;  %5540 = vmatprep.subr.bf16.mxu1 %v5783_v60  ;;  %v5787_v44 = vld [vmem:[#allocation15] sm:$0xff]   ;;  %p6064_p3 = por %p6063_p1, %p6062_p5 }
 0x932   : > { %5486 = vmatprep.mubr.bf16.mxu0 %v7176_v48  ;;  %5515 = vmatpush3.bf16.msra.mxu0 %v5777_v25  ;;  %v5780_v48 = vld [vmem:[#allocation13 + $0x220] sm:$0xff]  }
 0x933   : > { %5516 = vmatprep.subr.bf16.mxu0 %v5778_v42  ;;  %p6065_p4 = pnand %p6064_p3, %p6058_p13 }
 0x934   : > { %5541 = vmatpush3.bf16.msra.mxu1 %v5783_v60 }
 0x935   : > { %5542 = vmatprep.subr.bf16.mxu1 %v5785_v0 }
 0x936   : > { %5511 = vmatmul.mubr.bf16.gmra.mxu1 %v4022_v56  ;;  %5517 = vmatpush3.bf16.msra.mxu0 %v5778_v42 }
 0x937   : > { %5518 = vmatprep.subr.bf16.mxu0 %v5779_v1  ;;  %5546 = vmatprep.mubr.msk.bf16.mxu1 %vm656_vm0, %v4318_v58 }
 0x938   : > { %5543 = vmatpush3.bf16.msra.mxu1 %v5785_v0 }
 0x939   : > { %5487 = vmatmul.mubr.bf16.gmra.mxu0 %v3877_v3  ;;  %5544 = vmatprep.subr.bf16.mxu1 %v5787_v44 }
 0x93a   : > { %5519 = vmatpush3.bf16.msra.mxu0 %v5779_v1  ;;  %5530 = vmatprep.mubr.bf16.mxu0 %v7235_v12  ;;  %v5786_v12 = vld [vmem:[#allocation13 + $0x208] sm:$0xff]  }
 0x93b   : > { %5520 = vmatprep.subr.bf16.mxu0 %v5780_v48 }
 0x93c   : > { %5545 = vmatpush3.bf16.msra.mxu1 %v5787_v44 }
 0x93e   : > { %5521 = vmatpush3.bf16.msra.mxu0 %v5780_v48 }
 0x93f   : > { %5522 = vmatprep.subr.bf16.mxu0 %v5782_v26  ;;  %5547 = vmatmul.mubr.msk.bf16.vlgmr.msra.gmra.mxu1 %vm656_vm0, %v4319_v11 }
 0x940   : > { %5550 = vmatprep.mubr.msk.bf16.mxu1 %vm656_vm0, %v4320_v39 }
 0x942   : > { %5523 = vmatpush3.bf16.msra.mxu0 %v5782_v26 }
 0x943   : > { %5524 = vmatprep.subr.bf16.mxu0 %v5784_v61 }
 0x946   : > { %5525 = vmatpush3.bf16.msra.mxu0 %v5784_v61 }
 0x947   : > { %5526 = vmatprep.subr.bf16.mxu0 %v5786_v12  ;;  %5551 = vmatmul.mubr.msk.bf16.gmra.mxu1 %vm656_vm0, %v4321_v62 }
 0x94a   : > { %5527 = vmatpush3.bf16.msra.mxu0 %v5786_v12 }
 0x94b   : > { %5528 = vmatprep.subr.bf16.mxu0 %v5788_v9 }
 0x94e   : > { %5529 = vmatpush3.bf16.msra.mxu0 %v5788_v9 }
 0x951   : > { %5531 = vmatmul.mubr.bf16.vlgmr.msra.gmra.mxu0 %v7240_v32 }
 0x952   : > { %5534 = vmatprep.mubr.bf16.mxu0 %v7255_v14 }
 0x959   : > { %5535 = vmatmul.mubr.bf16.gmra.mxu0 %v4165_v21 }
 0x98e   : > { %v5364_v8 = vpop.f32.mrf.mxu1 }
 0x990   : > { %v3236_v29 = vpop.f32.mrf.mxu1 }
 0x991   : > { %v5340_v17 = vpop.f32.mrf.mxu0 }
 0x992   : > { %v5365_v35 = vpop.f32.mrf.mxu1  ;;  %v3245_v61 = vadd.f32 %v5364_v8, %v5340_v17 }
 0x993   : > { %v3123_v30 = vpop.f32.mrf.mxu0 }
 0x994   : > { %v3239_v63 = vpop.f32.mrf.mxu1  ;;  %v3237_v33 = vadd.f32 %v3236_v29, %v3123_v30 }
 0x995   : > { %v5341_v34 = vpop.f32.mrf.mxu0 }
 0x996   : > { %v7306_v24 = vpop.f32.mrf.mxu1  ;;  %v3248_v9 = vadd.f32 %v5365_v35, %v5341_v34 }
 0x997   : > { %v3126_v2 = vpop.f32.mrf.mxu0 }
 0x998   : > { %v7308_v5 = vpop.f32.mrf.mxu1 }
 0x999   : > { %v5344_v28 = vpop.f32.mrf.mxu0 }
 0x99a   : > { %v7310_v32 = vpop.f32.mrf.mxu1 }
 0x99b   : > { %v3139_v14 = vpop.f32.mrf.mxu0 }
 0x99c   : > { %v7312_v41 = vpop.f32.mrf.mxu1 }
 0x99d   : > { %v7314_v15 = vpop.f32.mrf.mxu0 }
 0x99e   : > { %v3264_v35 = vadd.f32 %v7310_v32, %v7314_v15 }
 0x99f   : > { %v7316_v21 = vpop.f32.mrf.mxu0 }
 0x9ae   : > { %v5412_v6 = vpop.f32.mrf.mxu1 }
 0x9b0   : > { %v3544_v40 = vpop.f32.mrf.mxu1 }
 0x9b1   : > { %v5388_v27 = vpop.f32.mrf.mxu0 }
 0x9b2   : > { %v5413_v50 = vpop.f32.mrf.mxu1  ;;  %v3435_v10 = vadd.f32 %v5388_v27, %v3245_v61 }
 0x9b3   : > { %v3402_v43 = vpop.f32.mrf.mxu0 }
 0x9b4   : > { %v3547_v38 = vpop.f32.mrf.mxu1 }
 0x9b5   : > { %v5389_v22 = vpop.f32.mrf.mxu0 }
 0x9b6   : > { %v7318_v59 = vpop.f32.mrf.mxu1 }
 0x9b7   : > { %v3405_v31 = vpop.f32.mrf.mxu0 }
 0x9b8   : > { %v7320_v7 = vpop.f32.mrf.mxu1 }
 0x9b9   : > { %v5392_v51 = vpop.f32.mrf.mxu0 }
 0x9ba   : > { %v7322_v19 = vpop.f32.mrf.mxu1 }
 0x9bb   : > { %v3418_v49 = vpop.f32.mrf.mxu0 }
 0x9bc   : > { %v7324_v13 = vpop.f32.mrf.mxu1 }
 0x9bd   : > { %v5393_v20 = vpop.f32.mrf.mxu0 }
 0x9bf   : > { %v3421_v37 = vpop.f32.mrf.mxu0 }
 0x9ce   : > { %v5460_v53 = vpop.f32.mrf.mxu1 }
 0x9d0   : > { %v3838_v18 = vpop.f32.mrf.mxu1 }
 0x9d1   : > { %v5436_v46 = vpop.f32.mrf.mxu0 }
 0x9d2   : > { %v5461_v16 = vpop.f32.mrf.mxu1 }
 0x9d3   : > { %v3692_v25 = vpop.f32.mrf.mxu0 }
 0x9d4   : > { %v7326_v23 = vpop.f32.mrf.mxu1 }
 0x9d5   : > { %v5437_v60 = vpop.f32.mrf.mxu0 }
 0x9d6   : > { %v7328_v42 = vpop.f32.mrf.mxu1 }
 0x9d7   : > { %7573 = vst [vmem:[#allocation31_spill] sm:$0xff] %v7328_v42  ;;  %v3695_v36 = vpop.f32.mrf.mxu0 }
 0x9d8   : > { %v7330_v0 = vpop.f32.mrf.mxu1 }
 0x9d9   : > { %7574 = vst [vmem:[#allocation32_spill] sm:$0xff] %v7330_v0  ;;  %v5440_v1 = vpop.f32.mrf.mxu0 }
 0x9da   : > { %v7332_v57 = vpop.f32.mrf.mxu1 }
 0x9db   : > { %7575 = vst [vmem:[#allocation35_spill] sm:$0xff] %v7332_v57  ;;  %v3708_v52 = vpop.f32.mrf.mxu0  ;;  %v3240_v57 = vadd.f32 %v3239_v63, %v3126_v2 }
 0x9dc   : > { %v7334_v58 = vpop.f32.mrf.mxu1 }
 0x9dd   : > { %7576 = vst [vmem:[#allocation34_spill] sm:$0xff] %v7334_v58  ;;  %v5441_v56 = vpop.f32.mrf.mxu0  ;;  %v3433_v58 = vadd.f32 %v3402_v43, %v3237_v33 }
 0x9df   : > { %v7338_v3 = vpop.f32.mrf.mxu0  ;;  %v3575_v42 = vadd.f32 %v3544_v40, %v3433_v58 }
 0x9e0   : > { %7578 = vst [vmem:[#allocation38_spill] sm:$0xff] %v7338_v3  ;;  %v3577_v3 = vadd.f32 %v5412_v6, %v3435_v10 }
 0x9e1   : > { %v3723_v30 = vadd.f32 %v3692_v25, %v3575_v42 }
 0x9ee   : > { %v5508_v44 = vpop.f32.mrf.mxu1 }
 0x9f0   : > { %v7336_v54 = vpop.f32.mrf.mxu1 }
 0x9f1   : > { %7577 = vst [vmem:[#allocation37_spill] sm:$0xff] %v7336_v54  ;;  %v5484_v26 = vpop.f32.mrf.mxu0  ;;  %v3434_v54 = vadd.f32 %v3405_v31, %v3240_v57  ;;  %v3869_v31 = vadd.f32 %v3838_v18, %v3723_v30  ;;  %v7593_v30 = vld [vmem:[#allocation34_spill] sm:$0xff] }
 0x9f2   : > { %v7340_v48 = vpop.f32.mrf.mxu1 }
 0x9f3   : > { %7579 = vst [vmem:[#allocation33_spill] sm:$0xff] %v7340_v48  ;;  %v3977_v11 = vpop.f32.mrf.mxu0  ;;  %v3576_v34 = vadd.f32 %v3547_v38, %v3434_v54 }
 0x9f4   : > { %v7342_v55 = vpop.f32.mrf.mxu1  ;;  %v4008_v32 = vadd.f32 %v3977_v11, %v3869_v31 }
 0x9f5   : > { %7580 = vst [vmem:[#allocation36_spill] sm:$0xff] %v7342_v55  ;;  %v5485_v47 = vpop.f32.mrf.mxu0  ;;  %v3436_v55 = vadd.f32 %v5389_v22, %v3248_v9  ;;  %v3724_v6 = vadd.f32 %v3695_v36, %v3576_v34 }
 0x9f6   : > { %v7344_v4 = vpop.f32.mrf.mxu1 }
 0x9f7   : > { %7581 = vst [vmem:[#allocation39_spill] sm:$0xff] %v7344_v4  ;;  %v3980_v12 = vpop.f32.mrf.mxu0  ;;  %v3261_v4 = vadd.f32 %v7306_v24, %v5344_v28  ;;  %v3578_v27 = vadd.f32 %v5413_v50, %v3436_v55  ;;  %v3256_v24 = vadd.f32 %v7312_v41, %v7316_v21  ;;  %v3440_v28 = vadd.f32 %v5393_v20, %v3264_v35  ;;  %v7365_v21 = vld [vmem:[%s7584_s1] ss:$0 sm:$0xff] }
 0x9f8   : > { %v7346_v45 = vpop.f32.mrf.mxu1 }
 0x9f9   : > { %7582 = vst [vmem:[#allocation25_spill] sm:$0xff] %v7346_v45  ;;  %v5488_v48 = vpop.f32.mrf.mxu0  ;;  %v3725_v45 = vadd.f32 %v5436_v46, %v3577_v3  ;;  %v3439_v8 = vadd.f32 %v5392_v51, %v3261_v4  ;;  %v3726_v2 = vadd.f32 %v5437_v60, %v3578_v27  ;;  %v3438_v51 = vadd.f32 %v3421_v37, %v3256_v24  ;;  %v7585_v60 = vld [vmem:[#allocation31_spill] sm:$0xff] }
 0x9fa   : > { %v7348_v39 = vpop.f32.mrf.mxu1  ;;  %v7590_v4 = vld [vmem:[#allocation33_spill] sm:$0xff] }
 0x9fb   : > { %7583 = vst [vmem:[#allocation27_spill] sm:$0xff] %v7348_v39  ;;  %v3253_v39 = vadd.f32 %v7308_v5, %v3139_v14  ;;  %v3993_v17 = vpop.f32.mrf.mxu0  ;;  %v3871_v43 = vadd.f32 %v5460_v53, %v3725_v45  ;;  %v3581_v40 = vadd.f32 %v7318_v59, %v3439_v8  ;;  %v3872_v15 = vadd.f32 %v5461_v16, %v3726_v2 }
 0x9fc   : > { %v7350_v62 = vpop.f32.mrf.mxu1  ;;  %v3870_v53 = vadd.f32 %v7326_v23, %v3724_v6  ;;  %v3580_v25 = vadd.f32 %v7324_v13, %v3438_v51  ;;  %v7592_v61 = vld [vmem:[#allocation36_spill] sm:$0xff] }
 0x9fd   : > { %v3437_v63 = vadd.f32 %v3418_v49, %v3253_v39  ;;  %v5489_v5 = vpop.f32.mrf.mxu0  ;;  %v4010_v22 = vadd.f32 %v5484_v26, %v3871_v43  ;;  %v3729_v50 = vadd.f32 %v5440_v1, %v3581_v40  ;;  %v3582_v49 = vadd.f32 %v7322_v19, %v3440_v28  ;;  %v7372_v19 = vld [vmem:[%s7586_s15] ss:$0 sm:$0xff] }
 0x9fe   : > { %v4011_v20 = vadd.f32 %v5485_v47, %v3872_v15  ;;  %v7587_v1 = vld [vmem:[#allocation37_spill] sm:$0xff]  ;;  %v7591_v47 = vld [vmem:[#allocation35_spill] sm:$0xff] }
 0x9ff   : > { %v5548_v0 = vpop.f32.mrf.mxu1  ;;  %v3579_v46 = vadd.f32 %v7320_v7, %v3437_v63  ;;  %v3996_v41 = vpop.f32.mrf.mxu0  ;;  %v4155_v18 = vadd.f32 %v5508_v44, %v4010_v22  ;;  %v3730_v37 = vadd.f32 %v5441_v56, %v3582_v49  ;;  %v4009_v7 = vadd.f32 %v3980_v12, %v3870_v53  ;;  %v7589_v56 = vld [vmem:[#allocation32_spill] sm:$0xff]  ;;  %v7594_v34 = vld [vmem:[#allocation39_spill] sm:$0xff] }
 0xa00   : > { %v3875_v16 = vadd.f32 %v7585_v60, %v3729_v50  ;;  %v4416_v42 = vadd.f32 %v5548_v0, %v7365_v21  ;;  %v4153_v57 = vadd.f32 %v7587_v1, %v4008_v32  ;;  %v4156_v11 = vadd.f32 %v7590_v4, %v4011_v20 }
 0xa01   : > { %v4407_v29 = vpop.f32.mrf.mxu1  ;;  %v3727_v38 = vadd.f32 %v3708_v52, %v3579_v46  ;;  %v7588_v52 = vld [vmem:[#allocation38_spill] sm:$0xff]  ;;  %v3876_v39 = vadd.f32 %v7591_v47, %v3730_v37  ;;  %v4154_v12 = vadd.f32 %v7592_v61, %v4009_v7 }
 0xa02   : > { %v3728_v58 = vadd.f32 %v7588_v52, %v3580_v25  ;;  %v4014_v44 = vadd.f32 %v5488_v48, %v3875_v16  ;;  %v4408_v33 = vadd.f32 %v7365_v21, %v4407_v29  ;;  %v7596_v53 = vld [vmem:[#allocation27_spill] sm:$0xff] }
 0xa03   : > { %v5549_v14 = vpop.f32.mrf.mxu1  ;;  %v3873_v54 = vadd.f32 %v7589_v56, %v3727_v38  ;;  %v4015_v8 = vadd.f32 %v5489_v5, %v3876_v39  ;;  %v7595_v5 = vld [vmem:[#allocation25_spill] sm:$0xff] }
 0xa04   : > { %v3874_v27 = vadd.f32 %v7593_v30, %v3728_v58  ;;  %v4159_v2 = vadd.f32 %v7594_v34, %v4014_v44 }
 0xa05   : > { %v4410_v59 = vpop.f32.mrf.mxu1  ;;  %v4012_v45 = vadd.f32 %v3993_v17, %v3873_v54  ;;  %v4419_v17 = vadd.f32 %v5549_v14, %v7365_v21 }
 0xa06   : > { %v4013_v28 = vadd.f32 %v3996_v41, %v3874_v27  ;;  %v4411_v6 = vadd.f32 %v7365_v21, %v4410_v59  ;;  %v4160_v41 = vadd.f32 %v7596_v53, %v4015_v8 }
 0xa07   : > { %v5552_v3 = vpop.f32.mrf.mxu1  ;;  %v4157_v22 = vadd.f32 %v7595_v5, %v4012_v45 }
 0xa08   : > { %v4432_v51 = vadd.f32 %v5552_v3, %v7365_v21  ;;  %v4158_v20 = vadd.f32 %v7350_v62, %v4013_v28 }
 0xa09   : > { %v4423_v63 = vpop.f32.mrf.mxu1 }
 0xa0b   : > { %v5553_v32 = vpop.f32.mrf.mxu1 }
 0xa0d   : > { %v4426_v60 = vpop.f32.mrf.mxu1 }
 0xa0e   : > { %v4427_v1 = vadd.f32 %v7365_v21, %v4426_v60 }
 0xa11   : > { %v5532_v23 = vpop.f32.mrf.mxu0 }
 0xa12   : > { %v4298_v36 = vadd.f32 %v5532_v23, %v4155_v18  ;;  %v4424_v18 = vadd.f32 %v7365_v21, %v4423_v63  ;;  %v4435_v23 = vadd.f32 %v5553_v32, %v7365_v21 }
 0xa13   : > { %v4265_v13 = vpop.f32.mrf.mxu0 }
 0xa14   : > { %v4312_v26 = vadd.f32 %v7372_v19, %v4298_v36  ;;  %v4296_v55 = vadd.f32 %v4265_v13, %v4153_v57 }
 0xa15   : > { %v5533_v0 = vpop.f32.mrf.mxu0 }
 0xa16   : > { %v4440_v10 = vadd.f32 %v4416_v42, %v4312_v26  ;;  %v4310_v48 = vadd.f32 %v7372_v19, %v4296_v55  ;;  %v4299_v9 = vadd.f32 %v5533_v0, %v4156_v11 }
 0xa17   : > { %v4268_v35 = vpop.f32.mrf.mxu0 }
 0xa18   : > { %4448 = vst [vmem:[%s7388_s30 + $0x10] sm:$0xff] %v4440_v10  ;;  %v4438_v29 = vadd.f32 %v4408_v33, %v4310_v48  ;;  %v4313_v43 = vadd.f32 %v7372_v19, %v4299_v9  ;;  %v4297_v24 = vadd.f32 %v4268_v35, %v4154_v12 }
 0xa19   : > { %v5536_v40 = vpop.f32.mrf.mxu0 }
 0xa1a   : > { %4446 = vst [vmem:[%s7388_s30] sm:$0xff] %v4438_v29  ;;  %v4441_v31 = vadd.f32 %v4419_v17, %v4313_v43  ;;  %v4311_v50 = vadd.f32 %v7372_v19, %v4297_v24  ;;  %v4302_v46 = vadd.f32 %v5536_v40, %v4159_v2 }
 0xa1b   : > { %v4281_v14 = vpop.f32.mrf.mxu0 }
 0xa1c   : > { %4449 = vst [vmem:[%s7388_s30 + $0x18] sm:$0xff] %v4441_v31  ;;  %v4439_v15 = vadd.f32 %v4411_v6, %v4311_v50  ;;  %v4316_v38 = vadd.f32 %v7372_v19, %v4302_v46  ;;  %v4300_v49 = vadd.f32 %v4281_v14, %v4157_v22 }
 0xa1d   : > { %v5537_v59 = vpop.f32.mrf.mxu0 }
 0xa1e   : > { %4447 = vst [vmem:[%s7388_s30 + $0x8] sm:$0xff] %v4439_v15  ;;  %v4444_v37 = vadd.f32 %v4432_v51, %v4316_v38  ;;  %v4314_v25 = vadd.f32 %v7372_v19, %v4300_v49  ;;  %v4303_v7 = vadd.f32 %v5537_v59, %v4160_v41 }
 0xa1f   : > { %v4284_v16 = vpop.f32.mrf.mxu0 }
 0xa20   : > { %4452 = vst [vmem:[%s7388_s30 + $0x30] sm:$0xff] %v4444_v37  ;;  %v4442_v42 = vadd.f32 %v4424_v18, %v4314_v25  ;;  %v4317_v36 = vadd.f32 %v7372_v19, %v4303_v7  ;;  %v4301_v62 = vadd.f32 %v4284_v16, %v4158_v20 }
 0xa22   : > { %4450 = vst [vmem:[%s7388_s30 + $0x20] sm:$0xff] %v4442_v42  ;;  %v4445_v57 = vadd.f32 %v4435_v23, %v4317_v36  ;;  %v4315_v52 = vadd.f32 %v7372_v19, %v4301_v62 }
 0xa24   : > { %4453 = vst [vmem:[%s7388_s30 + $0x38] sm:$0xff] %v4445_v57  ;;  %v4443_v58 = vadd.f32 %v4427_v1, %v4315_v52 }
 0xa26   : > { %4451 = vst [vmem:[%s7388_s30 + $0x28] sm:$0xff] %v4443_v58 }
 0xa27   : > { %6068 = shalt.err (!%p6065_p4)
}
 0xa28   : > { %s6069_s28 = scalar_lea.hbm %s7416_s4, 1024  ;;  %s6073_s16 = scalar_lea.hbm %s7597_s20, 2048 }
 0xa29   : > { %p6070_p6 = scmp.ne.s32.totalorder %s7416_s4, %s6069_s28  ;;  %p6074_p7 = scmp.lt.s32.totalorder %s7416_s4, %s7597_s20 }
 0xa2a   : > { %p6075_p2 = scmp.lt.s32.totalorder %s6073_s16, %s6069_s28 }
 0xa2b   : > { %p6071_p12 = pnand %p6070_p6, %p7598_p10 }
 0xa2c   : > { %p6076_p9 = por %p6075_p2, %p6074_p7 }
 0xa2d   : > { %p6072_p0 = pneg %p6071_p12 }
 0xa2f   : > { %p6077_p8 = pnand %p6076_p9, %p6072_p0 }
 0xa31   : > { %6080 = shalt.err (!%p6077_p8)
}
 0xa32   : > { %s6147_s19 = smov 128   ;;  %s6148_s29 = smov 8  }
 0xa33   : > { %5580 = dma.vmem_to_hbm [thread:$0]  (%p7598_p10), %s7418_s26, 1024, %s7416_s4, %s4455_s27, %s6147_s19, %s6147_s19, %s6148_s29  }
 0xa34 PF: > { %s4483_s25 = sand.u32 1, %s6119_s21   ;;  %p7599_p11 = scmp.ne.s32.totalorder %s7532_s17, 0 }
 0xa35   : > { %p7600_p13 = scmp.ge.s32.totalorder %s6131_s24, 2  ;;  %s4484_s0 = scalar_lea.sflag [#allocation6], %s4483_s25 }
 0xa37   : > { %p5606_p5 = pnand %p7600_p13, %p7599_p11 }
 0xa39   : > { %p5607_p1 = pneg %p5606_p5 }
 0xa3b   : > { %6114 = dma.done.wait (%p5607_p1), %s4484_s0, 1024  }
 0xa3c   : > { %6116 = vsyncadd (%p5607_p1), %s4484_s0, 4294966272  ;;  %s7601_s24 = sld [smem:[#allocation23_spill]]  ;;  %s7604_s21 = smov %s6123_s22 }
 0xa3d   : > { %s7602_s9 = sld [smem:[#allocation22_spill]] }
 0xa3e   : > { %s7603_s23 = sld [smem:[#allocation24_spill]] }
 0xa42   : > { %p32_p3 = scmp.ge.s32.totalorder %s7601_s24, 4  }
 0xa43   : > { %s7605_s22 = smov %s7602_s9 }
 0xa44   :  { %34 = sbr.rel (!%p32_p3) target bundleno = 19 (0x13), region = 174 }
 0xa49   :  { %4489 = vsyncpa [#allocation5], 1 }
 0xa4a   :  { %4491 = vsyncpa [#allocation5 + $0x1], 1 }
 0xa4b   :  { %4492 = vsyncpa [#allocation8], 1 }
 0xa4c   :  { %4493 = vsyncpa [#allocation11], 1 }
 0xa4d   :  { %4494 = vsyncpa [#allocation14], 1 }
 0xa4e   :  { %4495 = vsyncpa [#allocation6], 1 }
 0xa4f   :  { %4497 = vsyncpa [#allocation6 + $0x1], 1 }

</bundles_post_ra>
